<compile_context>
chip_gen: v6e
topology: v6e:2x2x1
jax: 0.10.0
libtpu: 0.0.40
codegen_flags: <defaults>
</compile_context>

<pallas_src>
import jax
import jax.numpy as jnp
from jax.experimental import pallas as pl
from jax.experimental.pallas import tpu as pltpu


# --------------------------- model configuration ---------------------------
VOCAB = 128
HIDDEN = 128                      # multiple of 128 -> lane-dense tiles
N_HEADS = 4
HEAD_DIM = HIDDEN // N_HEADS      # 32
N_LAYERS = 2
INTERMEDIATE = 512                # multiple of 128
MAX_POS = 64
LN_EPS = 1e-12
MASK_BIAS = -1e9
ATTN_SCALE = 1.0 / float(HEAD_DIM) ** 0.5


# ------------------------------ in-kernel math ------------------------------
def _mm(x, w):
    # bf16 operands (MXU-native on v6e/v7x), f32 accumulation.
    return jnp.dot(x.astype(jnp.bfloat16), w.astype(jnp.bfloat16),
                   preferred_element_type=jnp.float32)


def _gelu(x):
    # tanh-approximation GELU (EUP tanh + VPU mults).
    # TODO(synk): HF BERT's default is erf-based GELU; tanh approx differs slightly.
    c = 0.7978845608028654  # sqrt(2/pi)
    return 0.5 * x * (1.0 + jnp.tanh(c * (x + 0.044715 * x * x * x)))


def _ln(x, g, b):
    mu = jnp.mean(x, axis=-1, keepdims=True)
    var = jnp.mean(jnp.square(x - mu), axis=-1, keepdims=True)
    return (x - mu) * jax.lax.rsqrt(var + LN_EPS) * g + b


# ------------------------------- fused kernel -------------------------------
def _bert_kernel(emb_ref, bias_ref, emb_g_ref, emb_b_ref,
                 wqkv_ref, bqkv_ref, wo_ref, bo_ref, ln1g_ref, ln1b_ref,
                 w1_ref, b1_ref, w2_ref, b2_ref, ln2g_ref, ln2b_ref,
                 poolw_ref, poolb_ref, o_ref):
    """One grid step = one sequence: embeddings LN -> N_LAYERS blocks -> pooler."""
    h = emb_ref[0].astype(jnp.float32)                      # (S, H)
    bias = bias_ref[0].astype(jnp.float32)                  # (1, S) additive mask

    # Embedding LayerNorm.
    h = _ln(h, emb_g_ref[...].astype(jnp.float32), emb_b_ref[...].astype(jnp.float32))

    for li in range(N_LAYERS):                               # static unrolled loop
        # ---- self-attention --------------------------------------------------
        qkv = _mm(h, wqkv_ref[li]) + bqkv_ref[li].astype(jnp.float32)   # (S, 3H)
        q = qkv[:, :HIDDEN]
        k = qkv[:, HIDDEN:2 * HIDDEN]
        v = qkv[:, 2 * HIDDEN:]

        ctx_heads = []
        for hh in range(N_HEADS):                            # static per-head loop
            lo = hh * HEAD_DIM
            hi = lo + HEAD_DIM
            qh = q[:, lo:hi].astype(jnp.bfloat16)            # (S, DH)
            kh = k[:, lo:hi].astype(jnp.bfloat16)
            vh = v[:, lo:hi].astype(jnp.bfloat16)
            # q @ k^T without explicit transpose (contract last dims).
            s = jax.lax.dot_general(qh, kh, (((1,), (1,)), ((), ())),
                                    preferred_element_type=jnp.float32)
            s = s * ATTN_SCALE + bias                        # (S, S) + (1, S)
            s = s - jnp.max(s, axis=-1, keepdims=True)
            p = jnp.exp(s)
            p = p * pl.reciprocal(jnp.sum(p, axis=-1, keepdims=True), approx=True)
            ctx_heads.append(jnp.dot(p.astype(jnp.bfloat16), vh,
                                     preferred_element_type=jnp.float32))
        ctx = jnp.concatenate(ctx_heads, axis=-1)            # (S, H), lane-dense

        attn_out = _mm(ctx, wo_ref[li]) + bo_ref[li].astype(jnp.float32)
        h = _ln(attn_out + h,
                ln1g_ref[li].astype(jnp.float32), ln1b_ref[li].astype(jnp.float32))

        # ---- feed-forward ----------------------------------------------------
        ff = _gelu(_mm(h, w1_ref[li]) + b1_ref[li].astype(jnp.float32))  # (S, I)
        ff = _mm(ff, w2_ref[li]) + b2_ref[li].astype(jnp.float32)        # (S, H)
        h = _ln(ff + h,
                ln2g_ref[li].astype(jnp.float32), ln2b_ref[li].astype(jnp.float32))

    # ---- pooler: tanh(W_pool @ hidden[:, 0] + b_pool) -------------------------
    cls = h[0:1, :]                                          # (1, H)
    pooled = jnp.tanh(_mm(cls, poolw_ref[...]) + poolb_ref[...].astype(jnp.float32))
    o_ref[0] = pooled.astype(o_ref.dtype)


# ------------------------------- BERT forward --------------------------------
def bert_forward(params, inputs):
    """Mirror of the PyTorch module's forward: split ids / attention_mask from
    the packed `inputs`, run the encoder, return pooler_output (B, HIDDEN)."""
    B, L = inputs.shape
    S = L // 2
    input_ids = inputs[:, :S]
    attention_mask = inputs[:, S:]

    # Embeddings (word + position + token-type).
    # TODO(synk): the embedding-table gather is data-dependent; kept in XLA.
    tok = jnp.take(params["word_emb"], input_ids, axis=0)            # (B, S, H)
    pos = params["pos_emb"][:S][None, :, :]                          # (1, S, H)
    typ = params["type_emb"][0][None, None, :]                       # (1, 1, H)
    emb = tok + pos + typ                                            # (B, S, H)

    # Additive attention-mask bias, one row per sequence: (B, 1, S).
    bias = ((1.0 - attention_mask.astype(jnp.float32)) * MASK_BIAS)[:, None, :]

    operands = (
        emb, bias,
        params["emb_ln_g"], params["emb_ln_b"],
        params["wqkv"], params["bqkv"], params["wo"], params["bo"],
        params["ln1_g"], params["ln1_b"],
        params["w1"], params["b1"], params["w2"], params["b2"],
        params["ln2_g"], params["ln2_b"],
        params["pool_w"], params["pool_b"],
    )

    def full_spec(arr):
        nd = arr.ndim
        return pl.BlockSpec(arr.shape, lambda b, _nd=nd: (0,) * _nd)

    in_specs = [
        pl.BlockSpec((1, S, HIDDEN), lambda b: (b, 0, 0)),   # emb
        pl.BlockSpec((1, 1, S), lambda b: (b, 0, 0)),        # mask bias
    ] + [full_spec(a) for a in operands[2:]]                 # weights (resident)

    out_specs = pl.BlockSpec((1, 1, HIDDEN), lambda b: (b, 0, 0))

    # Advisory cost estimate for XLA's scheduler (tiny, dispatch-bound regime).
    M = B * S
    flops_layer = (2 * M * HIDDEN * 3 * HIDDEN
                   + 2 * 2 * B * N_HEADS * S * S * HEAD_DIM
                   + 2 * M * HIDDEN * HIDDEN
                   + 2 * 2 * M * HIDDEN * INTERMEDIATE)
    flops = N_LAYERS * flops_layer + 2 * B * HIDDEN * HIDDEN
    transcendentals = (N_LAYERS * (B * N_HEADS * S * S + M * INTERMEDIATE)
                       + B * HIDDEN)
    bytes_accessed = (sum(int(a.size) * a.dtype.itemsize for a in operands)
                      + B * HIDDEN * 4)

    out = pl.pallas_call(
        _bert_kernel,
        out_shape=jax.ShapeDtypeStruct((B, 1, HIDDEN), jnp.float32),
        grid_spec=pltpu.PrefetchScalarGridSpec(
            num_scalar_prefetch=0,
            grid=(B,),
            in_specs=in_specs,
            out_specs=out_specs,
        ),
        compiler_params=pltpu.CompilerParams(
            dimension_semantics=("parallel",)),
        cost_estimate=pl.CostEstimate(flops=int(flops),
                                      transcendentals=int(transcendentals),
                                      bytes_accessed=int(bytes_accessed)),
    )(*operands)
    return out.reshape(B, HIDDEN)


# --------------------------------- params ------------------------------------
def init_params(key, dtype=jnp.float32):
    keys = jax.random.split(key, 4 + N_LAYERS)

    def normal(k, shape):
        return (0.02 * jax.random.normal(k, shape, dtype=jnp.float32)).astype(dtype)

    # Per-layer weights are stacked along a leading layer axis so the fused
    # kernel receives a small, fixed operand list and indexes layers statically.
    wqkv, bqkv, wo, bo = [], [], [], []
    ln1g, ln1b, w1, b1, w2, b2, ln2g, ln2b = [], [], [], [], [], [], [], []
    for li in range(N_LAYERS):
        lk = jax.random.split(keys[4 + li], 4)
        wqkv.append(normal(lk[0], (HIDDEN, 3 * HIDDEN)))
        bqkv.append(jnp.zeros((1, 3 * HIDDEN), dtype))
        wo.append(normal(lk[1], (HIDDEN, HIDDEN)))
        bo.append(jnp.zeros((1, HIDDEN), dtype))
        ln1g.append(jnp.ones((1, HIDDEN), dtype))
        ln1b.append(jnp.zeros((1, HIDDEN), dtype))
        w1.append(normal(lk[2], (HIDDEN, INTERMEDIATE)))
        b1.append(jnp.zeros((1, INTERMEDIATE), dtype))
        w2.append(normal(lk[3], (INTERMEDIATE, HIDDEN)))
        b2.append(jnp.zeros((1, HIDDEN), dtype))
        ln2g.append(jnp.ones((1, HIDDEN), dtype))
        ln2b.append(jnp.zeros((1, HIDDEN), dtype))

    return {
        "word_emb": normal(keys[0], (VOCAB, HIDDEN)),
        "pos_emb": normal(keys[1], (MAX_POS, HIDDEN)),
        "type_emb": normal(keys[2], (2, HIDDEN)),
        "emb_ln_g": jnp.ones((1, HIDDEN), dtype),
        "emb_ln_b": jnp.zeros((1, HIDDEN), dtype),
        "wqkv": jnp.stack(wqkv), "bqkv": jnp.stack(bqkv),
        "wo": jnp.stack(wo), "bo": jnp.stack(bo),
        "ln1_g": jnp.stack(ln1g), "ln1_b": jnp.stack(ln1b),
        "w1": jnp.stack(w1), "b1": jnp.stack(b1),
        "w2": jnp.stack(w2), "b2": jnp.stack(b2),
        "ln2_g": jnp.stack(ln2g), "ln2_b": jnp.stack(ln2b),
        "pool_w": normal(keys[3], (HIDDEN, HIDDEN)),
        "pool_b": jnp.zeros((1, HIDDEN), dtype),
    }


# ----------------------------------- main ------------------------------------
if __name__ == "__main__":
    key = jax.random.PRNGKey(0)
    k_param, k_ids = jax.random.split(key)
    params = init_params(k_param)

    B, S = 2, 8
    input_ids = jax.random.randint(k_ids, (B, S), 0, VOCAB, dtype=jnp.int32)
    attention_mask = jnp.ones((B, S), dtype=jnp.int32)
    attention_mask = attention_mask.at[1, 6:].set(0)   # ragged second example
    # Packed layout matching the PyTorch module: [ids | attention_mask].
    inputs = jnp.concatenate([input_ids, attention_mask], axis=1)  # (B, 2*S)

    feats = jax.jit(bert_forward)(params, inputs)
    feats = jax.block_until_ready(feats)

    assert feats.shape == (B, HIDDEN), feats.shape
    assert feats.dtype == jnp.float32
    assert bool(jnp.all(jnp.isfinite(feats)))
    print("KERNEL_OK")
</pallas_src>

<mosaic_0001>
module attributes {stable_mosaic.version = 11 : i64} {
  func.func @_bert_kernel(%arg0: i32, %arg1: memref<1x8x128xf32, #tpu.memory_space<vmem>>, %arg2: memref<1x1x8xf32, #tpu.memory_space<vmem>>, %arg3: memref<1x128xf32, #tpu.memory_space<vmem>>, %arg4: memref<1x128xf32, #tpu.memory_space<vmem>>, %arg5: memref<2x128x384xf32, #tpu.memory_space<vmem>>, %arg6: memref<2x1x384xf32, #tpu.memory_space<vmem>>, %arg7: memref<2x128x128xf32, #tpu.memory_space<vmem>>, %arg8: memref<2x1x128xf32, #tpu.memory_space<vmem>>, %arg9: memref<2x1x128xf32, #tpu.memory_space<vmem>>, %arg10: memref<2x1x128xf32, #tpu.memory_space<vmem>>, %arg11: memref<2x128x512xf32, #tpu.memory_space<vmem>>, %arg12: memref<2x1x512xf32, #tpu.memory_space<vmem>>, %arg13: memref<2x512x128xf32, #tpu.memory_space<vmem>>, %arg14: memref<2x1x128xf32, #tpu.memory_space<vmem>>, %arg15: memref<2x1x128xf32, #tpu.memory_space<vmem>>, %arg16: memref<2x1x128xf32, #tpu.memory_space<vmem>>, %arg17: memref<128x128xf32, #tpu.memory_space<vmem>>, %arg18: memref<1x128xf32, #tpu.memory_space<vmem>>, %arg19: memref<1x1x128xf32, #tpu.memory_space<vmem>>) attributes {dimension_semantics = [#tpu.dimension_semantics<parallel>], iteration_bounds = array<i64: 2>, scalar_prefetch = 0 : i64, scratch_operands = 0 : i64, tpu.core_type = #tpu.core_type<tc>, window_params = [{transform_indices = @transform_0, window_bounds = array<i64: 1, 8, 128>}, {transform_indices = @transform_1, window_bounds = array<i64: 1, 1, 8>}, {pipeline_mode = #tpu.pipeline_mode<synchronous>, transform_indices = @transform_2, window_bounds = array<i64: 1, 128>}, {pipeline_mode = #tpu.pipeline_mode<synchronous>, transform_indices = @transform_3, window_bounds = array<i64: 1, 128>}, {pipeline_mode = #tpu.pipeline_mode<synchronous>, transform_indices = @transform_4, window_bounds = array<i64: 2, 128, 384>}, {pipeline_mode = #tpu.pipeline_mode<synchronous>, transform_indices = @transform_5, window_bounds = array<i64: 2, 1, 384>}, {pipeline_mode = #tpu.pipeline_mode<synchronous>, transform_indices = @transform_6, window_bounds = array<i64: 2, 128, 128>}, {pipeline_mode = #tpu.pipeline_mode<synchronous>, transform_indices = @transform_7, window_bounds = array<i64: 2, 1, 128>}, {pipeline_mode = #tpu.pipeline_mode<synchronous>, transform_indices = @transform_8, window_bounds = array<i64: 2, 1, 128>}, {pipeline_mode = #tpu.pipeline_mode<synchronous>, transform_indices = @transform_9, window_bounds = array<i64: 2, 1, 128>}, {pipeline_mode = #tpu.pipeline_mode<synchronous>, transform_indices = @transform_10, window_bounds = array<i64: 2, 128, 512>}, {pipeline_mode = #tpu.pipeline_mode<synchronous>, transform_indices = @transform_11, window_bounds = array<i64: 2, 1, 512>}, {pipeline_mode = #tpu.pipeline_mode<synchronous>, transform_indices = @transform_12, window_bounds = array<i64: 2, 512, 128>}, {pipeline_mode = #tpu.pipeline_mode<synchronous>, transform_indices = @transform_13, window_bounds = array<i64: 2, 1, 128>}, {pipeline_mode = #tpu.pipeline_mode<synchronous>, transform_indices = @transform_14, window_bounds = array<i64: 2, 1, 128>}, {pipeline_mode = #tpu.pipeline_mode<synchronous>, transform_indices = @transform_15, window_bounds = array<i64: 2, 1, 128>}, {pipeline_mode = #tpu.pipeline_mode<synchronous>, transform_indices = @transform_16, window_bounds = array<i64: 128, 128>}, {pipeline_mode = #tpu.pipeline_mode<synchronous>, transform_indices = @transform_17, window_bounds = array<i64: 1, 128>}, {transform_indices = @transform_18, window_bounds = array<i64: 1, 1, 128>}]} {
    %c0 = arith.constant 0 : index
    %c0_0 = arith.constant 0 : index
    %c0_1 = arith.constant 0 : index
    %0 = vector.load %arg1[%c0, %c0_0, %c0_1] : memref<1x8x128xf32, #tpu.memory_space<vmem>>, vector<1x8x128xf32>
    %1 = vector.shape_cast %0 : vector<1x8x128xf32> to vector<8x128xf32>
    %c0_2 = arith.constant 0 : index
    %c0_3 = arith.constant 0 : index
    %c0_4 = arith.constant 0 : index
    %2 = vector.load %arg2[%c0_2, %c0_3, %c0_4] : memref<1x1x8xf32, #tpu.memory_space<vmem>>, vector<1x1x8xf32>
    %3 = vector.shape_cast %2 : vector<1x1x8xf32> to vector<1x8xf32>
    %c0_5 = arith.constant 0 : index
    %c0_6 = arith.constant 0 : index
    %4 = vector.load %arg3[%c0_5, %c0_6] : memref<1x128xf32, #tpu.memory_space<vmem>>, vector<1x128xf32>
    %c0_7 = arith.constant 0 : index
    %c0_8 = arith.constant 0 : index
    %5 = vector.load %arg4[%c0_7, %c0_8] : memref<1x128xf32, #tpu.memory_space<vmem>>, vector<1x128xf32>
    %cst = arith.constant dense<0.000000e+00> : vector<8xf32>
    %6 = vector.multi_reduction <add>, %1, %cst [1] : vector<8x128xf32> to vector<8xf32>
    %7 = vector.shape_cast %6 : vector<8xf32> to vector<8x1xf32>
    %cst_9 = arith.constant 1.280000e+02 : f32
    %8 = vector.broadcast %cst_9 : f32 to vector<8x1xf32>
    %9 = arith.divf %7, %8 : vector<8x1xf32>
    %10 = vector.broadcast %9 : vector<8x1xf32> to vector<8x128xf32>
    %11 = arith.subf %1, %10 : vector<8x128xf32>
    %12 = arith.mulf %11, %11 : vector<8x128xf32>
    %cst_10 = arith.constant dense<0.000000e+00> : vector<8xf32>
    %13 = vector.multi_reduction <add>, %12, %cst_10 [1] : vector<8x128xf32> to vector<8xf32>
    %14 = vector.shape_cast %13 : vector<8xf32> to vector<8x1xf32>
    %cst_11 = arith.constant 1.280000e+02 : f32
    %15 = vector.broadcast %cst_11 : f32 to vector<8x1xf32>
    %16 = arith.divf %14, %15 : vector<8x1xf32>
    %17 = vector.broadcast %9 : vector<8x1xf32> to vector<8x128xf32>
    %18 = arith.subf %1, %17 : vector<8x128xf32>
    %cst_12 = arith.constant 9.99999996E-13 : f32
    %19 = vector.broadcast %cst_12 : f32 to vector<8x1xf32>
    %20 = arith.addf %16, %19 : vector<8x1xf32>
    %21 = math.rsqrt %20 : vector<8x1xf32>
    %22 = vector.broadcast %21 : vector<8x1xf32> to vector<8x128xf32>
    %23 = arith.mulf %18, %22 : vector<8x128xf32>
    %24 = vector.broadcast %4 : vector<1x128xf32> to vector<8x128xf32>
    %25 = arith.mulf %23, %24 : vector<8x128xf32>
    %26 = vector.broadcast %5 : vector<1x128xf32> to vector<8x128xf32>
    %27 = arith.addf %25, %26 : vector<8x128xf32>
    %c0_13 = arith.constant 0 : index
    %c0_14 = arith.constant 0 : index
    %c0_15 = arith.constant 0 : index
    %28 = vector.load %arg5[%c0_13, %c0_14, %c0_15] : memref<2x128x384xf32, #tpu.memory_space<vmem>>, vector<1x128x384xf32>
    %29 = vector.shape_cast %28 : vector<1x128x384xf32> to vector<128x384xf32>
    %30 = arith.truncf %27 : vector<8x128xf32> to vector<8x128xbf16>
    %31 = arith.truncf %29 : vector<128x384xf32> to vector<128x384xbf16>
    %cst_16 = arith.constant dense<0.000000e+00> : vector<8x384xf32>
    %32 = tpu.matmul %30, %31, %cst_16 {dimension_numbers = #tpu.dot_dimension_numbers<[1], [0], [0], [1], [0, 0, 1, 1], [], []>} : vector<8x128xbf16>, vector<128x384xbf16>, vector<8x384xf32> -> vector<8x384xf32>
    %c0_17 = arith.constant 0 : index
    %c0_18 = arith.constant 0 : index
    %c0_19 = arith.constant 0 : index
    %33 = vector.load %arg6[%c0_17, %c0_18, %c0_19] : memref<2x1x384xf32, #tpu.memory_space<vmem>>, vector<1x1x384xf32>
    %34 = vector.shape_cast %33 : vector<1x1x384xf32> to vector<1x384xf32>
    %35 = vector.broadcast %34 : vector<1x384xf32> to vector<8x384xf32>
    %36 = arith.addf %32, %35 : vector<8x384xf32>
    %37 = vector.extract_strided_slice %36 {offsets = [0, 0], sizes = [8, 128], strides = [1, 1]} : vector<8x384xf32> to vector<8x128xf32>
    %38 = vector.extract_strided_slice %36 {offsets = [0, 128], sizes = [8, 128], strides = [1, 1]} : vector<8x384xf32> to vector<8x128xf32>
    %39 = vector.extract_strided_slice %36 {offsets = [0, 256], sizes = [8, 128], strides = [1, 1]} : vector<8x384xf32> to vector<8x128xf32>
    %40 = vector.extract_strided_slice %37 {offsets = [0, 0], sizes = [8, 32], strides = [1, 1]} : vector<8x128xf32> to vector<8x32xf32>
    %41 = arith.truncf %40 : vector<8x32xf32> to vector<8x32xbf16>
    %42 = vector.extract_strided_slice %38 {offsets = [0, 0], sizes = [8, 32], strides = [1, 1]} : vector<8x128xf32> to vector<8x32xf32>
    %43 = arith.truncf %42 : vector<8x32xf32> to vector<8x32xbf16>
    %44 = vector.extract_strided_slice %39 {offsets = [0, 0], sizes = [8, 32], strides = [1, 1]} : vector<8x128xf32> to vector<8x32xf32>
    %45 = arith.truncf %44 : vector<8x32xf32> to vector<8x32xbf16>
    %cst_20 = arith.constant dense<0.000000e+00> : vector<8x8xf32>
    %46 = tpu.matmul %41, %43, %cst_20 {dimension_numbers = #tpu.dot_dimension_numbers<[1], [1], [0], [0], [0, 0, 1, 0], [], []>} : vector<8x32xbf16>, vector<8x32xbf16>, vector<8x8xf32> -> vector<8x8xf32>
    %cst_21 = arith.constant 0.176776692 : f32
    %47 = vector.broadcast %cst_21 : f32 to vector<8x8xf32>
    %48 = arith.mulf %46, %47 : vector<8x8xf32>
    %49 = vector.broadcast %3 : vector<1x8xf32> to vector<8x8xf32>
    %50 = arith.addf %48, %49 : vector<8x8xf32>
    %cst_22 = arith.constant dense<0xFF800000> : vector<8xf32>
    %51 = vector.multi_reduction <maximumf>, %50, %cst_22 [1] : vector<8x8xf32> to vector<8xf32>
    %52 = vector.shape_cast %51 : vector<8xf32> to vector<8x1xf32>
    %53 = vector.broadcast %52 : vector<8x1xf32> to vector<8x8xf32>
    %54 = arith.subf %50, %53 : vector<8x8xf32>
    %55 = math.exp %54 : vector<8x8xf32>
    %cst_23 = arith.constant dense<0.000000e+00> : vector<8xf32>
    %56 = vector.multi_reduction <add>, %55, %cst_23 [1] : vector<8x8xf32> to vector<8xf32>
    %57 = vector.shape_cast %56 : vector<8xf32> to vector<8x1xf32>
    %58 = tpu.reciprocal %57 {approx = true} : vector<8x1xf32> -> vector<8x1xf32>
    %59 = vector.broadcast %58 : vector<8x1xf32> to vector<8x8xf32>
    %60 = arith.mulf %55, %59 : vector<8x8xf32>
    %61 = arith.truncf %60 : vector<8x8xf32> to vector<8x8xbf16>
    %cst_24 = arith.constant dense<0.000000e+00> : vector<8x32xf32>
    %62 = tpu.matmul %61, %45, %cst_24 {dimension_numbers = #tpu.dot_dimension_numbers<[1], [0], [0], [1], [0, 0, 1, 1], [], []>} : vector<8x8xbf16>, vector<8x32xbf16>, vector<8x32xf32> -> vector<8x32xf32>
    %63 = vector.extract_strided_slice %37 {offsets = [0, 32], sizes = [8, 32], strides = [1, 1]} : vector<8x128xf32> to vector<8x32xf32>
    %64 = arith.truncf %63 : vector<8x32xf32> to vector<8x32xbf16>
    %65 = vector.extract_strided_slice %38 {offsets = [0, 32], sizes = [8, 32], strides = [1, 1]} : vector<8x128xf32> to vector<8x32xf32>
    %66 = arith.truncf %65 : vector<8x32xf32> to vector<8x32xbf16>
    %67 = vector.extract_strided_slice %39 {offsets = [0, 32], sizes = [8, 32], strides = [1, 1]} : vector<8x128xf32> to vector<8x32xf32>
    %68 = arith.truncf %67 : vector<8x32xf32> to vector<8x32xbf16>
    %cst_25 = arith.constant dense<0.000000e+00> : vector<8x8xf32>
    %69 = tpu.matmul %64, %66, %cst_25 {dimension_numbers = #tpu.dot_dimension_numbers<[1], [1], [0], [0], [0, 0, 1, 0], [], []>} : vector<8x32xbf16>, vector<8x32xbf16>, vector<8x8xf32> -> vector<8x8xf32>
    %cst_26 = arith.constant 0.176776692 : f32
    %70 = vector.broadcast %cst_26 : f32 to vector<8x8xf32>
    %71 = arith.mulf %69, %70 : vector<8x8xf32>
    %72 = vector.broadcast %3 : vector<1x8xf32> to vector<8x8xf32>
    %73 = arith.addf %71, %72 : vector<8x8xf32>
    %cst_27 = arith.constant dense<0xFF800000> : vector<8xf32>
    %74 = vector.multi_reduction <maximumf>, %73, %cst_27 [1] : vector<8x8xf32> to vector<8xf32>
    %75 = vector.shape_cast %74 : vector<8xf32> to vector<8x1xf32>
    %76 = vector.broadcast %75 : vector<8x1xf32> to vector<8x8xf32>
    %77 = arith.subf %73, %76 : vector<8x8xf32>
    %78 = math.exp %77 : vector<8x8xf32>
    %cst_28 = arith.constant dense<0.000000e+00> : vector<8xf32>
    %79 = vector.multi_reduction <add>, %78, %cst_28 [1] : vector<8x8xf32> to vector<8xf32>
    %80 = vector.shape_cast %79 : vector<8xf32> to vector<8x1xf32>
    %81 = tpu.reciprocal %80 {approx = true} : vector<8x1xf32> -> vector<8x1xf32>
    %82 = vector.broadcast %81 : vector<8x1xf32> to vector<8x8xf32>
    %83 = arith.mulf %78, %82 : vector<8x8xf32>
    %84 = arith.truncf %83 : vector<8x8xf32> to vector<8x8xbf16>
    %cst_29 = arith.constant dense<0.000000e+00> : vector<8x32xf32>
    %85 = tpu.matmul %84, %68, %cst_29 {dimension_numbers = #tpu.dot_dimension_numbers<[1], [0], [0], [1], [0, 0, 1, 1], [], []>} : vector<8x8xbf16>, vector<8x32xbf16>, vector<8x32xf32> -> vector<8x32xf32>
    %86 = vector.extract_strided_slice %37 {offsets = [0, 64], sizes = [8, 32], strides = [1, 1]} : vector<8x128xf32> to vector<8x32xf32>
    %87 = arith.truncf %86 : vector<8x32xf32> to vector<8x32xbf16>
    %88 = vector.extract_strided_slice %38 {offsets = [0, 64], sizes = [8, 32], strides = [1, 1]} : vector<8x128xf32> to vector<8x32xf32>
    %89 = arith.truncf %88 : vector<8x32xf32> to vector<8x32xbf16>
    %90 = vector.extract_strided_slice %39 {offsets = [0, 64], sizes = [8, 32], strides = [1, 1]} : vector<8x128xf32> to vector<8x32xf32>
    %91 = arith.truncf %90 : vector<8x32xf32> to vector<8x32xbf16>
    %cst_30 = arith.constant dense<0.000000e+00> : vector<8x8xf32>
    %92 = tpu.matmul %87, %89, %cst_30 {dimension_numbers = #tpu.dot_dimension_numbers<[1], [1], [0], [0], [0, 0, 1, 0], [], []>} : vector<8x32xbf16>, vector<8x32xbf16>, vector<8x8xf32> -> vector<8x8xf32>
    %cst_31 = arith.constant 0.176776692 : f32
    %93 = vector.broadcast %cst_31 : f32 to vector<8x8xf32>
    %94 = arith.mulf %92, %93 : vector<8x8xf32>
    %95 = vector.broadcast %3 : vector<1x8xf32> to vector<8x8xf32>
    %96 = arith.addf %94, %95 : vector<8x8xf32>
    %cst_32 = arith.constant dense<0xFF800000> : vector<8xf32>
    %97 = vector.multi_reduction <maximumf>, %96, %cst_32 [1] : vector<8x8xf32> to vector<8xf32>
    %98 = vector.shape_cast %97 : vector<8xf32> to vector<8x1xf32>
    %99 = vector.broadcast %98 : vector<8x1xf32> to vector<8x8xf32>
    %100 = arith.subf %96, %99 : vector<8x8xf32>
    %101 = math.exp %100 : vector<8x8xf32>
    %cst_33 = arith.constant dense<0.000000e+00> : vector<8xf32>
    %102 = vector.multi_reduction <add>, %101, %cst_33 [1] : vector<8x8xf32> to vector<8xf32>
    %103 = vector.shape_cast %102 : vector<8xf32> to vector<8x1xf32>
    %104 = tpu.reciprocal %103 {approx = true} : vector<8x1xf32> -> vector<8x1xf32>
    %105 = vector.broadcast %104 : vector<8x1xf32> to vector<8x8xf32>
    %106 = arith.mulf %101, %105 : vector<8x8xf32>
    %107 = arith.truncf %106 : vector<8x8xf32> to vector<8x8xbf16>
    %cst_34 = arith.constant dense<0.000000e+00> : vector<8x32xf32>
    %108 = tpu.matmul %107, %91, %cst_34 {dimension_numbers = #tpu.dot_dimension_numbers<[1], [0], [0], [1], [0, 0, 1, 1], [], []>} : vector<8x8xbf16>, vector<8x32xbf16>, vector<8x32xf32> -> vector<8x32xf32>
    %109 = vector.extract_strided_slice %37 {offsets = [0, 96], sizes = [8, 32], strides = [1, 1]} : vector<8x128xf32> to vector<8x32xf32>
    %110 = arith.truncf %109 : vector<8x32xf32> to vector<8x32xbf16>
    %111 = vector.extract_strided_slice %38 {offsets = [0, 96], sizes = [8, 32], strides = [1, 1]} : vector<8x128xf32> to vector<8x32xf32>
    %112 = arith.truncf %111 : vector<8x32xf32> to vector<8x32xbf16>
    %113 = vector.extract_strided_slice %39 {offsets = [0, 96], sizes = [8, 32], strides = [1, 1]} : vector<8x128xf32> to vector<8x32xf32>
    %114 = arith.truncf %113 : vector<8x32xf32> to vector<8x32xbf16>
    %cst_35 = arith.constant dense<0.000000e+00> : vector<8x8xf32>
    %115 = tpu.matmul %110, %112, %cst_35 {dimension_numbers = #tpu.dot_dimension_numbers<[1], [1], [0], [0], [0, 0, 1, 0], [], []>} : vector<8x32xbf16>, vector<8x32xbf16>, vector<8x8xf32> -> vector<8x8xf32>
    %cst_36 = arith.constant 0.176776692 : f32
    %116 = vector.broadcast %cst_36 : f32 to vector<8x8xf32>
    %117 = arith.mulf %115, %116 : vector<8x8xf32>
    %118 = vector.broadcast %3 : vector<1x8xf32> to vector<8x8xf32>
    %119 = arith.addf %117, %118 : vector<8x8xf32>
    %cst_37 = arith.constant dense<0xFF800000> : vector<8xf32>
    %120 = vector.multi_reduction <maximumf>, %119, %cst_37 [1] : vector<8x8xf32> to vector<8xf32>
    %121 = vector.shape_cast %120 : vector<8xf32> to vector<8x1xf32>
    %122 = vector.broadcast %121 : vector<8x1xf32> to vector<8x8xf32>
    %123 = arith.subf %119, %122 : vector<8x8xf32>
    %124 = math.exp %123 : vector<8x8xf32>
    %cst_38 = arith.constant dense<0.000000e+00> : vector<8xf32>
    %125 = vector.multi_reduction <add>, %124, %cst_38 [1] : vector<8x8xf32> to vector<8xf32>
    %126 = vector.shape_cast %125 : vector<8xf32> to vector<8x1xf32>
    %127 = tpu.reciprocal %126 {approx = true} : vector<8x1xf32> -> vector<8x1xf32>
    %128 = vector.broadcast %127 : vector<8x1xf32> to vector<8x8xf32>
    %129 = arith.mulf %124, %128 : vector<8x8xf32>
    %130 = arith.truncf %129 : vector<8x8xf32> to vector<8x8xbf16>
    %cst_39 = arith.constant dense<0.000000e+00> : vector<8x32xf32>
    %131 = tpu.matmul %130, %114, %cst_39 {dimension_numbers = #tpu.dot_dimension_numbers<[1], [0], [0], [1], [0, 0, 1, 1], [], []>} : vector<8x8xbf16>, vector<8x32xbf16>, vector<8x32xf32> -> vector<8x32xf32>
    %132 = tpu.concatenate %62, %85, %108, %131 in 1 : vector<8x32xf32>, vector<8x32xf32>, vector<8x32xf32>, vector<8x32xf32> -> vector<8x128xf32>
    %c0_40 = arith.constant 0 : index
    %c0_41 = arith.constant 0 : index
    %c0_42 = arith.constant 0 : index
    %133 = vector.load %arg7[%c0_40, %c0_41, %c0_42] : memref<2x128x128xf32, #tpu.memory_space<vmem>>, vector<1x128x128xf32>
    %134 = vector.shape_cast %133 : vector<1x128x128xf32> to vector<128x128xf32>
    %135 = arith.truncf %132 : vector<8x128xf32> to vector<8x128xbf16>
    %136 = arith.truncf %134 : vector<128x128xf32> to vector<128x128xbf16>
    %cst_43 = arith.constant dense<0.000000e+00> : vector<8x128xf32>
    %137 = tpu.matmul %135, %136, %cst_43 {dimension_numbers = #tpu.dot_dimension_numbers<[1], [0], [0], [1], [0, 0, 1, 1], [], []>} : vector<8x128xbf16>, vector<128x128xbf16>, vector<8x128xf32> -> vector<8x128xf32>
    %c0_44 = arith.constant 0 : index
    %c0_45 = arith.constant 0 : index
    %c0_46 = arith.constant 0 : index
    %138 = vector.load %arg8[%c0_44, %c0_45, %c0_46] : memref<2x1x128xf32, #tpu.memory_space<vmem>>, vector<1x1x128xf32>
    %139 = vector.shape_cast %138 : vector<1x1x128xf32> to vector<1x128xf32>
    %140 = vector.broadcast %139 : vector<1x128xf32> to vector<8x128xf32>
    %141 = arith.addf %137, %140 : vector<8x128xf32>
    %142 = arith.addf %141, %27 : vector<8x128xf32>
    %c0_47 = arith.constant 0 : index
    %c0_48 = arith.constant 0 : index
    %c0_49 = arith.constant 0 : index
    %143 = vector.load %arg9[%c0_47, %c0_48, %c0_49] : memref<2x1x128xf32, #tpu.memory_space<vmem>>, vector<1x1x128xf32>
    %144 = vector.shape_cast %143 : vector<1x1x128xf32> to vector<1x128xf32>
    %c0_50 = arith.constant 0 : index
    %c0_51 = arith.constant 0 : index
    %c0_52 = arith.constant 0 : index
    %145 = vector.load %arg10[%c0_50, %c0_51, %c0_52] : memref<2x1x128xf32, #tpu.memory_space<vmem>>, vector<1x1x128xf32>
    %146 = vector.shape_cast %145 : vector<1x1x128xf32> to vector<1x128xf32>
    %cst_53 = arith.constant dense<0.000000e+00> : vector<8xf32>
    %147 = vector.multi_reduction <add>, %142, %cst_53 [1] : vector<8x128xf32> to vector<8xf32>
    %148 = vector.shape_cast %147 : vector<8xf32> to vector<8x1xf32>
    %cst_54 = arith.constant 1.280000e+02 : f32
    %149 = vector.broadcast %cst_54 : f32 to vector<8x1xf32>
    %150 = arith.divf %148, %149 : vector<8x1xf32>
    %151 = vector.broadcast %150 : vector<8x1xf32> to vector<8x128xf32>
    %152 = arith.subf %142, %151 : vector<8x128xf32>
    %153 = arith.mulf %152, %152 : vector<8x128xf32>
    %cst_55 = arith.constant dense<0.000000e+00> : vector<8xf32>
    %154 = vector.multi_reduction <add>, %153, %cst_55 [1] : vector<8x128xf32> to vector<8xf32>
    %155 = vector.shape_cast %154 : vector<8xf32> to vector<8x1xf32>
    %cst_56 = arith.constant 1.280000e+02 : f32
    %156 = vector.broadcast %cst_56 : f32 to vector<8x1xf32>
    %157 = arith.divf %155, %156 : vector<8x1xf32>
    %158 = vector.broadcast %150 : vector<8x1xf32> to vector<8x128xf32>
    %159 = arith.subf %142, %158 : vector<8x128xf32>
    %cst_57 = arith.constant 9.99999996E-13 : f32
    %160 = vector.broadcast %cst_57 : f32 to vector<8x1xf32>
    %161 = arith.addf %157, %160 : vector<8x1xf32>
    %162 = math.rsqrt %161 : vector<8x1xf32>
    %163 = vector.broadcast %162 : vector<8x1xf32> to vector<8x128xf32>
    %164 = arith.mulf %159, %163 : vector<8x128xf32>
    %165 = vector.broadcast %144 : vector<1x128xf32> to vector<8x128xf32>
    %166 = arith.mulf %164, %165 : vector<8x128xf32>
    %167 = vector.broadcast %146 : vector<1x128xf32> to vector<8x128xf32>
    %168 = arith.addf %166, %167 : vector<8x128xf32>
    %c0_58 = arith.constant 0 : index
    %c0_59 = arith.constant 0 : index
    %c0_60 = arith.constant 0 : index
    %169 = vector.load %arg11[%c0_58, %c0_59, %c0_60] : memref<2x128x512xf32, #tpu.memory_space<vmem>>, vector<1x128x512xf32>
    %170 = vector.shape_cast %169 : vector<1x128x512xf32> to vector<128x512xf32>
    %171 = arith.truncf %168 : vector<8x128xf32> to vector<8x128xbf16>
    %172 = arith.truncf %170 : vector<128x512xf32> to vector<128x512xbf16>
    %cst_61 = arith.constant dense<0.000000e+00> : vector<8x512xf32>
    %173 = tpu.matmul %171, %172, %cst_61 {dimension_numbers = #tpu.dot_dimension_numbers<[1], [0], [0], [1], [0, 0, 1, 1], [], []>} : vector<8x128xbf16>, vector<128x512xbf16>, vector<8x512xf32> -> vector<8x512xf32>
    %c0_62 = arith.constant 0 : index
    %c0_63 = arith.constant 0 : index
    %c0_64 = arith.constant 0 : index
    %174 = vector.load %arg12[%c0_62, %c0_63, %c0_64] : memref<2x1x512xf32, #tpu.memory_space<vmem>>, vector<1x1x512xf32>
    %175 = vector.shape_cast %174 : vector<1x1x512xf32> to vector<1x512xf32>
    %176 = vector.broadcast %175 : vector<1x512xf32> to vector<8x512xf32>
    %177 = arith.addf %173, %176 : vector<8x512xf32>
    %cst_65 = arith.constant 5.000000e-01 : f32
    %178 = vector.broadcast %cst_65 : f32 to vector<8x512xf32>
    %179 = arith.mulf %178, %177 : vector<8x512xf32>
    %cst_66 = arith.constant 4.471500e-02 : f32
    %180 = vector.broadcast %cst_66 : f32 to vector<8x512xf32>
    %181 = arith.mulf %180, %177 : vector<8x512xf32>
    %182 = arith.mulf %181, %177 : vector<8x512xf32>
    %183 = arith.mulf %182, %177 : vector<8x512xf32>
    %184 = arith.addf %177, %183 : vector<8x512xf32>
    %cst_67 = arith.constant 0.797884583 : f32
    %185 = vector.broadcast %cst_67 : f32 to vector<8x512xf32>
    %186 = arith.mulf %185, %184 : vector<8x512xf32>
    %187 = math.tanh %186 : vector<8x512xf32>
    %cst_68 = arith.constant 1.000000e+00 : f32
    %188 = vector.broadcast %cst_68 : f32 to vector<8x512xf32>
    %189 = arith.addf %188, %187 : vector<8x512xf32>
    %190 = arith.mulf %179, %189 : vector<8x512xf32>
    %c0_69 = arith.constant 0 : index
    %c0_70 = arith.constant 0 : index
    %c0_71 = arith.constant 0 : index
    %191 = vector.load %arg13[%c0_69, %c0_70, %c0_71] : memref<2x512x128xf32, #tpu.memory_space<vmem>>, vector<1x512x128xf32>
    %192 = vector.shape_cast %191 : vector<1x512x128xf32> to vector<512x128xf32>
    %193 = arith.truncf %190 : vector<8x512xf32> to vector<8x512xbf16>
    %194 = arith.truncf %192 : vector<512x128xf32> to vector<512x128xbf16>
    %cst_72 = arith.constant dense<0.000000e+00> : vector<8x128xf32>
    %195 = tpu.matmul %193, %194, %cst_72 {dimension_numbers = #tpu.dot_dimension_numbers<[1], [0], [0], [1], [0, 0, 1, 1], [], []>} : vector<8x512xbf16>, vector<512x128xbf16>, vector<8x128xf32> -> vector<8x128xf32>
    %c0_73 = arith.constant 0 : index
    %c0_74 = arith.constant 0 : index
    %c0_75 = arith.constant 0 : index
    %196 = vector.load %arg14[%c0_73, %c0_74, %c0_75] : memref<2x1x128xf32, #tpu.memory_space<vmem>>, vector<1x1x128xf32>
    %197 = vector.shape_cast %196 : vector<1x1x128xf32> to vector<1x128xf32>
    %198 = vector.broadcast %197 : vector<1x128xf32> to vector<8x128xf32>
    %199 = arith.addf %195, %198 : vector<8x128xf32>
    %200 = arith.addf %199, %168 : vector<8x128xf32>
    %c0_76 = arith.constant 0 : index
    %c0_77 = arith.constant 0 : index
    %c0_78 = arith.constant 0 : index
    %201 = vector.load %arg15[%c0_76, %c0_77, %c0_78] : memref<2x1x128xf32, #tpu.memory_space<vmem>>, vector<1x1x128xf32>
    %202 = vector.shape_cast %201 : vector<1x1x128xf32> to vector<1x128xf32>
    %c0_79 = arith.constant 0 : index
    %c0_80 = arith.constant 0 : index
    %c0_81 = arith.constant 0 : index
    %203 = vector.load %arg16[%c0_79, %c0_80, %c0_81] : memref<2x1x128xf32, #tpu.memory_space<vmem>>, vector<1x1x128xf32>
    %204 = vector.shape_cast %203 : vector<1x1x128xf32> to vector<1x128xf32>
    %cst_82 = arith.constant dense<0.000000e+00> : vector<8xf32>
    %205 = vector.multi_reduction <add>, %200, %cst_82 [1] : vector<8x128xf32> to vector<8xf32>
    %206 = vector.shape_cast %205 : vector<8xf32> to vector<8x1xf32>
    %cst_83 = arith.constant 1.280000e+02 : f32
    %207 = vector.broadcast %cst_83 : f32 to vector<8x1xf32>
    %208 = arith.divf %206, %207 : vector<8x1xf32>
    %209 = vector.broadcast %208 : vector<8x1xf32> to vector<8x128xf32>
    %210 = arith.subf %200, %209 : vector<8x128xf32>
    %211 = arith.mulf %210, %210 : vector<8x128xf32>
    %cst_84 = arith.constant dense<0.000000e+00> : vector<8xf32>
    %212 = vector.multi_reduction <add>, %211, %cst_84 [1] : vector<8x128xf32> to vector<8xf32>
    %213 = vector.shape_cast %212 : vector<8xf32> to vector<8x1xf32>
    %cst_85 = arith.constant 1.280000e+02 : f32
    %214 = vector.broadcast %cst_85 : f32 to vector<8x1xf32>
    %215 = arith.divf %213, %214 : vector<8x1xf32>
    %216 = vector.broadcast %208 : vector<8x1xf32> to vector<8x128xf32>
    %217 = arith.subf %200, %216 : vector<8x128xf32>
    %cst_86 = arith.constant 9.99999996E-13 : f32
    %218 = vector.broadcast %cst_86 : f32 to vector<8x1xf32>
    %219 = arith.addf %215, %218 : vector<8x1xf32>
    %220 = math.rsqrt %219 : vector<8x1xf32>
    %221 = vector.broadcast %220 : vector<8x1xf32> to vector<8x128xf32>
    %222 = arith.mulf %217, %221 : vector<8x128xf32>
    %223 = vector.broadcast %202 : vector<1x128xf32> to vector<8x128xf32>
    %224 = arith.mulf %222, %223 : vector<8x128xf32>
    %225 = vector.broadcast %204 : vector<1x128xf32> to vector<8x128xf32>
    %226 = arith.addf %224, %225 : vector<8x128xf32>
    %c1 = arith.constant 1 : index
    %c0_87 = arith.constant 0 : index
    %c0_88 = arith.constant 0 : index
    %227 = vector.load %arg5[%c1, %c0_87, %c0_88] : memref<2x128x384xf32, #tpu.memory_space<vmem>>, vector<1x128x384xf32>
    %228 = vector.shape_cast %227 : vector<1x128x384xf32> to vector<128x384xf32>
    %229 = arith.truncf %226 : vector<8x128xf32> to vector<8x128xbf16>
    %230 = arith.truncf %228 : vector<128x384xf32> to vector<128x384xbf16>
    %cst_89 = arith.constant dense<0.000000e+00> : vector<8x384xf32>
    %231 = tpu.matmul %229, %230, %cst_89 {dimension_numbers = #tpu.dot_dimension_numbers<[1], [0], [0], [1], [0, 0, 1, 1], [], []>} : vector<8x128xbf16>, vector<128x384xbf16>, vector<8x384xf32> -> vector<8x384xf32>
    %c1_90 = arith.constant 1 : index
    %c0_91 = arith.constant 0 : index
    %c0_92 = arith.constant 0 : index
    %232 = vector.load %arg6[%c1_90, %c0_91, %c0_92] : memref<2x1x384xf32, #tpu.memory_space<vmem>>, vector<1x1x384xf32>
    %233 = vector.shape_cast %232 : vector<1x1x384xf32> to vector<1x384xf32>
    %234 = vector.broadcast %233 : vector<1x384xf32> to vector<8x384xf32>
    %235 = arith.addf %231, %234 : vector<8x384xf32>
    %236 = vector.extract_strided_slice %235 {offsets = [0, 0], sizes = [8, 128], strides = [1, 1]} : vector<8x384xf32> to vector<8x128xf32>
    %237 = vector.extract_strided_slice %235 {offsets = [0, 128], sizes = [8, 128], strides = [1, 1]} : vector<8x384xf32> to vector<8x128xf32>
    %238 = vector.extract_strided_slice %235 {offsets = [0, 256], sizes = [8, 128], strides = [1, 1]} : vector<8x384xf32> to vector<8x128xf32>
    %239 = vector.extract_strided_slice %236 {offsets = [0, 0], sizes = [8, 32], strides = [1, 1]} : vector<8x128xf32> to vector<8x32xf32>
    %240 = arith.truncf %239 : vector<8x32xf32> to vector<8x32xbf16>
    %241 = vector.extract_strided_slice %237 {offsets = [0, 0], sizes = [8, 32], strides = [1, 1]} : vector<8x128xf32> to vector<8x32xf32>
    %242 = arith.truncf %241 : vector<8x32xf32> to vector<8x32xbf16>
    %243 = vector.extract_strided_slice %238 {offsets = [0, 0], sizes = [8, 32], strides = [1, 1]} : vector<8x128xf32> to vector<8x32xf32>
    %244 = arith.truncf %243 : vector<8x32xf32> to vector<8x32xbf16>
    %cst_93 = arith.constant dense<0.000000e+00> : vector<8x8xf32>
    %245 = tpu.matmul %240, %242, %cst_93 {dimension_numbers = #tpu.dot_dimension_numbers<[1], [1], [0], [0], [0, 0, 1, 0], [], []>} : vector<8x32xbf16>, vector<8x32xbf16>, vector<8x8xf32> -> vector<8x8xf32>
    %cst_94 = arith.constant 0.176776692 : f32
    %246 = vector.broadcast %cst_94 : f32 to vector<8x8xf32>
    %247 = arith.mulf %245, %246 : vector<8x8xf32>
    %248 = vector.broadcast %3 : vector<1x8xf32> to vector<8x8xf32>
    %249 = arith.addf %247, %248 : vector<8x8xf32>
    %cst_95 = arith.constant dense<0xFF800000> : vector<8xf32>
    %250 = vector.multi_reduction <maximumf>, %249, %cst_95 [1] : vector<8x8xf32> to vector<8xf32>
    %251 = vector.shape_cast %250 : vector<8xf32> to vector<8x1xf32>
    %252 = vector.broadcast %251 : vector<8x1xf32> to vector<8x8xf32>
    %253 = arith.subf %249, %252 : vector<8x8xf32>
    %254 = math.exp %253 : vector<8x8xf32>
    %cst_96 = arith.constant dense<0.000000e+00> : vector<8xf32>
    %255 = vector.multi_reduction <add>, %254, %cst_96 [1] : vector<8x8xf32> to vector<8xf32>
    %256 = vector.shape_cast %255 : vector<8xf32> to vector<8x1xf32>
    %257 = tpu.reciprocal %256 {approx = true} : vector<8x1xf32> -> vector<8x1xf32>
    %258 = vector.broadcast %257 : vector<8x1xf32> to vector<8x8xf32>
    %259 = arith.mulf %254, %258 : vector<8x8xf32>
    %260 = arith.truncf %259 : vector<8x8xf32> to vector<8x8xbf16>
    %cst_97 = arith.constant dense<0.000000e+00> : vector<8x32xf32>
    %261 = tpu.matmul %260, %244, %cst_97 {dimension_numbers = #tpu.dot_dimension_numbers<[1], [0], [0], [1], [0, 0, 1, 1], [], []>} : vector<8x8xbf16>, vector<8x32xbf16>, vector<8x32xf32> -> vector<8x32xf32>
    %262 = vector.extract_strided_slice %236 {offsets = [0, 32], sizes = [8, 32], strides = [1, 1]} : vector<8x128xf32> to vector<8x32xf32>
    %263 = arith.truncf %262 : vector<8x32xf32> to vector<8x32xbf16>
    %264 = vector.extract_strided_slice %237 {offsets = [0, 32], sizes = [8, 32], strides = [1, 1]} : vector<8x128xf32> to vector<8x32xf32>
    %265 = arith.truncf %264 : vector<8x32xf32> to vector<8x32xbf16>
    %266 = vector.extract_strided_slice %238 {offsets = [0, 32], sizes = [8, 32], strides = [1, 1]} : vector<8x128xf32> to vector<8x32xf32>
    %267 = arith.truncf %266 : vector<8x32xf32> to vector<8x32xbf16>
    %cst_98 = arith.constant dense<0.000000e+00> : vector<8x8xf32>
    %268 = tpu.matmul %263, %265, %cst_98 {dimension_numbers = #tpu.dot_dimension_numbers<[1], [1], [0], [0], [0, 0, 1, 0], [], []>} : vector<8x32xbf16>, vector<8x32xbf16>, vector<8x8xf32> -> vector<8x8xf32>
    %cst_99 = arith.constant 0.176776692 : f32
    %269 = vector.broadcast %cst_99 : f32 to vector<8x8xf32>
    %270 = arith.mulf %268, %269 : vector<8x8xf32>
    %271 = vector.broadcast %3 : vector<1x8xf32> to vector<8x8xf32>
    %272 = arith.addf %270, %271 : vector<8x8xf32>
    %cst_100 = arith.constant dense<0xFF800000> : vector<8xf32>
    %273 = vector.multi_reduction <maximumf>, %272, %cst_100 [1] : vector<8x8xf32> to vector<8xf32>
    %274 = vector.shape_cast %273 : vector<8xf32> to vector<8x1xf32>
    %275 = vector.broadcast %274 : vector<8x1xf32> to vector<8x8xf32>
    %276 = arith.subf %272, %275 : vector<8x8xf32>
    %277 = math.exp %276 : vector<8x8xf32>
    %cst_101 = arith.constant dense<0.000000e+00> : vector<8xf32>
    %278 = vector.multi_reduction <add>, %277, %cst_101 [1] : vector<8x8xf32> to vector<8xf32>
    %279 = vector.shape_cast %278 : vector<8xf32> to vector<8x1xf32>
    %280 = tpu.reciprocal %279 {approx = true} : vector<8x1xf32> -> vector<8x1xf32>
    %281 = vector.broadcast %280 : vector<8x1xf32> to vector<8x8xf32>
    %282 = arith.mulf %277, %281 : vector<8x8xf32>
    %283 = arith.truncf %282 : vector<8x8xf32> to vector<8x8xbf16>
    %cst_102 = arith.constant dense<0.000000e+00> : vector<8x32xf32>
    %284 = tpu.matmul %283, %267, %cst_102 {dimension_numbers = #tpu.dot_dimension_numbers<[1], [0], [0], [1], [0, 0, 1, 1], [], []>} : vector<8x8xbf16>, vector<8x32xbf16>, vector<8x32xf32> -> vector<8x32xf32>
    %285 = vector.extract_strided_slice %236 {offsets = [0, 64], sizes = [8, 32], strides = [1, 1]} : vector<8x128xf32> to vector<8x32xf32>
    %286 = arith.truncf %285 : vector<8x32xf32> to vector<8x32xbf16>
    %287 = vector.extract_strided_slice %237 {offsets = [0, 64], sizes = [8, 32], strides = [1, 1]} : vector<8x128xf32> to vector<8x32xf32>
    %288 = arith.truncf %287 : vector<8x32xf32> to vector<8x32xbf16>
    %289 = vector.extract_strided_slice %238 {offsets = [0, 64], sizes = [8, 32], strides = [1, 1]} : vector<8x128xf32> to vector<8x32xf32>
    %290 = arith.truncf %289 : vector<8x32xf32> to vector<8x32xbf16>
    %cst_103 = arith.constant dense<0.000000e+00> : vector<8x8xf32>
    %291 = tpu.matmul %286, %288, %cst_103 {dimension_numbers = #tpu.dot_dimension_numbers<[1], [1], [0], [0], [0, 0, 1, 0], [], []>} : vector<8x32xbf16>, vector<8x32xbf16>, vector<8x8xf32> -> vector<8x8xf32>
    %cst_104 = arith.constant 0.176776692 : f32
    %292 = vector.broadcast %cst_104 : f32 to vector<8x8xf32>
    %293 = arith.mulf %291, %292 : vector<8x8xf32>
    %294 = vector.broadcast %3 : vector<1x8xf32> to vector<8x8xf32>
    %295 = arith.addf %293, %294 : vector<8x8xf32>
    %cst_105 = arith.constant dense<0xFF800000> : vector<8xf32>
    %296 = vector.multi_reduction <maximumf>, %295, %cst_105 [1] : vector<8x8xf32> to vector<8xf32>
    %297 = vector.shape_cast %296 : vector<8xf32> to vector<8x1xf32>
    %298 = vector.broadcast %297 : vector<8x1xf32> to vector<8x8xf32>
    %299 = arith.subf %295, %298 : vector<8x8xf32>
    %300 = math.exp %299 : vector<8x8xf32>
    %cst_106 = arith.constant dense<0.000000e+00> : vector<8xf32>
    %301 = vector.multi_reduction <add>, %300, %cst_106 [1] : vector<8x8xf32> to vector<8xf32>
    %302 = vector.shape_cast %301 : vector<8xf32> to vector<8x1xf32>
    %303 = tpu.reciprocal %302 {approx = true} : vector<8x1xf32> -> vector<8x1xf32>
    %304 = vector.broadcast %303 : vector<8x1xf32> to vector<8x8xf32>
    %305 = arith.mulf %300, %304 : vector<8x8xf32>
    %306 = arith.truncf %305 : vector<8x8xf32> to vector<8x8xbf16>
    %cst_107 = arith.constant dense<0.000000e+00> : vector<8x32xf32>
    %307 = tpu.matmul %306, %290, %cst_107 {dimension_numbers = #tpu.dot_dimension_numbers<[1], [0], [0], [1], [0, 0, 1, 1], [], []>} : vector<8x8xbf16>, vector<8x32xbf16>, vector<8x32xf32> -> vector<8x32xf32>
    %308 = vector.extract_strided_slice %236 {offsets = [0, 96], sizes = [8, 32], strides = [1, 1]} : vector<8x128xf32> to vector<8x32xf32>
    %309 = arith.truncf %308 : vector<8x32xf32> to vector<8x32xbf16>
    %310 = vector.extract_strided_slice %237 {offsets = [0, 96], sizes = [8, 32], strides = [1, 1]} : vector<8x128xf32> to vector<8x32xf32>
    %311 = arith.truncf %310 : vector<8x32xf32> to vector<8x32xbf16>
    %312 = vector.extract_strided_slice %238 {offsets = [0, 96], sizes = [8, 32], strides = [1, 1]} : vector<8x128xf32> to vector<8x32xf32>
    %313 = arith.truncf %312 : vector<8x32xf32> to vector<8x32xbf16>
    %cst_108 = arith.constant dense<0.000000e+00> : vector<8x8xf32>
    %314 = tpu.matmul %309, %311, %cst_108 {dimension_numbers = #tpu.dot_dimension_numbers<[1], [1], [0], [0], [0, 0, 1, 0], [], []>} : vector<8x32xbf16>, vector<8x32xbf16>, vector<8x8xf32> -> vector<8x8xf32>
    %cst_109 = arith.constant 0.176776692 : f32
    %315 = vector.broadcast %cst_109 : f32 to vector<8x8xf32>
    %316 = arith.mulf %314, %315 : vector<8x8xf32>
    %317 = vector.broadcast %3 : vector<1x8xf32> to vector<8x8xf32>
    %318 = arith.addf %316, %317 : vector<8x8xf32>
    %cst_110 = arith.constant dense<0xFF800000> : vector<8xf32>
    %319 = vector.multi_reduction <maximumf>, %318, %cst_110 [1] : vector<8x8xf32> to vector<8xf32>
    %320 = vector.shape_cast %319 : vector<8xf32> to vector<8x1xf32>
    %321 = vector.broadcast %320 : vector<8x1xf32> to vector<8x8xf32>
    %322 = arith.subf %318, %321 : vector<8x8xf32>
    %323 = math.exp %322 : vector<8x8xf32>
    %cst_111 = arith.constant dense<0.000000e+00> : vector<8xf32>
    %324 = vector.multi_reduction <add>, %323, %cst_111 [1] : vector<8x8xf32> to vector<8xf32>
    %325 = vector.shape_cast %324 : vector<8xf32> to vector<8x1xf32>
    %326 = tpu.reciprocal %325 {approx = true} : vector<8x1xf32> -> vector<8x1xf32>
    %327 = vector.broadcast %326 : vector<8x1xf32> to vector<8x8xf32>
    %328 = arith.mulf %323, %327 : vector<8x8xf32>
    %329 = arith.truncf %328 : vector<8x8xf32> to vector<8x8xbf16>
    %cst_112 = arith.constant dense<0.000000e+00> : vector<8x32xf32>
    %330 = tpu.matmul %329, %313, %cst_112 {dimension_numbers = #tpu.dot_dimension_numbers<[1], [0], [0], [1], [0, 0, 1, 1], [], []>} : vector<8x8xbf16>, vector<8x32xbf16>, vector<8x32xf32> -> vector<8x32xf32>
    %331 = tpu.concatenate %261, %284, %307, %330 in 1 : vector<8x32xf32>, vector<8x32xf32>, vector<8x32xf32>, vector<8x32xf32> -> vector<8x128xf32>
    %c1_113 = arith.constant 1 : index
    %c0_114 = arith.constant 0 : index
    %c0_115 = arith.constant 0 : index
    %332 = vector.load %arg7[%c1_113, %c0_114, %c0_115] : memref<2x128x128xf32, #tpu.memory_space<vmem>>, vector<1x128x128xf32>
    %333 = vector.shape_cast %332 : vector<1x128x128xf32> to vector<128x128xf32>
    %334 = arith.truncf %331 : vector<8x128xf32> to vector<8x128xbf16>
    %335 = arith.truncf %333 : vector<128x128xf32> to vector<128x128xbf16>
    %cst_116 = arith.constant dense<0.000000e+00> : vector<8x128xf32>
    %336 = tpu.matmul %334, %335, %cst_116 {dimension_numbers = #tpu.dot_dimension_numbers<[1], [0], [0], [1], [0, 0, 1, 1], [], []>} : vector<8x128xbf16>, vector<128x128xbf16>, vector<8x128xf32> -> vector<8x128xf32>
    %c1_117 = arith.constant 1 : index
    %c0_118 = arith.constant 0 : index
    %c0_119 = arith.constant 0 : index
    %337 = vector.load %arg8[%c1_117, %c0_118, %c0_119] : memref<2x1x128xf32, #tpu.memory_space<vmem>>, vector<1x1x128xf32>
    %338 = vector.shape_cast %337 : vector<1x1x128xf32> to vector<1x128xf32>
    %339 = vector.broadcast %338 : vector<1x128xf32> to vector<8x128xf32>
    %340 = arith.addf %336, %339 : vector<8x128xf32>
    %341 = arith.addf %340, %226 : vector<8x128xf32>
    %c1_120 = arith.constant 1 : index
    %c0_121 = arith.constant 0 : index
    %c0_122 = arith.constant 0 : index
    %342 = vector.load %arg9[%c1_120, %c0_121, %c0_122] : memref<2x1x128xf32, #tpu.memory_space<vmem>>, vector<1x1x128xf32>
    %343 = vector.shape_cast %342 : vector<1x1x128xf32> to vector<1x128xf32>
    %c1_123 = arith.constant 1 : index
    %c0_124 = arith.constant 0 : index
    %c0_125 = arith.constant 0 : index
    %344 = vector.load %arg10[%c1_123, %c0_124, %c0_125] : memref<2x1x128xf32, #tpu.memory_space<vmem>>, vector<1x1x128xf32>
    %345 = vector.shape_cast %344 : vector<1x1x128xf32> to vector<1x128xf32>
    %cst_126 = arith.constant dense<0.000000e+00> : vector<8xf32>
    %346 = vector.multi_reduction <add>, %341, %cst_126 [1] : vector<8x128xf32> to vector<8xf32>
    %347 = vector.shape_cast %346 : vector<8xf32> to vector<8x1xf32>
    %cst_127 = arith.constant 1.280000e+02 : f32
    %348 = vector.broadcast %cst_127 : f32 to vector<8x1xf32>
    %349 = arith.divf %347, %348 : vector<8x1xf32>
    %350 = vector.broadcast %349 : vector<8x1xf32> to vector<8x128xf32>
    %351 = arith.subf %341, %350 : vector<8x128xf32>
    %352 = arith.mulf %351, %351 : vector<8x128xf32>
    %cst_128 = arith.constant dense<0.000000e+00> : vector<8xf32>
    %353 = vector.multi_reduction <add>, %352, %cst_128 [1] : vector<8x128xf32> to vector<8xf32>
    %354 = vector.shape_cast %353 : vector<8xf32> to vector<8x1xf32>
    %cst_129 = arith.constant 1.280000e+02 : f32
    %355 = vector.broadcast %cst_129 : f32 to vector<8x1xf32>
    %356 = arith.divf %354, %355 : vector<8x1xf32>
    %357 = vector.broadcast %349 : vector<8x1xf32> to vector<8x128xf32>
    %358 = arith.subf %341, %357 : vector<8x128xf32>
    %cst_130 = arith.constant 9.99999996E-13 : f32
    %359 = vector.broadcast %cst_130 : f32 to vector<8x1xf32>
    %360 = arith.addf %356, %359 : vector<8x1xf32>
    %361 = math.rsqrt %360 : vector<8x1xf32>
    %362 = vector.broadcast %361 : vector<8x1xf32> to vector<8x128xf32>
    %363 = arith.mulf %358, %362 : vector<8x128xf32>
    %364 = vector.broadcast %343 : vector<1x128xf32> to vector<8x128xf32>
    %365 = arith.mulf %363, %364 : vector<8x128xf32>
    %366 = vector.broadcast %345 : vector<1x128xf32> to vector<8x128xf32>
    %367 = arith.addf %365, %366 : vector<8x128xf32>
    %c1_131 = arith.constant 1 : index
    %c0_132 = arith.constant 0 : index
    %c0_133 = arith.constant 0 : index
    %368 = vector.load %arg11[%c1_131, %c0_132, %c0_133] : memref<2x128x512xf32, #tpu.memory_space<vmem>>, vector<1x128x512xf32>
    %369 = vector.shape_cast %368 : vector<1x128x512xf32> to vector<128x512xf32>
    %370 = arith.truncf %367 : vector<8x128xf32> to vector<8x128xbf16>
    %371 = arith.truncf %369 : vector<128x512xf32> to vector<128x512xbf16>
    %cst_134 = arith.constant dense<0.000000e+00> : vector<8x512xf32>
    %372 = tpu.matmul %370, %371, %cst_134 {dimension_numbers = #tpu.dot_dimension_numbers<[1], [0], [0], [1], [0, 0, 1, 1], [], []>} : vector<8x128xbf16>, vector<128x512xbf16>, vector<8x512xf32> -> vector<8x512xf32>
    %c1_135 = arith.constant 1 : index
    %c0_136 = arith.constant 0 : index
    %c0_137 = arith.constant 0 : index
    %373 = vector.load %arg12[%c1_135, %c0_136, %c0_137] : memref<2x1x512xf32, #tpu.memory_space<vmem>>, vector<1x1x512xf32>
    %374 = vector.shape_cast %373 : vector<1x1x512xf32> to vector<1x512xf32>
    %375 = vector.broadcast %374 : vector<1x512xf32> to vector<8x512xf32>
    %376 = arith.addf %372, %375 : vector<8x512xf32>
    %cst_138 = arith.constant 5.000000e-01 : f32
    %377 = vector.broadcast %cst_138 : f32 to vector<8x512xf32>
    %378 = arith.mulf %377, %376 : vector<8x512xf32>
    %cst_139 = arith.constant 4.471500e-02 : f32
    %379 = vector.broadcast %cst_139 : f32 to vector<8x512xf32>
    %380 = arith.mulf %379, %376 : vector<8x512xf32>
    %381 = arith.mulf %380, %376 : vector<8x512xf32>
    %382 = arith.mulf %381, %376 : vector<8x512xf32>
    %383 = arith.addf %376, %382 : vector<8x512xf32>
    %cst_140 = arith.constant 0.797884583 : f32
    %384 = vector.broadcast %cst_140 : f32 to vector<8x512xf32>
    %385 = arith.mulf %384, %383 : vector<8x512xf32>
    %386 = math.tanh %385 : vector<8x512xf32>
    %cst_141 = arith.constant 1.000000e+00 : f32
    %387 = vector.broadcast %cst_141 : f32 to vector<8x512xf32>
    %388 = arith.addf %387, %386 : vector<8x512xf32>
    %389 = arith.mulf %378, %388 : vector<8x512xf32>
    %c1_142 = arith.constant 1 : index
    %c0_143 = arith.constant 0 : index
    %c0_144 = arith.constant 0 : index
    %390 = vector.load %arg13[%c1_142, %c0_143, %c0_144] : memref<2x512x128xf32, #tpu.memory_space<vmem>>, vector<1x512x128xf32>
    %391 = vector.shape_cast %390 : vector<1x512x128xf32> to vector<512x128xf32>
    %392 = arith.truncf %389 : vector<8x512xf32> to vector<8x512xbf16>
    %393 = arith.truncf %391 : vector<512x128xf32> to vector<512x128xbf16>
    %cst_145 = arith.constant dense<0.000000e+00> : vector<8x128xf32>
    %394 = tpu.matmul %392, %393, %cst_145 {dimension_numbers = #tpu.dot_dimension_numbers<[1], [0], [0], [1], [0, 0, 1, 1], [], []>} : vector<8x512xbf16>, vector<512x128xbf16>, vector<8x128xf32> -> vector<8x128xf32>
    %c1_146 = arith.constant 1 : index
    %c0_147 = arith.constant 0 : index
    %c0_148 = arith.constant 0 : index
    %395 = vector.load %arg14[%c1_146, %c0_147, %c0_148] : memref<2x1x128xf32, #tpu.memory_space<vmem>>, vector<1x1x128xf32>
    %396 = vector.shape_cast %395 : vector<1x1x128xf32> to vector<1x128xf32>
    %397 = vector.broadcast %396 : vector<1x128xf32> to vector<8x128xf32>
    %398 = arith.addf %394, %397 : vector<8x128xf32>
    %399 = arith.addf %398, %367 : vector<8x128xf32>
    %c1_149 = arith.constant 1 : index
    %c0_150 = arith.constant 0 : index
    %c0_151 = arith.constant 0 : index
    %400 = vector.load %arg15[%c1_149, %c0_150, %c0_151] : memref<2x1x128xf32, #tpu.memory_space<vmem>>, vector<1x1x128xf32>
    %401 = vector.shape_cast %400 : vector<1x1x128xf32> to vector<1x128xf32>
    %c1_152 = arith.constant 1 : index
    %c0_153 = arith.constant 0 : index
    %c0_154 = arith.constant 0 : index
    %402 = vector.load %arg16[%c1_152, %c0_153, %c0_154] : memref<2x1x128xf32, #tpu.memory_space<vmem>>, vector<1x1x128xf32>
    %403 = vector.shape_cast %402 : vector<1x1x128xf32> to vector<1x128xf32>
    %cst_155 = arith.constant dense<0.000000e+00> : vector<8xf32>
    %404 = vector.multi_reduction <add>, %399, %cst_155 [1] : vector<8x128xf32> to vector<8xf32>
    %405 = vector.shape_cast %404 : vector<8xf32> to vector<8x1xf32>
    %cst_156 = arith.constant 1.280000e+02 : f32
    %406 = vector.broadcast %cst_156 : f32 to vector<8x1xf32>
    %407 = arith.divf %405, %406 : vector<8x1xf32>
    %408 = vector.broadcast %407 : vector<8x1xf32> to vector<8x128xf32>
    %409 = arith.subf %399, %408 : vector<8x128xf32>
    %410 = arith.mulf %409, %409 : vector<8x128xf32>
    %cst_157 = arith.constant dense<0.000000e+00> : vector<8xf32>
    %411 = vector.multi_reduction <add>, %410, %cst_157 [1] : vector<8x128xf32> to vector<8xf32>
    %412 = vector.shape_cast %411 : vector<8xf32> to vector<8x1xf32>
    %cst_158 = arith.constant 1.280000e+02 : f32
    %413 = vector.broadcast %cst_158 : f32 to vector<8x1xf32>
    %414 = arith.divf %412, %413 : vector<8x1xf32>
    %415 = vector.broadcast %407 : vector<8x1xf32> to vector<8x128xf32>
    %416 = arith.subf %399, %415 : vector<8x128xf32>
    %cst_159 = arith.constant 9.99999996E-13 : f32
    %417 = vector.broadcast %cst_159 : f32 to vector<8x1xf32>
    %418 = arith.addf %414, %417 : vector<8x1xf32>
    %419 = math.rsqrt %418 : vector<8x1xf32>
    %420 = vector.broadcast %419 : vector<8x1xf32> to vector<8x128xf32>
    %421 = arith.mulf %416, %420 : vector<8x128xf32>
    %422 = vector.broadcast %401 : vector<1x128xf32> to vector<8x128xf32>
    %423 = arith.mulf %421, %422 : vector<8x128xf32>
    %424 = vector.broadcast %403 : vector<1x128xf32> to vector<8x128xf32>
    %425 = arith.addf %423, %424 : vector<8x128xf32>
    %426 = vector.extract_strided_slice %425 {offsets = [0, 0], sizes = [1, 128], strides = [1, 1]} : vector<8x128xf32> to vector<1x128xf32>
    %c0_160 = arith.constant 0 : index
    %c0_161 = arith.constant 0 : index
    %427 = vector.load %arg17[%c0_160, %c0_161] : memref<128x128xf32, #tpu.memory_space<vmem>>, vector<128x128xf32>
    %428 = arith.truncf %426 : vector<1x128xf32> to vector<1x128xbf16>
    %429 = arith.truncf %427 : vector<128x128xf32> to vector<128x128xbf16>
    %cst_162 = arith.constant dense<0.000000e+00> : vector<1x128xf32>
    %430 = tpu.matmul %428, %429, %cst_162 {dimension_numbers = #tpu.dot_dimension_numbers<[1], [0], [0], [1], [0, 0, 1, 1], [], []>} : vector<1x128xbf16>, vector<128x128xbf16>, vector<1x128xf32> -> vector<1x128xf32>
    %c0_163 = arith.constant 0 : index
    %c0_164 = arith.constant 0 : index
    %431 = vector.load %arg18[%c0_163, %c0_164] : memref<1x128xf32, #tpu.memory_space<vmem>>, vector<1x128xf32>
    %432 = arith.addf %430, %431 : vector<1x128xf32>
    %433 = math.tanh %432 : vector<1x128xf32>
    %c0_165 = arith.constant 0 : index
    %c0_166 = arith.constant 0 : index
    %c0_167 = arith.constant 0 : index
    %434 = vector.load %arg19[%c0_165, %c0_166, %c0_167] : memref<1x1x128xf32, #tpu.memory_space<vmem>>, vector<1x1x128xf32>
    %435 = vector.shape_cast %434 : vector<1x1x128xf32> to vector<1x128xf32>
    %436 = vector.shape_cast %433 : vector<1x128xf32> to vector<1x1x128xf32>
    tpu.vector_store %arg19[%c0_165, %c0_166, %c0_167], %436 {strides = array<i32>} : memref<1x1x128xf32, #tpu.memory_space<vmem>>, vector<1x1x128xf32>,
    return
  }
  func.func @transform_0(%arg0: i32) -> (i32, i32, i32) {
    %c0_i32 = arith.constant 0 : i32
    %c0_i32_0 = arith.constant 0 : i32
    %c0_i32_1 = arith.constant 0 : i32
    return %arg0, %c0_i32, %c0_i32_0 : i32, i32, i32
  }
  func.func @transform_1(%arg0: i32) -> (i32, i32, i32) {
    %c0_i32 = arith.constant 0 : i32
    %c0_i32_0 = arith.constant 0 : i32
    %c0_i32_1 = arith.constant 0 : i32
    return %arg0, %c0_i32, %c0_i32_0 : i32, i32, i32
  }
  func.func @transform_2(%arg0: i32) -> (i32, i32) {
    %c0_i32 = arith.constant 0 : i32
    %c0_i32_0 = arith.constant 0 : i32
    %c0_i32_1 = arith.constant 0 : i32
    return %c0_i32, %c0_i32_0 : i32, i32
  }
  func.func @transform_3(%arg0: i32) -> (i32, i32) {
    %c0_i32 = arith.constant 0 : i32
    %c0_i32_0 = arith.constant 0 : i32
    %c0_i32_1 = arith.constant 0 : i32
    return %c0_i32, %c0_i32_0 : i32, i32
  }
  func.func @transform_4(%arg0: i32) -> (i32, i32, i32) {
    %c0_i32 = arith.constant 0 : i32
    %c0_i32_0 = arith.constant 0 : i32
    %c0_i32_1 = arith.constant 0 : i32
    %c0_i32_2 = arith.constant 0 : i32
    return %c0_i32, %c0_i32_0, %c0_i32_1 : i32, i32, i32
  }
  func.func @transform_5(%arg0: i32) -> (i32, i32, i32) {
    %c0_i32 = arith.constant 0 : i32
    %c0_i32_0 = arith.constant 0 : i32
    %c0_i32_1 = arith.constant 0 : i32
    %c0_i32_2 = arith.constant 0 : i32
    return %c0_i32, %c0_i32_0, %c0_i32_1 : i32, i32, i32
  }
  func.func @transform_6(%arg0: i32) -> (i32, i32, i32) {
    %c0_i32 = arith.constant 0 : i32
    %c0_i32_0 = arith.constant 0 : i32
    %c0_i32_1 = arith.constant 0 : i32
    %c0_i32_2 = arith.constant 0 : i32
    return %c0_i32, %c0_i32_0, %c0_i32_1 : i32, i32, i32
  }
  func.func @transform_7(%arg0: i32) -> (i32, i32, i32) {
    %c0_i32 = arith.constant 0 : i32
    %c0_i32_0 = arith.constant 0 : i32
    %c0_i32_1 = arith.constant 0 : i32
    %c0_i32_2 = arith.constant 0 : i32
    return %c0_i32, %c0_i32_0, %c0_i32_1 : i32, i32, i32
  }
  func.func @transform_8(%arg0: i32) -> (i32, i32, i32) {
    %c0_i32 = arith.constant 0 : i32
    %c0_i32_0 = arith.constant 0 : i32
    %c0_i32_1 = arith.constant 0 : i32
    %c0_i32_2 = arith.constant 0 : i32
    return %c0_i32, %c0_i32_0, %c0_i32_1 : i32, i32, i32
  }
  func.func @transform_9(%arg0: i32) -> (i32, i32, i32) {
    %c0_i32 = arith.constant 0 : i32
    %c0_i32_0 = arith.constant 0 : i32
    %c0_i32_1 = arith.constant 0 : i32
    %c0_i32_2 = arith.constant 0 : i32
    return %c0_i32, %c0_i32_0, %c0_i32_1 : i32, i32, i32
  }
  func.func @transform_10(%arg0: i32) -> (i32, i32, i32) {
    %c0_i32 = arith.constant 0 : i32
    %c0_i32_0 = arith.constant 0 : i32
    %c0_i32_1 = arith.constant 0 : i32
    %c0_i32_2 = arith.constant 0 : i32
    return %c0_i32, %c0_i32_0, %c0_i32_1 : i32, i32, i32
  }
  func.func @transform_11(%arg0: i32) -> (i32, i32, i32) {
    %c0_i32 = arith.constant 0 : i32
    %c0_i32_0 = arith.constant 0 : i32
    %c0_i32_1 = arith.constant 0 : i32
    %c0_i32_2 = arith.constant 0 : i32
    return %c0_i32, %c0_i32_0, %c0_i32_1 : i32, i32, i32
  }
  func.func @transform_12(%arg0: i32) -> (i32, i32, i32) {
    %c0_i32 = arith.constant 0 : i32
    %c0_i32_0 = arith.constant 0 : i32
    %c0_i32_1 = arith.constant 0 : i32
    %c0_i32_2 = arith.constant 0 : i32
    return %c0_i32, %c0_i32_0, %c0_i32_1 : i32, i32, i32
  }
  func.func @transform_13(%arg0: i32) -> (i32, i32, i32) {
    %c0_i32 = arith.constant 0 : i32
    %c0_i32_0 = arith.constant 0 : i32
    %c0_i32_1 = arith.constant 0 : i32
    %c0_i32_2 = arith.constant 0 : i32
    return %c0_i32, %c0_i32_0, %c0_i32_1 : i32, i32, i32
  }
  func.func @transform_14(%arg0: i32) -> (i32, i32, i32) {
    %c0_i32 = arith.constant 0 : i32
    %c0_i32_0 = arith.constant 0 : i32
    %c0_i32_1 = arith.constant 0 : i32
    %c0_i32_2 = arith.constant 0 : i32
    return %c0_i32, %c0_i32_0, %c0_i32_1 : i32, i32, i32
  }
  func.func @transform_15(%arg0: i32) -> (i32, i32, i32) {
    %c0_i32 = arith.constant 0 : i32
    %c0_i32_0 = arith.constant 0 : i32
    %c0_i32_1 = arith.constant 0 : i32
    %c0_i32_2 = arith.constant 0 : i32
    return %c0_i32, %c0_i32_0, %c0_i32_1 : i32, i32, i32
  }
  func.func @transform_16(%arg0: i32) -> (i32, i32) {
    %c0_i32 = arith.constant 0 : i32
    %c0_i32_0 = arith.constant 0 : i32
    %c0_i32_1 = arith.constant 0 : i32
    return %c0_i32, %c0_i32_0 : i32, i32
  }
  func.func @transform_17(%arg0: i32) -> (i32, i32) {
    %c0_i32 = arith.constant 0 : i32
    %c0_i32_0 = arith.constant 0 : i32
    %c0_i32_1 = arith.constant 0 : i32
    return %c0_i32, %c0_i32_0 : i32, i32
  }
  func.func @transform_18(%arg0: i32) -> (i32, i32, i32) {
    %c0_i32 = arith.constant 0 : i32
    %c0_i32_0 = arith.constant 0 : i32
    %c0_i32_1 = arith.constant 0 : i32
    return %arg0, %c0_i32, %c0_i32_0 : i32, i32, i32
  }
}

</mosaic_0001>

<bundles_post_ra>
// kernel: bert_forward.1
= control target key start
LH: loop header
LB: loop body
LE: loop exit
PB: predicated region body
PF: predicated region fallthrough
CT: control target
= control target key end

     0   :  { %s4664_s0 = inlined_call_operand.vmem [shape: f32[2,8,128], index: 0, kind: input, shape index: {}]   ;;  %s4665_s1 = inlined_call_operand.vmem [shape: f32[2,1,8], index: 1, kind: input, shape index: {}]   ;;  %s4666_s2 = inlined_call_operand.vmem [shape: f32[1,128], index: 2, kind: input, shape index: {}]   ;;  %s4667_s3 = inlined_call_operand.vmem [shape: f32[1,128], index: 3, kind: input, shape index: {}]   ;;  %s4668_s4 = inlined_call_operand.hbm [shape: f32[2,128,384], index: 4, kind: input, shape index: {}]   ;;  %s4669_s5 = inlined_call_operand.vmem [shape: f32[2,1,384], index: 5, kind: input, shape index: {}]   ;;  %s4670_s6 = inlined_call_operand.hbm [shape: f32[2,128,128], index: 6, kind: input, shape index: {}]   ;;  %s4671_s7 = inlined_call_operand.vmem [shape: f32[2,1,128], index: 7, kind: input, shape index: {}]   ;;  %s4672_s8 = inlined_call_operand.vmem [shape: f32[2,1,128], index: 8, kind: input, shape index: {}]   ;;  %s4673_s9 = inlined_call_operand.vmem [shape: f32[2,1,128], index: 9, kind: input, shape index: {}]   ;;  %s4674_s10 = inlined_call_operand.hbm [shape: f32[2,128,512], index: 10, kind: input, shape index: {}]   ;;  %s4675_s11 = inlined_call_operand.vmem [shape: f32[2,1,512], index: 11, kind: input, shape index: {}]   ;;  %s4676_s12 = inlined_call_operand.hbm [shape: f32[2,512,128], index: 12, kind: input, shape index: {}]   ;;  %s4677_s13 = inlined_call_operand.vmem [shape: f32[2,1,128], index: 13, kind: input, shape index: {}]   ;;  %s4678_s14 = inlined_call_operand.vmem [shape: f32[2,1,128], index: 14, kind: input, shape index: {}]   ;;  %s4679_s15 = inlined_call_operand.vmem [shape: f32[2,1,128], index: 15, kind: input, shape index: {}]   ;;  %s4680_s16 = inlined_call_operand.vmem [shape: f32[128,128], index: 16, kind: input, shape index: {}]   ;;  %s4681_s17 = inlined_call_operand.vmem [shape: f32[1,128], index: 17, kind: input, shape index: {}]   ;;  %s4682_s18 = inlined_call_operand.hbm [shape: f32[2,1,128], index: 18, kind: output, shape index: {}]  }
   0x1   :  { %4691 = sst [smem:[#allocation21_spill]] %s4664_s0 }
   0x2   :  { %4692 = sst [smem:[#allocation22_spill]] %s4665_s1 }
   0x3   :  { %4693 = sst [smem:[#allocation23_spill]] %s4666_s2 }
   0x4   :  { %4694 = sst [smem:[#allocation24_spill]] %s4682_s18 }
   0x5   :  { %23 = vsyncpa [#allocation3], 0 }
   0x6   :  { %24 = vsyncpa [#allocation6], 0 }
   0x7   :  { %25 = vsyncpa [#allocation9], 0 }
   0x8   :  { %26 = vsyncpa [#allocation4], 0 }
   0x9   :  { %28 = vsyncpa [#allocation4 + $0x1], 0  ;;  %s4114_s27 = smov 0   ;;  %s4116_s28 = smov 0  }
   0xa   :  { %s4118_s29 = smov 0   ;;  %s4120_s30 = smov 0  }
   0xb LB: > { %4695 = sst [smem:[#allocation15_spill]] %s3988_s27  ;;  %s4135_s0 = sadd.s32 4294967295, %s4000_s30   ;;  %s4000_s30 = sphi %s4120_s30, %s4713_s30   ;;  %s3996_s29 = sphi %s4118_s29, %s4715_s29   ;;  %s3992_s28 = sphi %s4116_s28, %s4717_s28   ;;  %s3988_s27 = sphi %s4114_s27, %s4716_s27  }
   0xc   : > { %4696 = sst [smem:[#allocation16_spill]] %s3996_s29  ;;  %s3255_s19 = sadd.s32 4294967294, %s4000_s30  }
   0xd   : > { %4697 = sst [smem:[#allocation17_spill]] %s4000_s30  ;;  %s4139_s1 = sadd.s32 1, %s4000_s30  }
   0xe   : > { %4698 = sst [smem:[#allocation18_spill]] %s4139_s1  ;;  %s429_s20 = sadd.s32 1, %s3996_s29 }
   0xf   : > { %s426_s21 = ssub.s32 %s4000_s30, %s4139_s1  ;;  %p439_p0 = scmp.ne.s32.totalorder %s3996_s29, %s3992_s28 }
  0x10   : > { %p427_p1 = scmp.eq.s32.totalorder %s426_s21, 0  ;;  %p440_p2 = scmp.eq.s32.totalorder %s4135_s0, 1 }
  0x11   : > { %p445_p3 = scmp.ne.s32.totalorder %s3992_s28, %s3988_s27  ;;  %p446_p4 = scmp.eq.s32.totalorder %s3255_s19, 1 }
  0x12   : > { %s4150_s22 = scalar_select %p427_p1, %s3996_s29, %s429_s20  }
  0x13   : > { %p4152_p5 = por %p440_p2, %p439_p0  ;;  %p4156_p6 = por %p446_p4, %p445_p3 }
  0x14   : > { %4699 = sst [smem:[#allocation19_spill]] %s4150_s22  ;;  %p3256_p7 = scmp.ge.s32.totalorder %s4000_s30, 1 }
  0x15   : > { %s4701_s23 = scalar_select %p4156_p6, 1, 0 }
  0x16   : > { %p453_p8 = scmp.lt.s32.totalorder %s4000_s30, 3  ;;  %p3706_p9 = scmp.eq.s32.totalorder %s4135_s0, 0 }
  0x17   : > { %4702 = sst [smem:[#allocation20_spill]] %s4701_s23  ;;  %s4002_s25 = smov [#allocation5]  }
  0x18   : > { %p4163_p10 = pnand %p3256_p7, %p453_p8  ;;  %s487_s26 = sshll.u32 %s4002_s25, 4  ;;  %s488_s26 = int_to_ptr.vmem [resolvable:$true] %s487_s26 }
  0x19   : > { %s4003_s20 = smov [#allocation2]   ;;  %s3835_s22 = scalar_lea.vmem %s488_s26, 4096 }
  0x1a   : > { %p3689_p11 = pneg %p4163_p10  ;;  %s471_s21 = sshll.u32 %s4003_s20, 4  ;;  %s472_s21 = int_to_ptr.vmem [resolvable:$true] %s471_s21 }
  0x1b   : > { %p3836_p0 = scmp.ne.s32.totalorder %s488_s26, %s3835_s22  ;;  %p3843_p3 = scmp.lt.s32.totalorder %s488_s26, %s488_s26 }
  0x1c   : > { %p4171_p12 = pnand %p3706_p9, %p3689_p11  ;;  %p3844_p4 = scmp.lt.s32.totalorder %s3835_s22, %s3835_s22 }
  0x1e   : > { %p3826_p13 = pneg %p4171_p12  ;;  %p3845_p7 = por %p3844_p4, %p3843_p3 }
  0x20   : > { %p3838_p1 = pnand %p3836_p0, %p3826_p13 }
  0x22   : > { %p3839_p2 = pneg %p3838_p1 }
  0x24   : > { %p3846_p8 = pnand %p3845_p7, %p3839_p2 }
  0x26   : > { %3849 = shalt.err (!%p3846_p8)
}
  0x27   : > { %s4690_s25 = smov 128   ;;  %s4005_s29 = smov 8  }
  0x28   : > { %3695 = dma.hbm_to_vmem [thread:$0]  (!%p4171_p12), %s4670_s6, 4096, %s488_s26, [#allocation6], %s4690_s25, %s4690_s25, %s4005_s29  }
  0x29   : > { %s3861_s23 = scalar_lea.vmem %s472_s21, 12288  ;;  %p3869_p2 = scmp.lt.s32.totalorder %s472_s21, %s472_s21 }
  0x2a   : > { %p3862_p11 = scmp.ne.s32.totalorder %s472_s21, %s3861_s23  ;;  %p3870_p3 = scmp.lt.s32.totalorder %s3861_s23, %s3861_s23 }
  0x2c   : > { %p3864_p0 = pnand %p3862_p11, %p3826_p13  ;;  %p3871_p4 = por %p3870_p3, %p3869_p2 }
  0x2e   : > { %p3865_p1 = pneg %p3864_p0 }
  0x30   : > { %p3872_p7 = pnand %p3871_p4, %p3865_p1 }
  0x32   : > { %3875 = shalt.err (!%p3872_p7)
}
  0x33   : > { %s4006_s22 = smov 384   ;;  %s4007_s27 = smov 24  }
  0x34   : > { %3692 = dma.hbm_to_vmem [thread:$0]  (!%p4171_p12), %s4668_s4, 12288, %s472_s21, [#allocation3], %s4006_s22, %s4006_s22, %s4007_s27  }
  0x35   : > { %s4008_s1 = smov [#allocation7]  }
  0x36   : > { %s509_s26 = sshll.u32 %s4008_s1, 4  ;;  %s510_s26 = int_to_ptr.vmem [resolvable:$true] %s509_s26 }
  0x37   : > { %s3887_s20 = scalar_lea.vmem %s510_s26, 16384  ;;  %p3895_p1 = scmp.lt.s32.totalorder %s510_s26, %s510_s26 }
  0x38   : > { %p3888_p8 = scmp.ne.s32.totalorder %s510_s26, %s3887_s20  ;;  %p3896_p2 = scmp.lt.s32.totalorder %s3887_s20, %s3887_s20 }
  0x3a   : > { %p3890_p11 = pnand %p3888_p8, %p3826_p13  ;;  %p3897_p3 = por %p3896_p2, %p3895_p1 }
  0x3c   : > { %p3891_p0 = pneg %p3890_p11 }
  0x3e   : > { %p3898_p4 = pnand %p3897_p3, %p3891_p0 }
  0x40   : > { %3901 = shalt.err (!%p3898_p4)
}
  0x41   : > { %s4009_s23 = smov 512   ;;  %s4010_s25 = smov 32  }
  0x42   : > { %3698 = dma.hbm_to_vmem [thread:$0]  (!%p4171_p12), %s4674_s10, 16384, %s510_s26, [#allocation6], %s4009_s23, %s4009_s23, %s4010_s25  }
  0x43   : > { %s4011_s30 = smov [#allocation8]  }
  0x44   : > { %s525_s21 = sshll.u32 %s4011_s30, 4  ;;  %s526_s21 = int_to_ptr.vmem [resolvable:$true] %s525_s21 }
  0x45   : > { %s3913_s22 = scalar_lea.vmem %s526_s21, 16384  ;;  %p3921_p0 = scmp.lt.s32.totalorder %s526_s21, %s526_s21 }
  0x46   : > { %p3914_p7 = scmp.ne.s32.totalorder %s526_s21, %s3913_s22  ;;  %p3922_p1 = scmp.lt.s32.totalorder %s3913_s22, %s3913_s22 }
  0x48   : > { %p3916_p8 = pnand %p3914_p7, %p3826_p13  ;;  %p3923_p2 = por %p3922_p1, %p3921_p0 }
  0x4a   : > { %p3917_p11 = pneg %p3916_p8 }
  0x4c   : > { %p3924_p3 = pnand %p3923_p2, %p3917_p11 }
  0x4e   : > { %3927 = shalt.err (!%p3924_p3)
}
  0x4f   : > { %s4705_s1 = smov 128   ;;  %569 = sbr.rel (%p4163_p10) target bundleno = 5878 (0x16f6), region = 92 }
  0x50   : > { %3701 = dma.hbm_to_vmem [thread:$0]  (!%p4171_p12), %s4676_s12, 16384, %s526_s21, [#allocation9], %s4705_s1, %s4705_s1, %s4005_s29  }
  0x54   : > { %3971 = dma.done.wait (%p3706_p9), [#allocation3], 12288  }
  0x55   : > { %3973 = vsyncadd (%p3706_p9), [#allocation3], 4294955008 }
  0x56   : > { %3975 = dma.done.wait (%p3706_p9), [#allocation6], 20480  }
  0x57   : > { %3977 = vsyncadd (%p3706_p9), [#allocation6], 4294946816 }
  0x58   : > { %3979 = dma.done.wait (%p3706_p9), [#allocation9], 16384  }
  0x59   : > { %3981 = vsyncadd (%p3706_p9), [#allocation9], 4294950912  ;;  %p636_p10 = scmp.lt.s32.totalorder %s4135_s0, 1  ;;  %s4706_s23 = sld [smem:[#allocation21_spill]]  ;;  %v717_v1 = vld [vmem:[#allocation2 + $0x158] sm:$0xff]  ;;  %v720_v2 = vld [vmem:[#allocation2 + $0x170] sm:$0xff] }
  0x5a   : > { %v716_v3 = vld [vmem:[#allocation2 + $0x150] sm:$0xff]  ;;  %v745_v4 = vpack.c.bf16 %v720_v2, %v717_v1  ;;  %v4012_v5 = vmov 0.0   ;;  %v719_v6 = vld [vmem:[#allocation2 + $0x168] sm:$0xff]  ;;  %v718_v7 = vld [vmem:[#allocation2 + $0x160] sm:$0xff]  ;;  %v4013_v43 = vmov 0   ;;  %vm4014_vm0 = vmmov 0  }
  0x5b   : > { %s4231_s29 = scalar_select %p636_p10, %s4135_s0, 1  ;;  %3475 = vmatprep.subr.bf16.mxu1 %v4012_v5  ;;  %v721_v8 = vld [vmem:[#allocation2 + $0x178] sm:$0xff]  ;;  %v744_v9 = vpack.c.bf16 %v719_v6, %v716_v3  ;;  %v711_v11 = vld [vmem:[#allocation2 + $0x128] sm:$0xff]  ;;  %v714_v12 = vld [vmem:[#allocation2 + $0x140] sm:$0xff]  ;;  %796 = vmatprep.mubr.bf16.mxu0 %v4013_v43  ;;  %vm919_vm1 = vcmask 1043456   ;;  %vm848_vm2 = vcmask 261120  }
  0x5c   : > { %v746_v10 = vpack.c.bf16 %v721_v8, %v718_v7  ;;  %v710_v13 = vld [vmem:[#allocation2 + $0x120] sm:$0xff]  ;;  %764 = vmatprep.subr.bf16.mxu0 %v745_v4  ;;  %v742_v14 = vpack.c.bf16 %v714_v12, %v711_v11  ;;  %v713_v15 = vld [vmem:[#allocation2 + $0x138] sm:$0xff]  ;;  %v712_v16 = vld [vmem:[#allocation2 + $0x130] sm:$0xff]  ;;  %3491 = vmatprep.mubr.msk.bf16.mxu1 %vm4014_vm0, %v4012_v5  ;;  %s4707_s21 = sld [smem:[#allocation23_spill]]  ;;  %s4016_s19 = smov 96   ;;  %vm903_vm3 = vcmask 64512  }
  0x5d   : > { %s3267_s24 = sshll.u32 %s4231_s29, 3  ;;  %v715_v17 = vld [vmem:[#allocation2 + $0x148] sm:$0xff]  ;;  %765 = vmatpush1.bf16.msra.mxu0 %v744_v9  ;;  %v741_v18 = vpack.c.bf16 %v713_v15, %v710_v13  ;;  %v705_v24 = vld [vmem:[#allocation2 + $0xf8] sm:$0xff]  ;;  %v708_v25 = vld [vmem:[#allocation2 + $0x110] sm:$0xff]  ;;  %s4017_s20 = smov 32   ;;  %vm1315_vm4 = vcmask 523264  }
  0x5e   : > { %3476 = vmatpush3.bf16.msra.mxu1 %v746_v10  ;;  %v743_v19 = vpack.c.bf16 %v715_v17, %v712_v16  ;;  %766 = vmatprep.subr.bf16.mxu0 %v742_v14  ;;  %v739_v26 = vpack.c.bf16 %v708_v25, %v705_v24  ;;  %v704_v27 = vld [vmem:[#allocation2 + $0xf0] sm:$0xff]  ;;  %v707_v28 = vld [vmem:[#allocation2 + $0x108] sm:$0xff]  ;;  %v706_v29 = vld [vmem:[#allocation2 + $0x100] sm:$0xff]  ;;  %s4708_s27 = sld [smem:[#allocation22_spill]]  ;;  %vm1317_vm5 = vcmask 785408   ;;  %s634_s1 = sand.u32 1, %s3992_s28  }
  0x5f   : > { %s639_s18 = scalar_lea.vmem %s4706_s23, %s3267_s24  ;;  %3477 = vmatprep.subr.bf16.mxu1 %v4012_v5  ;;  %v738_v30 = vpack.c.bf16 %v707_v28, %v704_v27  ;;  %v709_v31 = vld [vmem:[#allocation2 + $0x118] sm:$0xff]  ;;  %v699_v33 = vld [vmem:[#allocation2 + $0xc8] sm:$0xff]  ;;  %v702_v34 = vld [vmem:[#allocation2 + $0xe0] sm:$0xff]  ;;  %v749_v27 = vlaneseq  ;;  %s4015_s24 = smov 64  }
  0x60   : > { %v644_v0 = vld [vmem:[%s639_s18] sm:$0xff]  ;;  %v740_v32 = vpack.c.bf16 %v709_v31, %v706_v29  ;;  %v736_v35 = vpack.c.bf16 %v702_v34, %v699_v33  ;;  %v701_v37 = vld [vmem:[#allocation2 + $0xd8] sm:$0xff]  ;;  %v700_v38 = vld [vmem:[#allocation2 + $0xd0] sm:$0xff]  ;;  %s3307_s25 = sshll.u32 %s4135_s0, 4  ;;  %s635_s26 = scalar_lea.vmem [#allocation10], %s634_s1 }
  0x61   : > { %648 = vadd.xlane.f32.xlu0 %v644_v0  ;;  %767 = vmatpush1.bf16.msra.mxu0 %v741_v18  ;;  %v698_v36 = vld [vmem:[#allocation2 + $0xc0] sm:$0xff]  ;;  %v703_v40 = vld [vmem:[#allocation2 + $0xe8] sm:$0xff]  ;;  %v693_v41 = vld [vmem:[#allocation2 + $0x98] sm:$0xff]  ;;  %s3150_s23 = sshll.u32 %s635_s26, 4  ;;  %s3138_s18 = scalar_lea.sflag [#allocation4], %s634_s1  ;;  %s3151_s23 = int_to_ptr.vmem [resolvable:$true] %s3150_s23 }
  0x62   : > { %3478 = vmatpush3.bf16.msra.mxu1 %v743_v19  ;;  %768 = vmatprep.subr.bf16.mxu0 %v739_v26  ;;  %v735_v39 = vpack.c.bf16 %v701_v37, %v698_v36  ;;  %v696_v42 = vld [vmem:[#allocation2 + $0xb0] sm:$0xff]  ;;  %v737_v44 = vpack.c.bf16 %v703_v40, %v700_v38  ;;  %v695_v47 = vld [vmem:[#allocation2 + $0xa8] sm:$0xff]  ;;  %v694_v48 = vld [vmem:[#allocation2 + $0xa0] sm:$0xff] }
  0x63   : > { %3479 = vmatprep.subr.bf16.mxu1 %v4012_v5  ;;  %v733_v45 = vpack.c.bf16 %v696_v42, %v693_v41  ;;  %v692_v46 = vld [vmem:[#allocation2 + $0x90] sm:$0xff]  ;;  %v697_v50 = vld [vmem:[#allocation2 + $0xb8] sm:$0xff]  ;;  %v687_v51 = vld [vmem:[#allocation2 + $0x68] sm:$0xff] }
  0x64   : > { %v732_v49 = vpack.c.bf16 %v695_v47, %v692_v46  ;;  %v690_v52 = vld [vmem:[#allocation2 + $0x80] sm:$0xff]  ;;  %v734_v53 = vpack.c.bf16 %v697_v50, %v694_v48  ;;  %v689_v56 = vld [vmem:[#allocation2 + $0x78] sm:$0xff]  ;;  %v688_v57 = vld [vmem:[#allocation2 + $0x70] sm:$0xff]  ;;  %s4321_s30 = scalar_lea.vmem %s4708_s27, %s4231_s29  ;;  %s3928_s27 = scalar_lea.vmem %s3151_s23, 16 }
  0x65   : > { %769 = vmatpush1.bf16.msra.mxu0 %v738_v30  ;;  %v730_v54 = vpack.c.bf16 %v690_v52, %v687_v51  ;;  %v686_v55 = vld [vmem:[#allocation2 + $0x60] sm:$0xff]  ;;  %v691_v58 = vld [vmem:[#allocation2 + $0x88] sm:$0xff]  ;;  %v681_v59 = vld [vmem:[#allocation2 + $0x38] sm:$0xff]  ;;  %p3929_p9 = scmp.ne.s32.totalorder %s3151_s23, %s3928_s27  ;;  %s4018_s29 = smov [#allocation10]  }
  0x66   : > { %3480 = vmatpush3.bf16.msra.mxu1 %v740_v32  ;;  %770 = vmatprep.subr.bf16.mxu0 %v736_v35  ;;  %v684_v60 = vld [vmem:[#allocation2 + $0x50] sm:$0xff]  ;;  %v729_v61 = vpack.c.bf16 %v689_v56, %v686_v55  ;;  %v731_v62 = vpack.c.bf16 %v691_v58, %v688_v57  ;;  %v683_v1 = vld [vmem:[#allocation2 + $0x48] sm:$0xff]  ;;  %v682_v2 = vld [vmem:[#allocation2 + $0x40] sm:$0xff] }
  0x67   : > { %3481 = vmatprep.subr.bf16.mxu1 %v4012_v5  ;;  %v727_v63 = vpack.c.bf16 %v684_v60, %v681_v59  ;;  %v685_v3 = vld [vmem:[#allocation2 + $0x58] sm:$0xff]  ;;  %v675_v4 = vld [vmem:[#allocation2 + $0x8] sm:$0xff]  ;;  %v678_v6 = vld [vmem:[#allocation2 + $0x20] sm:$0xff]  ;;  %p3930_p12 = pnand %p3929_p9, %p4152_p5 }
  0x68   : > { %v728_v8 = vpack.c.bf16 %v685_v3, %v682_v2  ;;  %v724_v9 = vpack.c.bf16 %v678_v6, %v675_v4  ;;  %v674_v10 = vld [vmem:[#allocation2] sm:$0xff]  ;;  %v677_v11 = vld [vmem:[#allocation2 + $0x18] sm:$0xff]  ;;  %v676_v12 = vld [vmem:[#allocation2 + $0x10] sm:$0xff] }
  0x69   : > { %771 = vmatpush1.bf16.msra.mxu0 %v735_v39  ;;  %v679_v13 = vld [vmem:[#allocation2 + $0x28] sm:$0xff]  ;;  %v723_v14 = vpack.c.bf16 %v677_v11, %v674_v10  ;;  %v747_v29 = vld [vmem:[%s4669_s5] sm:$0x7]  ;;  %p3931_p13 = pneg %p3930_p12 }
  0x6a   : > { %3482 = vmatpush3.bf16.msra.mxu1 %v737_v44  ;;  %772 = vmatprep.subr.bf16.mxu0 %v733_v45  ;;  %v725_v15 = vpack.c.bf16 %v679_v13, %v676_v12 }
  0x6b   : > { %3483 = vmatprep.subr.bf16.mxu1 %v4012_v5 }
  0x6d   : > { %773 = vmatpush1.bf16.msra.mxu0 %v732_v49 }
  0x6e   : > { %3484 = vmatpush3.bf16.msra.mxu1 %v734_v53  ;;  %774 = vmatprep.subr.bf16.mxu0 %v730_v54 }
  0x6f   : > { %3485 = vmatprep.subr.bf16.mxu1 %v4012_v5 }
  0x71   : > { %775 = vmatpush1.bf16.msra.mxu0 %v729_v61  ;;  %v3271_v61 = vld [vmem:[%s4321_s30] ss:$0 sm:$0xff] }
  0x72   : > { %3486 = vmatpush3.bf16.msra.mxu1 %v731_v62  ;;  %776 = vmatprep.subr.bf16.mxu0 %v727_v63 }
  0x73   : > { %3487 = vmatprep.subr.bf16.mxu1 %v4012_v5 }
  0x76   : > { %3488 = vmatpush3.bf16.msra.mxu1 %v728_v8 }
  0x77   : > { %3489 = vmatprep.subr.bf16.mxu1 %v4012_v5 }
  0x7a   : > { %3490 = vmatpush3.bf16.msra.mxu1 %v725_v15 }
  0x7b   : > { %3501 = vmatprep.subr.bf16.mxu1 %v4012_v5 }
  0xea   : > { %v649_v20 = vpop.xlane.xlu0 %648 }
  0xeb   : > { %v651_v21 = vmul.f32 0.0078125, %v649_v20  ;;  %v3268_v20 = vld [vmem:[%s4707_s21] ss:$0 sm:$0xff]  ;;  %s3932_s21 = sshll.u32 %s4018_s29, 4  ;;  %s3933_s21 = int_to_ptr.vmem [resolvable:$false] %s3932_s21 }
  0xec   : > { %s3934_s0 = scalar_lea.vmem %s3933_s21, 32  ;;  %p3935_p4 = scmp.lt.s32.totalorder %s3151_s23, %s3933_s21 }
  0xed   : > { %v4240_v22 = vsub.f32 %v644_v0, %v651_v21  ;;  %v680_v0 = vld [vmem:[#allocation2 + $0x30] sm:$0xff]  ;;  %p3936_p7 = scmp.lt.s32.totalorder %s3934_s0, %s3928_s27 }
  0xee   : > { %v726_v7 = vpack.c.bf16 %v683_v1, %v680_v0 }
  0xef   : > { %v653_v23 = vmul.f32 %v4240_v22, %v4240_v22  ;;  %p3937_p8 = por %p3936_p7, %p3935_p4 }
  0xf0   : > { %777 = vmatpush1.bf16.msra.mxu0 %v726_v7 }
  0xf1   : > { %654 = vadd.xlane.f32.xlu0 %v653_v23  ;;  %778 = vmatprep.subr.bf16.mxu0 %v724_v9  ;;  %v3269_v23 = vld [vmem:[%s4667_s3] ss:$0 sm:$0xff]  ;;  %p3938_p11 = pnand %p3937_p8, %p3931_p13 }
  0xf4   : > { %779 = vmatpush1.bf16.msra.mxu0 %v723_v14 }
  0xf5   : > { %3495 = vmatprep.subr.bf16.mxu0 %v4012_v5 }
 0x17a   : > { %v655_v16 = vpop.xlane.xlu0 %654 }
 0x17b   : > { %v656_v17 = vmul.f32 0.0078125, %v655_v16 }
 0x17d   : > { %v657_v18 = vadd.f32 1e-12, %v656_v17 }
 0x17f   : > { %3763 = vrsqrt.f32 %v657_v18 }
 0x18c   : > { %v3764_v19 = vpop.eup %3763 }
 0x18d   : > { %v659_v21 = vmul.f32 %v3764_v19, %v4240_v22  ;;  %v4269_v22 = vshrl.u32 %v749_v27, 7 }
 0x18f   : > { %v666_v24 = vmul.f32 %v3268_v20, %v659_v21  ;;  %v4272_v28 = vsub.s32 2, %v4269_v22  ;;  %v4278_v30 = vsub.s32 1, %v4269_v22  ;;  %v4281_v31 = vsub.s32 0, %v4269_v22 }
 0x191   : > { %v4261_v25 = vadd.f32 %v3269_v23, %v666_v24  ;;  %v760_v32 = vrot.slane %v747_v29, %v4272_v28  ;;  %v756_v33 = vrot.slane %v747_v29, %v4278_v30  ;;  %v752_v36 = vrot.slane %v747_v29, %v4281_v31 }
 0x193   : > { %v722_v26 = vpack.c.bf16 %v4261_v25, %v4261_v25 }
 0x195   : > { %797 = vmatmul.mubr.bf16.vlgmr.msra.gmra.mxu0 %v722_v26  ;;  %3492 = vmatmul.mubr.bf16.vlgmr.msra.gmra.mxu1 %v722_v26 }
 0x196   : > { %3497 = vmatprep.mubr.msk.bf16.mxu0 %vm4014_vm0, %v4012_v5  ;;  %3503 = vmatprep.mubr.msk.bf16.mxu1 %vm4014_vm0, %v4012_v5 }
 0x255   : > { %v798_v34 = vpop.f32.mrf.mxu0  ;;  %v839_v35 = vpop.f32.mrf.mxu1 }
 0x256   : > { %v840_v37 = vadd.f32 %v839_v35, %v760_v32  ;;  %v799_v45 = vadd.f32 %v798_v34, %v752_v36 }
 0x257   : > { %v800_v38 = vpop.f32.mrf.mxu0  ;;  %v3493_v39 = vpop.f32.mrf.mxu1 }
 0x258   : > { %v4286_v40 = vpack.c.bf16 %v840_v37, %v840_v37  ;;  %v801_v41 = vadd.f32 %v800_v38, %v756_v33  ;;  %v845_v51 = vpack.c.bf16 %v799_v45, %v799_v45 }
 0x259   : > { %v802_v42 = vpop.f32.mrf.mxu0  ;;  %v842_v44 = vpop.f32.mrf.mxu1 }
 0x25a   : > { %v846_v46 = vpack.c.bf16 %v801_v41, %v801_v41  ;;  %v921_v47 = vsel %vm919_vm1, %v4286_v40, 0 }
 0x25b   : > { %v803_v48 = vpop.f32.mrf.mxu0  ;;  %v3494_v49 = vpop.f32.mrf.mxu1  ;;  %3502 = vmatpush3.bf16.msra.mxu1 %v921_v47 }
 0x25c   : > { %1080 = vrot.lane.b32.xlu0 %v846_v46, %s4015_s24  ;;  %967 = vrot.lane.b32.xlu1 %v846_v46, %s4016_s19  ;;  %v853_v50 = vsel %vm848_vm2, %v846_v46, 0 }
 0x25d   : > { %3496 = vmatpush3.bf16.xpose.msra.mxu0 %v853_v50  ;;  %3513 = vmatprep.subr.bf16.mxu1 %v4012_v5 }
 0x25e   : > { %3507 = vmatprep.subr.bf16.mxu0 %v4012_v5 }
 0x260   : > { %964 = vrot.lane.b32.xlu1 %v845_v51, %s4016_s19 }
 0x264   : > { %1078 = vrot.lane.b32.xlu1 %v845_v51, %s4015_s24  ;;  %3498 = vmatmul.mubr.msk.bf16.vlgmr.msra.gmra.mxu0 %vm848_vm2, %v845_v51 }
 0x265   : > { %3509 = vmatprep.mubr.msk.bf16.mxu0 %vm4014_vm0, %v4012_v5 }
 0x268   : > { %1192 = vrot.lane.b32.xlu1 %v846_v46, %s4017_s20 }
 0x26c   : > { %1190 = vrot.lane.b32.xlu1 %v845_v51, %s4017_s20 }
 0x2ce   : > { %v968_v52 = vpop.permute.xlu1 %967  ;;  %v1081_v55 = vpop.permute.xlu0 %1080 }
 0x2cf   : > { %v973_v53 = vsel %vm848_vm2, %v968_v52, 0  ;;  %v1086_v57 = vsel %vm848_vm2, %v1081_v55, 0 }
 0x2d0   : > { %3508 = vmatpush3.bf16.xpose.msra.mxu0 %v973_v53 }
 0x2d1   : > { %3519 = vmatprep.subr.bf16.mxu0 %v4012_v5 }
 0x2d2   : > { %v965_v54 = vpop.permute.xlu1 %964 }
 0x2d6   : > { %v1079_v56 = vpop.permute.xlu1 %1078 }
 0x2d7   : > { %3510 = vmatmul.mubr.msk.bf16.vlgmr.msra.gmra.mxu0 %vm848_vm2, %v965_v54 }
 0x2d8   : > { %3520 = vmatpush3.bf16.xpose.msra.mxu0 %v1086_v57  ;;  %3521 = vmatprep.mubr.msk.bf16.mxu0 %vm4014_vm0, %v4012_v5 }
 0x2d9   : > { %3531 = vmatprep.subr.bf16.mxu0 %v4012_v5 }
 0x2da   : > { %v1193_v58 = vpop.permute.xlu1 %1192 }
 0x2db   : > { %v1198_v59 = vsel %vm848_vm2, %v1193_v58, 0 }
 0x2de   : > { %v1191_v60 = vpop.permute.xlu1 %1190 }
 0x2df   : > { %3522 = vmatmul.mubr.msk.bf16.vlgmr.msra.gmra.mxu0 %vm848_vm2, %v1079_v56 }
 0x2e0   : > { %3532 = vmatpush3.bf16.xpose.msra.mxu0 %v1198_v59  ;;  %3533 = vmatprep.mubr.msk.bf16.mxu0 %vm4014_vm0, %v4012_v5 }
 0x2e1   : > { %3543 = vmatprep.subr.bf16.mxu0 %v4012_v5 }
 0x2e7   : > { %3534 = vmatmul.mubr.msk.bf16.vlgmr.msra.gmra.mxu0 %vm848_vm2, %v1191_v60 }
 0x2e8   : > { %3559 = vmatprep.mubr.msk.bf16.mxu0 %vm4014_vm0, %v4012_v5 }
 0x324   : > { %v889_v62 = vpop.f32.mrf.mxu0 }
 0x325   : > { %v895_v63 = vmul.f32 0.17677669, %v889_v62 }
 0x326   : > { %v3499_v0 = vpop.f32.mrf.mxu0 }
 0x327   : > { %v902_v1 = vadd.f32 %v3271_v61, %v895_v63 }
 0x328   : > { %v892_v2 = vpop.f32.mrf.mxu0 }
 0x329   : > { %v904_v3 = vsel %vm903_vm3, %v902_v1, -inf }
 0x32a   : > { %905 = vmax.xlane.f32.xlu1 %v904_v3  ;;  %v3500_v4 = vpop.f32.mrf.mxu0 }
 0x397   : > { %v1009_v6 = vpop.f32.mrf.mxu0 }
 0x398   : > { %v1015_v7 = vmul.f32 0.17677669, %v1009_v6 }
 0x399   : > { %v3511_v8 = vpop.f32.mrf.mxu0 }
 0x39a   : > { %v1016_v9 = vadd.f32 %v3271_v61, %v1015_v7 }
 0x39b   : > { %v1012_v10 = vpop.f32.mrf.mxu0 }
 0x39c   : > { %v1017_v11 = vsel %vm903_vm3, %v1016_v9, -inf }
 0x39d   : > { %1018 = vmax.xlane.f32.xlu0 %v1017_v11  ;;  %v3512_v12 = vpop.f32.mrf.mxu0 }
 0x39f   : > { %v1122_v13 = vpop.f32.mrf.mxu0 }
 0x3a0   : > { %v1128_v14 = vmul.f32 0.17677669, %v1122_v13 }
 0x3a1   : > { %v3523_v15 = vpop.f32.mrf.mxu0 }
 0x3a2   : > { %v1129_v16 = vadd.f32 %v3271_v61, %v1128_v14 }
 0x3a3   : > { %v1125_v17 = vpop.f32.mrf.mxu0 }
 0x3a4   : > { %v1130_v18 = vsel %vm903_vm3, %v1129_v16, -inf  ;;  %v1334_v17 = vld [vmem:[#allocation5 + $0x78] sm:$0xff] }
 0x3a5   : > { %1131 = vmax.xlane.f32.xlu1 %v1130_v18  ;;  %v3524_v19 = vpop.f32.mrf.mxu0  ;;  %v1331_v18 = vld [vmem:[#allocation5 + $0x60] sm:$0xff] }
 0x3a7   : > { %v1234_v20 = vpop.f32.mrf.mxu0 }
 0x3a8   : > { %v1240_v21 = vmul.f32 0.17677669, %v1234_v20  ;;  %v1332_v20 = vld [vmem:[#allocation5 + $0x68] sm:$0xff] }
 0x3a9   : > { %v3535_v23 = vpop.f32.mrf.mxu0 }
 0x3aa   : > { %v1241_v24 = vadd.f32 %v3271_v61, %v1240_v21  ;;  %v1342_v21 = vpack.c.bf16 %v1332_v20, %v1331_v18  ;;  %v1477_v18 = vld [vmem:[#allocation7 + $0x1d0] sm:$0xff]  ;;  %v1468_v20 = vld [vmem:[#allocation7 + $0x188] sm:$0xff] }
 0x3ab   : > { %v1237_v26 = vpop.f32.mrf.mxu0 }
 0x3ac   : > { %v1242_v27 = vsel %vm903_vm3, %v1241_v24, -inf  ;;  %v1330_v26 = vld [vmem:[#allocation5 + $0x58] sm:$0xff] }
 0x3ad   : > { %1243 = vmax.xlane.f32.xlu1 %v1242_v27  ;;  %v3536_v29 = vpop.f32.mrf.mxu0 }
 0x3b3   : > { %v906_v32 = vpop.xlane.xlu1 %905 }
 0x3b4   : > { %v907_v33 = vsub.f32 %v902_v1, %v906_v32 }
 0x3b6   : > { %v908_v34 = vmul.f32 1.442695, %v907_v33  ;;  %v1327_v33 = vld [vmem:[#allocation5 + $0x40] sm:$0xff] }
 0x3b8   : > { %3765 = vpow2.f32 %v908_v34  ;;  %v1328_v34 = vld [vmem:[#allocation5 + $0x48] sm:$0xff] }
 0x3c5   : > { %v3766_v35 = vpop.eup %3765 }
 0x3c6   : > { %v910_v36 = vsel %vm903_vm3, %v3766_v35, 0.0 }
 0x3c7   : > { %911 = vadd.xlane.f32.xlu0 %v910_v36  ;;  %v1340_v36 = vpack.c.bf16 %v1328_v34, %v1327_v33  ;;  %v1469_v33 = vld [vmem:[#allocation7 + $0x190] sm:$0xff] }
 0x426   : > { %v1019_v37 = vpop.xlane.xlu0 %1018 }
 0x427   : > { %v1020_v38 = vsub.f32 %v1016_v9, %v1019_v37 }
 0x429   : > { %v1021_v39 = vmul.f32 1.442695, %v1020_v38  ;;  %v1325_v38 = vld [vmem:[#allocation5 + $0x30] sm:$0xff] }
 0x42b   : > { %3767 = vpow2.f32 %v1021_v39  ;;  %v1326_v39 = vld [vmem:[#allocation5 + $0x38] sm:$0xff] }
 0x42e   : > { %v1132_v41 = vpop.xlane.xlu1 %1131 }
 0x42f   : > { %v1133_v42 = vsub.f32 %v1129_v16, %v1132_v41  ;;  %v1333_v16 = vld [vmem:[#allocation5 + $0x70] sm:$0xff] }
 0x430   : > { %v1343_v19 = vpack.c.bf16 %v1334_v17, %v1333_v16 }
 0x431   : > { %v1134_v44 = vmul.f32 1.442695, %v1133_v42  ;;  %v1339_v42 = vpack.c.bf16 %v1326_v39, %v1325_v38 }
 0x432   : > { %3544 = vmatpush3.bf16.msra.mxu0 %v1343_v19  ;;  %v1481_v19 = vld [vmem:[#allocation7 + $0x1f0] sm:$0xff] }
 0x433   : > { %3769 = vpow2.f32 %v1134_v44  ;;  %3545 = vmatprep.subr.bf16.mxu0 %v4012_v5 }
 0x436   : > { %v1244_v50 = vpop.xlane.xlu1 %1243  ;;  %3546 = vmatpush3.bf16.msra.mxu0 %v1342_v21  ;;  %v1514_v21 = vpack.c.bf16 %v1481_v19, %v1477_v18  ;;  %v1438_v18 = vld [vmem:[#allocation7 + $0x98] sm:$0xff] }
 0x437   : > { %v1245_v51 = vsub.f32 %v1241_v24, %v1244_v50  ;;  %v1329_v24 = vld [vmem:[#allocation5 + $0x50] sm:$0xff]  ;;  %3547 = vmatprep.subr.bf16.mxu0 %v4012_v5  ;;  %v1322_v50 = vld [vmem:[#allocation5 + $0x18] sm:$0xff] }
 0x438   : > { %v3768_v45 = vpop.eup %3767  ;;  %v1341_v29 = vpack.c.bf16 %v1330_v26, %v1329_v24  ;;  %v1470_v24 = vld [vmem:[#allocation7 + $0x198] sm:$0xff] }
 0x439   : > { %v1023_v46 = vsel %vm903_vm3, %v3768_v45, 0.0  ;;  %v1246_v52 = vmul.f32 1.442695, %v1245_v51  ;;  %v1442_v19 = vld [vmem:[#allocation7 + $0xb8] sm:$0xff] }
 0x43a   : > { %1024 = vadd.xlane.f32.xlu1 %v1023_v46  ;;  %3548 = vmatpush3.bf16.msra.mxu0 %v1341_v29  ;;  %v1324_v46 = vld [vmem:[#allocation5 + $0x28] sm:$0xff]  ;;  %v1467_v29 = vld [vmem:[#allocation7 + $0x180] sm:$0xff] }
 0x43b   : > { %3549 = vmatprep.subr.bf16.mxu0 %v4012_v5 }
 0x43e   : > { %3550 = vmatpush3.bf16.msra.mxu0 %v1340_v36 }
 0x43f   : > { %3551 = vmatprep.subr.bf16.mxu0 %v4012_v5 }
 0x440   : > { %v3770_v47 = vpop.eup %3769 }
 0x441   : > { %v1136_v48 = vsel %vm903_vm3, %v3770_v47, 0.0 }
 0x442   : > { %1137 = vadd.xlane.f32.xlu0 %v1136_v48  ;;  %3552 = vmatpush3.bf16.msra.mxu0 %v1339_v42  ;;  %v1460_v42 = vld [vmem:[#allocation7 + $0x148] sm:$0xff] }
 0x443   : > { %3553 = vmatprep.subr.bf16.mxu0 %v4012_v5 }
 0x44b   : > { %1142 = vrot.lane.b32.xlu1 %v4286_v40, %s4015_s24 }
 0x450   : > { %v912_v49 = vpop.xlane.xlu0 %911 }
 0x451   : > { %3771 = vrcp.f32 %v912_v49  ;;  %v1321_v49 = vld [vmem:[#allocation5 + $0x10] sm:$0xff] }
 0x452   : > { %3773 = vpow2.f32 %v1246_v52  ;;  %v1337_v51 = vpack.c.bf16 %v1322_v50, %v1321_v49  ;;  %v1319_v52 = vld [vmem:[#allocation5] sm:$0xff] }
 0x453   : > { %v1463_v49 = vld [vmem:[#allocation7 + $0x160] sm:$0xff] }
 0x458   : > { %1030 = vrot.lane.b32.xlu0 %v4286_v40, %s4016_s19 }
 0x45e   : > { %v3772_v53 = vpop.eup %3771 }
 0x45f   : > { %v914_v54 = vmul.f32 %v3772_v53, %v3766_v35  ;;  %v3774_v56 = vpop.eup %3773  ;;  %v1320_v53 = vld [vmem:[#allocation5 + $0x8] sm:$0xff] }
 0x460   : > { %v1248_v57 = vsel %vm903_vm3, %v3774_v56, 0.0 }
 0x461   : > { %v915_v55 = vpack.c.bf16 %v914_v54, %v914_v54  ;;  %v1336_v54 = vpack.c.bf16 %v1320_v53, %v1319_v52  ;;  %v1461_v52 = vld [vmem:[#allocation7 + $0x150] sm:$0xff] }
 0x462   : > { %v1465_v53 = vld [vmem:[#allocation7 + $0x170] sm:$0xff] }
 0x463   : > { %3504 = vmatmul.mubr.msk.bf16.vlgmr.msra.gmra.mxu1 %vm903_vm3, %v915_v55 }
 0x464   : > { %3515 = vmatprep.mubr.msk.bf16.mxu1 %vm4014_vm0, %v4012_v5 }
 0x46f   : > { %1249 = vadd.xlane.f32.xlu1 %v1248_v57 }
 0x480   : > { %1254 = vrot.lane.b32.xlu1 %v4286_v40, %s4017_s20 }
 0x4c3   : > { %v1025_v58 = vpop.xlane.xlu1 %1024 }
 0x4c4   : > { %3775 = vrcp.f32 %v1025_v58 }
 0x4c7   : > { %v1143_v0 = vpop.permute.xlu1 %1142 }
 0x4c8   : > { %v1148_v2 = vsel %vm919_vm1, %v1143_v0, 0 }
 0x4cb   : > { %v1138_v59 = vpop.xlane.xlu0 %1137 }
 0x4cc   : > { %3777 = vrcp.f32 %v1138_v59 }
 0x4cf   : > { %v1031_v60 = vpop.permute.xlu0 %1030 }
 0x4d0   : > { %v1036_v61 = vsel %vm919_vm1, %v1031_v60, 0 }
 0x4d1   : > { %v3776_v62 = vpop.eup %3775  ;;  %3514 = vmatpush3.bf16.msra.mxu1 %v1036_v61 }
 0x4d2   : > { %3525 = vmatprep.subr.bf16.mxu1 %v4012_v5  ;;  %v1027_v63 = vmul.f32 %v3776_v62, %v3768_v45  ;;  %v1323_v45 = vld [vmem:[#allocation5 + $0x20] sm:$0xff] }
 0x4d3   : > { %v1338_v48 = vpack.c.bf16 %v1324_v46, %v1323_v45  ;;  %v1462_v45 = vld [vmem:[#allocation7 + $0x158] sm:$0xff] }
 0x4d4   : > { %v1028_v1 = vpack.c.bf16 %v1027_v63, %v1027_v63 }
 0x4d5   : > { %3554 = vmatpush3.bf16.msra.mxu0 %v1338_v48  ;;  %v1459_v48 = vld [vmem:[#allocation7 + $0x140] sm:$0xff] }
 0x4d6   : > { %3516 = vmatmul.mubr.msk.bf16.vlgmr.msra.gmra.mxu1 %vm903_vm3, %v1028_v1  ;;  %3555 = vmatprep.subr.bf16.mxu0 %v4012_v5 }
 0x4d7   : > { %3526 = vmatpush3.bf16.msra.mxu1 %v1148_v2  ;;  %3527 = vmatprep.mubr.msk.bf16.mxu1 %vm4014_vm0, %v4012_v5  ;;  %v3279_v2 = vld [vmem:[%s4671_s7] ss:$0 sm:$0xff] }
 0x4d8   : > { %3537 = vmatprep.subr.bf16.mxu1 %v4012_v5 }
 0x4d9   : > { %v3778_v40 = vpop.eup %3777  ;;  %3556 = vmatpush3.bf16.msra.mxu0 %v1337_v51  ;;  %v1504_v51 = vpack.c.bf16 %v1463_v49, %v1459_v48 }
 0x4da   : > { %v1140_v3 = vmul.f32 %v3778_v40, %v3770_v47  ;;  %3557 = vmatprep.subr.bf16.mxu0 %v4012_v5 }
 0x4dc   : > { %v1141_v4 = vpack.c.bf16 %v1140_v3, %v1140_v3 }
 0x4dd   : > { %3558 = vmatpush3.bf16.msra.mxu0 %v1336_v54  ;;  %v1506_v54 = vpack.c.bf16 %v1465_v53, %v1461_v52  ;;  %v1423_v52 = vld [vmem:[#allocation7 + $0x20] sm:$0xff] }
 0x4de   : > { %3528 = vmatmul.mubr.msk.bf16.vlgmr.msra.gmra.mxu1 %vm903_vm3, %v1141_v4 }
 0x4df   : > { %3539 = vmatprep.mubr.msk.bf16.mxu1 %vm4014_vm0, %v4012_v5 }
 0x4f8   : > { %v1250_v6 = vpop.xlane.xlu1 %1249 }
 0x4f9   : > { %3779 = vrcp.f32 %v1250_v6 }
 0x4fc   : > { %v1255_v7 = vpop.permute.xlu1 %1254 }
 0x4fd   : > { %v1260_v8 = vsel %vm919_vm1, %v1255_v7, 0 }
 0x4fe   : > { %3538 = vmatpush3.bf16.msra.mxu1 %v1260_v8 }
 0x506   : > { %v3780_v9 = vpop.eup %3779 }
 0x507   : > { %v1252_v10 = vmul.f32 %v3780_v9, %v3774_v56  ;;  %v1476_v9 = vld [vmem:[#allocation7 + $0x1c8] sm:$0xff] }
 0x509   : > { %v1253_v11 = vpack.c.bf16 %v1252_v10, %v1252_v10  ;;  %v1480_v10 = vld [vmem:[#allocation7 + $0x1e8] sm:$0xff] }
 0x50b   : > { %3540 = vmatmul.mubr.msk.bf16.vlgmr.msra.gmra.mxu1 %vm903_vm3, %v1253_v11  ;;  %v1478_v11 = vld [vmem:[#allocation7 + $0x1d8] sm:$0xff] }
 0x50c   : > { %1570 = vmatprep.mubr.bf16.mxu1 %v4013_v43 }
 0x523   : > { %v4354_v12 = vpop.f32.mrf.mxu1 }
 0x525   : > { %v3505_v13 = vpop.f32.mrf.mxu1 }
 0x526   : > { %v1482_v13 = vld [vmem:[#allocation7 + $0x1f8] sm:$0xff] }
 0x527   : > { %v960_v14 = vpop.f32.mrf.mxu1  ;;  %v1515_v16 = vpack.c.bf16 %v1482_v13, %v1478_v11  ;;  %v1445_v11 = vld [vmem:[#allocation7 + $0xd0] sm:$0xff] }
 0x528   : > { %v1475_v14 = vld [vmem:[#allocation7 + $0x1c0] sm:$0xff]  ;;  %v1449_v13 = vld [vmem:[#allocation7 + $0xf0] sm:$0xff] }
 0x529   : > { %v3506_v15 = vpop.f32.mrf.mxu1  ;;  %1579 = vmatprep.subr.bf16.mxu0 %v1515_v16  ;;  %v1498_v16 = vpack.c.bf16 %v1449_v13, %v1445_v11  ;;  %v1703_v13 = vld [vmem:[#allocation8 + $0x178] sm:$0xff] }
 0x52a   : > { %v1479_v15 = vld [vmem:[#allocation7 + $0x1e0] sm:$0xff] }
 0x52b   : > { %v1512_v17 = vpack.c.bf16 %v1479_v15, %v1475_v14  ;;  %v1436_v14 = vld [vmem:[#allocation7 + $0x88] sm:$0xff] }
 0x52c   : > { %v1440_v15 = vld [vmem:[#allocation7 + $0xa8] sm:$0xff] }
 0x596   : > { %v1072_v23 = vpop.f32.mrf.mxu1 }
 0x597   : > { %1303 = vrot.lane.b32.xlu0 %v1072_v23, %s4017_s20  ;;  %v1472_v23 = vld [vmem:[#allocation7 + $0x1a8] sm:$0xff] }
 0x598   : > { %v3517_v27 = vpop.f32.mrf.mxu1  ;;  %v1509_v26 = vpack.c.bf16 %v1472_v23, %v1468_v20  ;;  %v1435_v20 = vld [vmem:[#allocation7 + $0x80] sm:$0xff] }
 0x599   : > { %v1439_v23 = vld [vmem:[#allocation7 + $0xa0] sm:$0xff] }
 0x59a   : > { %v1075_v32 = vpop.f32.mrf.mxu1 }
 0x59b   : > { %v1471_v32 = vld [vmem:[#allocation7 + $0x1a0] sm:$0xff] }
 0x59c   : > { %v3518_v35 = vpop.f32.mrf.mxu1  ;;  %v1508_v34 = vpack.c.bf16 %v1471_v32, %v1467_v29  ;;  %v1432_v29 = vld [vmem:[#allocation7 + $0x68] sm:$0xff]  ;;  %v1430_v32 = vld [vmem:[#allocation7 + $0x58] sm:$0xff] }
 0x59d   : > { %v1473_v35 = vld [vmem:[#allocation7 + $0x1b0] sm:$0xff] }
 0x59e   : > { %v1184_v37 = vpop.f32.mrf.mxu1  ;;  %v1510_v36 = vpack.c.bf16 %v1473_v35, %v1469_v33  ;;  %v1434_v35 = vld [vmem:[#allocation7 + $0x78] sm:$0xff] }
 0x59f   : > { %1307 = vrot.lane.b32.xlu1 %v1184_v37, %s4015_s24 }
 0x5a0   : > { %v3529_v41 = vpop.f32.mrf.mxu1 }
 0x5a2   : > { %v1187_v44 = vpop.f32.mrf.mxu1 }
 0x5a3   : > { %v1464_v44 = vld [vmem:[#allocation7 + $0x168] sm:$0xff] }
 0x5a4   : > { %v3530_v47 = vpop.f32.mrf.mxu1  ;;  %v1505_v46 = vpack.c.bf16 %v1464_v44, %v1460_v42  ;;  %v1433_v42 = vld [vmem:[#allocation7 + $0x70] sm:$0xff]  ;;  %v1420_v44 = vld [vmem:[#allocation7 + $0x8] sm:$0xff] }
 0x5a5   : > { %v1466_v47 = vld [vmem:[#allocation7 + $0x178] sm:$0xff] }
 0x5a6   : > { %v1507_v50 = vpack.c.bf16 %v1466_v47, %v1462_v45  ;;  %v1424_v45 = vld [vmem:[#allocation7 + $0x28] sm:$0xff]  ;;  %v1426_v47 = vld [vmem:[#allocation7 + $0x38] sm:$0xff] }
 0x5cb   : > { %v1296_v55 = vpop.f32.mrf.mxu1 }
 0x5cc   : > { %1311 = vrot.lane.b32.xlu0 %v1296_v55, %s4016_s19  ;;  %v1452_v55 = vld [vmem:[#allocation7 + $0x108] sm:$0xff] }
 0x5cd   : > { %v3541_v56 = vpop.f32.mrf.mxu1 }
 0x5ce   : > { %v1456_v56 = vld [vmem:[#allocation7 + $0x128] sm:$0xff] }
 0x5cf   : > { %v1299_v57 = vpop.f32.mrf.mxu1 }
 0x5d0   : > { %v1454_v57 = vld [vmem:[#allocation7 + $0x118] sm:$0xff] }
 0x5d1   : > { %v3542_v58 = vpop.f32.mrf.mxu1 }
 0x5d2   : > { %v1501_v58 = vpack.c.bf16 %v1456_v56, %v1452_v55  ;;  %v1425_v55 = vld [vmem:[#allocation7 + $0x30] sm:$0xff] }
 0x609   : > { %v1304_v59 = vpop.permute.xlu0 %1303 }
 0x60a   : > { %v1314_v61 = vsel %vm848_vm2, %v4354_v12, %v1304_v59  ;;  %v1513_v12 = vpack.c.bf16 %v1480_v10, %v1476_v9  ;;  %v1458_v59 = vld [vmem:[#allocation7 + $0x138] sm:$0xff]  ;;  %v1443_v9 = vld [vmem:[#allocation7 + $0xc0] sm:$0xff] }
 0x60b   : > { %v1447_v10 = vld [vmem:[#allocation7 + $0xe0] sm:$0xff] }
 0x60c   : > { %1538 = vmatprep.subr.bf16.mxu1 %v1513_v12  ;;  %v1496_v12 = vpack.c.bf16 %v1447_v10, %v1443_v9  ;;  %v1670_v9 = vld [vmem:[#allocation8 + $0x70] sm:$0xff]  ;;  %v1671_v10 = vld [vmem:[#allocation8 + $0x78] sm:$0xff] }
 0x60d   : > { %1539 = vmatpush1.bf16.msra.mxu1 %v1512_v17  ;;  %v1493_v17 = vpack.c.bf16 %v1440_v15, %v1436_v14  ;;  %v1731_v11 = vpack.c.bf16 %v1671_v10, %v1670_v9  ;;  %v1684_v15 = vld [vmem:[#allocation8 + $0xe0] sm:$0xff] }
 0x60e   : > { %1540 = vmatprep.subr.bf16.mxu1 %v1509_v26  ;;  %v1492_v26 = vpack.c.bf16 %v1439_v23, %v1435_v20  ;;  %v1668_v20 = vld [vmem:[#allocation8 + $0x60] sm:$0xff] }
 0x611   : > { %v1308_v60 = vpop.permute.xlu1 %1307  ;;  %1541 = vmatpush1.bf16.msra.mxu1 %v1508_v34 }
 0x612   : > { %v1316_v62 = vsel %vm1315_vm4, %v1314_v61, %v1308_v60  ;;  %1542 = vmatprep.subr.bf16.mxu1 %v1505_v46  ;;  %v1451_v60 = vld [vmem:[#allocation7 + $0x100] sm:$0xff]  ;;  %v1422_v46 = vld [vmem:[#allocation7 + $0x18] sm:$0xff] }
 0x613   : > { %v1455_v61 = vld [vmem:[#allocation7 + $0x120] sm:$0xff]  ;;  %v1487_v53 = vpack.c.bf16 %v1426_v47, %v1422_v46  ;;  %v1681_v47 = vld [vmem:[#allocation8 + $0xc8] sm:$0xff] }
 0x615   : > { %1543 = vmatpush1.bf16.msra.mxu1 %v1504_v51  ;;  %v1419_v51 = vld [vmem:[#allocation7] sm:$0xff] }
 0x616   : > { %1544 = vmatprep.subr.bf16.mxu1 %v1501_v58  ;;  %v1484_v56 = vpack.c.bf16 %v1423_v52, %v1419_v51  ;;  %v1664_v52 = vld [vmem:[#allocation8 + $0x40] sm:$0xff] }
 0x63e   : > { %v1312_v63 = vpop.permute.xlu0 %1311 }
 0x63f   : > { %v1318_v0 = vsel %vm1317_vm5, %v1316_v62, %v1312_v63  ;;  %v1503_v62 = vpack.c.bf16 %v1458_v59, %v1454_v57  ;;  %v1500_v63 = vpack.c.bf16 %v1455_v61, %v1451_v60 }
 0x640   : > { %v1335_v1 = vpack.c.bf16 %v1318_v0, %v1318_v0  ;;  %v1453_v0 = vld [vmem:[#allocation7 + $0x110] sm:$0xff] }
 0x641   : > { %1545 = vmatpush1.bf16.msra.mxu1 %v1500_v63 }
 0x642   : > { %3560 = vmatmul.mubr.bf16.vlgmr.msra.gmra.mxu0 %v1335_v1  ;;  %v1457_v1 = vld [vmem:[#allocation7 + $0x130] sm:$0xff] }
 0x643   : > { %1611 = vmatprep.mubr.bf16.mxu0 %v4013_v43  ;;  %1580 = vmatpush1.bf16.msra.mxu0 %v1514_v21  ;;  %v1495_v21 = vpack.c.bf16 %v1442_v19, %v1438_v18  ;;  %v1717_v19 = vld [vmem:[#allocation8 + $0x1e8] sm:$0xff] }
 0x702   : > { %v1385_v40 = vpop.f32.mrf.mxu0 }
 0x703   : > { %v1386_v3 = vadd.f32 %v3279_v2, %v1385_v40  ;;  %v1444_v2 = vld [vmem:[#allocation7 + $0xc8] sm:$0xff]  ;;  %v1502_v40 = vpack.c.bf16 %v1457_v1, %v1453_v0  ;;  %v3281_v0 = vld [vmem:[%s4673_s9] ss:$0 sm:$0xff] }
 0x704   : > { %v3561_v4 = vpop.f32.mrf.mxu0 }
 0x705   : > { %v1391_v6 = vadd.f32 %v1386_v3, %v4261_v25  ;;  %v1474_v25 = vld [vmem:[#allocation7 + $0x1b8] sm:$0xff]  ;;  %v1448_v3 = vld [vmem:[#allocation7 + $0xe8] sm:$0xff] }
 0x706   : > { %v1388_v7 = vpop.f32.mrf.mxu0  ;;  %v1511_v27 = vpack.c.bf16 %v1474_v25, %v1470_v24  ;;  %v1446_v4 = vld [vmem:[#allocation7 + $0xd8] sm:$0xff]  ;;  %v1437_v24 = vld [vmem:[#allocation7 + $0x90] sm:$0xff] }
 0x707   : > { %1394 = vadd.xlane.f32.xlu1 %v1391_v6  ;;  %v1497_v7 = vpack.c.bf16 %v1448_v3, %v1444_v2  ;;  %v1441_v25 = vld [vmem:[#allocation7 + $0xb0] sm:$0xff] }
 0x708   : > { %v3562_v8 = vpop.f32.mrf.mxu0  ;;  %1581 = vmatprep.subr.bf16.mxu0 %v1511_v27  ;;  %v1428_v27 = vld [vmem:[#allocation7 + $0x48] sm:$0xff]  ;;  %v1494_v33 = vpack.c.bf16 %v1441_v25, %v1437_v24  ;;  %v1686_v3 = vld [vmem:[#allocation8 + $0xf0] sm:$0xff]  ;;  %v1700_v25 = vld [vmem:[#allocation8 + $0x160] sm:$0xff] }
 0x709   : > { %1582 = vmatpush1.bf16.msra.mxu0 %v1510_v36  ;;  %1546 = vmatprep.subr.bf16.mxu1 %v1497_v7  ;;  %v1489_v34 = vpack.c.bf16 %v1432_v29, %v1428_v27  ;;  %v1427_v36 = vld [vmem:[#allocation7 + $0x40] sm:$0xff]  ;;  %v1682_v29 = vld [vmem:[#allocation8 + $0xd0] sm:$0xff] }
 0x70a   : > { %1583 = vmatprep.subr.bf16.mxu0 %v1507_v50  ;;  %1547 = vmatpush1.bf16.msra.mxu1 %v1496_v12  ;;  %v1485_v50 = vpack.c.bf16 %v1424_v45, %v1420_v44  ;;  %v1702_v12 = vld [vmem:[#allocation8 + $0x170] sm:$0xff]  ;;  %v1699_v44 = vld [vmem:[#allocation8 + $0x158] sm:$0xff]  ;;  %v1680_v45 = vld [vmem:[#allocation8 + $0xc0] sm:$0xff] }
 0x70b   : > { %1548 = vmatprep.subr.bf16.mxu1 %v1493_v17  ;;  %v1747_v14 = vpack.c.bf16 %v1703_v13, %v1702_v12  ;;  %v1716_v17 = vld [vmem:[#allocation8 + $0x1e0] sm:$0xff]  ;;  %v1661_v12 = vld [vmem:[#allocation8 + $0x28] sm:$0xff] }
 0x70c   : > { %v1754_v23 = vpack.c.bf16 %v1717_v19, %v1716_v17  ;;  %v1675_v17 = vld [vmem:[#allocation8 + $0x98] sm:$0xff] }
 0x70d   : > { %1584 = vmatpush1.bf16.msra.mxu0 %v1506_v54  ;;  %v1421_v54 = vld [vmem:[#allocation7 + $0x10] sm:$0xff]  ;;  %v1707_v19 = vld [vmem:[#allocation8 + $0x198] sm:$0xff] }
 0x70e   : > { %1585 = vmatprep.subr.bf16.mxu0 %v1503_v62  ;;  %1549 = vmatpush1.bf16.msra.mxu1 %v1492_v26  ;;  %v1486_v57 = vpack.c.bf16 %v1425_v55, %v1421_v54  ;;  %v3280_v62 = vld [vmem:[%s4672_s8] ss:$0 sm:$0xff]  ;;  %v1701_v26 = vld [vmem:[#allocation8 + $0x168] sm:$0xff] }
 0x70f   : > { %1550 = vmatprep.subr.bf16.mxu1 %v1489_v34  ;;  %v1746_v27 = vpack.c.bf16 %v1701_v26, %v1700_v25  ;;  %v1696_v54 = vld [vmem:[#allocation8 + $0x140] sm:$0xff]  ;;  %v1659_v25 = vld [vmem:[#allocation8 + $0x18] sm:$0xff]  ;;  %v1690_v26 = vld [vmem:[#allocation8 + $0x110] sm:$0xff] }
 0x711   : > { %1586 = vmatpush1.bf16.msra.mxu0 %v1502_v40 }
 0x790   : > { %v1395_v37 = vpop.xlane.xlu1 %1394 }
 0x791   : > { %v1396_v38 = vmul.f32 0.0078125, %v1395_v37  ;;  %v1431_v37 = vld [vmem:[#allocation7 + $0x60] sm:$0xff] }
 0x792   : > { %v1488_v48 = vpack.c.bf16 %v1431_v37, %v1427_v36  ;;  %v1666_v36 = vld [vmem:[#allocation8 + $0x50] sm:$0xff]  ;;  %v1667_v37 = vld [vmem:[#allocation8 + $0x58] sm:$0xff] }
 0x793   : > { %v4375_v39 = vsub.f32 %v1391_v6, %v1396_v38  ;;  %v1450_v6 = vld [vmem:[#allocation7 + $0xf8] sm:$0xff]  ;;  %v1491_v38 = vpack.c.bf16 %v1434_v35, %v1430_v32 }
 0x794   : > { %v1499_v8 = vpack.c.bf16 %v1450_v6, %v1446_v4  ;;  %1551 = vmatpush1.bf16.msra.mxu1 %v1488_v48  ;;  %v1687_v4 = vld [vmem:[#allocation8 + $0xf8] sm:$0xff]  ;;  %v1718_v6 = vld [vmem:[#allocation8 + $0x1f0] sm:$0xff]  ;;  %v1712_v48 = vld [vmem:[#allocation8 + $0x1c0] sm:$0xff] }
 0x795   : > { %v1398_v41 = vmul.f32 %v4375_v39, %v4375_v39  ;;  %1552 = vmatprep.subr.bf16.mxu1 %v1485_v50  ;;  %v1739_v7 = vpack.c.bf16 %v1687_v4, %v1686_v3  ;;  %v1683_v32 = vld [vmem:[#allocation8 + $0xd8] sm:$0xff]  ;;  %v1736_v50 = vpack.c.bf16 %v1681_v47, %v1680_v45  ;;  %v1688_v45 = vld [vmem:[#allocation8 + $0x100] sm:$0xff] }
 0x796   : > { %1587 = vmatprep.subr.bf16.mxu0 %v1499_v8  ;;  %v1719_v8 = vld [vmem:[#allocation8 + $0x1f8] sm:$0xff]  ;;  %v1737_v34 = vpack.c.bf16 %v1683_v32, %v1682_v29  ;;  %v1672_v32 = vld [vmem:[#allocation8 + $0x80] sm:$0xff] }
 0x797   : > { %1399 = vadd.xlane.f32.xlu0 %v1398_v41  ;;  %1588 = vmatpush1.bf16.msra.mxu0 %v1498_v16  ;;  %v1429_v41 = vld [vmem:[#allocation7 + $0x50] sm:$0xff]  ;;  %v1685_v16 = vld [vmem:[#allocation8 + $0xe8] sm:$0xff]  ;;  %v1715_v35 = vld [vmem:[#allocation8 + $0x1d8] sm:$0xff] }
 0x798   : > { %1589 = vmatprep.subr.bf16.mxu0 %v1495_v21  ;;  %v1490_v49 = vpack.c.bf16 %v1433_v42, %v1429_v41  ;;  %1553 = vmatpush1.bf16.msra.mxu1 %v1484_v56  ;;  %v1738_v18 = vpack.c.bf16 %v1685_v16, %v1684_v15  ;;  %v1669_v21 = vld [vmem:[#allocation8 + $0x68] sm:$0xff]  ;;  %v1729_v41 = vpack.c.bf16 %v1667_v37, %v1666_v36  ;;  %v1698_v42 = vld [vmem:[#allocation8 + $0x150] sm:$0xff]  ;;  %v1695_v3 = vld [vmem:[#allocation8 + $0x138] sm:$0xff] }
 0x799   : > { %3344 = vmatprep.subr.bf16.mxu1 %v1739_v7  ;;  %v1730_v24 = vpack.c.bf16 %v1669_v21, %v1668_v20  ;;  %v1745_v46 = vpack.c.bf16 %v1699_v44, %v1698_v42  ;;  %v1697_v56 = vld [vmem:[#allocation8 + $0x148] sm:$0xff]  ;;  %v1674_v16 = vld [vmem:[#allocation8 + $0x90] sm:$0xff]  ;;  %v1691_v29 = vld [vmem:[#allocation8 + $0x118] sm:$0xff] }
 0x79a   : > { %v1677_v7 = vld [vmem:[#allocation8 + $0xa8] sm:$0xff]  ;;  %v1741_v37 = vpack.c.bf16 %v1691_v29, %v1690_v26 }
 0x79b   : > { %1590 = vmatpush1.bf16.msra.mxu0 %v1494_v33  ;;  %v1714_v33 = vld [vmem:[#allocation8 + $0x1d0] sm:$0xff]  ;;  %v1693_v15 = vld [vmem:[#allocation8 + $0x128] sm:$0xff] }
 0x79c   : > { %1591 = vmatprep.subr.bf16.mxu0 %v1491_v38  ;;  %v1753_v38 = vpack.c.bf16 %v1715_v35, %v1714_v33  ;;  %v1673_v33 = vld [vmem:[#allocation8 + $0x88] sm:$0xff] }
 0x79d   : > { %v1705_v35 = vld [vmem:[#allocation8 + $0x188] sm:$0xff] }
 0x79e   : > { %v1657_v42 = vld [vmem:[#allocation8 + $0x8] sm:$0xff] }
 0x79f   : > { %1592 = vmatpush1.bf16.msra.mxu0 %v1490_v49  ;;  %v1713_v49 = vld [vmem:[#allocation8 + $0x1c8] sm:$0xff] }
 0x7a0   : > { %1593 = vmatprep.subr.bf16.mxu0 %v1487_v53  ;;  %v1752_v51 = vpack.c.bf16 %v1713_v49, %v1712_v48  ;;  %v1665_v53 = vld [vmem:[#allocation8 + $0x48] sm:$0xff]  ;;  %v1516_v49 = vld [vmem:[%s4675_s11] sm:$0xf] }
 0x7a1   : > { %v1728_v55 = vpack.c.bf16 %v1665_v53, %v1664_v52  ;;  %v1529_v52 = vrot.slane %v1516_v49, %v4272_v28  ;;  %v1525_v53 = vrot.slane %v1516_v49, %v4278_v30 }
 0x7a3   : > { %1594 = vmatpush1.bf16.msra.mxu0 %v1486_v57  ;;  %v1678_v57 = vld [vmem:[#allocation8 + $0xb0] sm:$0xff] }
 0x820   : > { %v1400_v58 = vpop.xlane.xlu0 %1399 }
 0x821   : > { %v1401_v59 = vmul.f32 0.0078125, %v1400_v58  ;;  %v1679_v58 = vld [vmem:[#allocation8 + $0xb8] sm:$0xff] }
 0x823   : > { %v1402_v60 = vadd.f32 1e-12, %v1401_v59  ;;  %v1744_v59 = vpack.c.bf16 %v1697_v56, %v1696_v54 }
 0x825   : > { %3781 = vrsqrt.f32 %v1402_v60  ;;  %v1735_v60 = vpack.c.bf16 %v1679_v58, %v1678_v57 }
 0x832   : > { %v3782_v61 = vpop.eup %3781 }
 0x833   : > { %v1404_v63 = vmul.f32 %v3782_v61, %v4375_v39  ;;  %v1755_v39 = vpack.c.bf16 %v1719_v8, %v1718_v6  ;;  %v1710_v61 = vld [vmem:[#allocation8 + $0x1b0] sm:$0xff]  ;;  %v1676_v6 = vld [vmem:[#allocation8 + $0xa0] sm:$0xff] }
 0x834   : > { %v1708_v8 = vld [vmem:[#allocation8 + $0x1a0] sm:$0xff]  ;;  %v1734_v10 = vpack.c.bf16 %v1677_v7, %v1676_v6 }
 0x835   : > { %v1411_v1 = vmul.f32 %v3280_v62, %v1404_v63  ;;  %3366 = vmatprep.subr.bf16.mxu0 %v1755_v39  ;;  %v1711_v62 = vld [vmem:[#allocation8 + $0x1b8] sm:$0xff]  ;;  %v1662_v63 = vld [vmem:[#allocation8 + $0x30] sm:$0xff]  ;;  %v1709_v39 = vld [vmem:[#allocation8 + $0x1a8] sm:$0xff] }
 0x836   : > { %v1750_v13 = vpack.c.bf16 %v1709_v39, %v1708_v8 }
 0x837   : > { %v4386_v2 = vadd.f32 %v3281_v0, %v1411_v1  ;;  %v1751_v0 = vpack.c.bf16 %v1711_v62, %v1710_v61  ;;  %v1663_v1 = vld [vmem:[#allocation8 + $0x38] sm:$0xff] }
 0x838   : > { %v1727_v4 = vpack.c.bf16 %v1663_v1, %v1662_v63 }
 0x839   : > { %v1483_v40 = vpack.c.bf16 %v4386_v2, %v4386_v2 }
 0x83b   : > { %1571 = vmatmul.mubr.bf16.vlgmr.msra.gmra.mxu1 %v1483_v40  ;;  %1612 = vmatmul.mubr.bf16.vlgmr.msra.gmra.mxu0 %v1483_v40  ;;  %v1694_v40 = vld [vmem:[#allocation8 + $0x130] sm:$0xff] }
 0x83c   : > { %3345 = vmatpush3.bf16.msra.mxu1 %v1731_v11  ;;  %3367 = vmatpush3.bf16.msra.mxu0 %v1747_v14  ;;  %v1743_v9 = vpack.c.bf16 %v1695_v3, %v1694_v40  ;;  %v1660_v11 = vld [vmem:[#allocation8 + $0x20] sm:$0xff] }
 0x83d   : > { %3346 = vmatprep.subr.bf16.mxu1 %v1738_v18  ;;  %3368 = vmatprep.subr.bf16.mxu0 %v1754_v23  ;;  %v1692_v14 = vld [vmem:[#allocation8 + $0x120] sm:$0xff]  ;;  %v1706_v18 = vld [vmem:[#allocation8 + $0x190] sm:$0xff]  ;;  %v1726_v20 = vpack.c.bf16 %v1661_v12, %v1660_v11  ;;  %v1733_v23 = vpack.c.bf16 %v1675_v17, %v1674_v16 }
 0x83e   : > { %v1742_v21 = vpack.c.bf16 %v1693_v15, %v1692_v14 }
 0x840   : > { %3347 = vmatpush3.bf16.msra.mxu1 %v1730_v24  ;;  %3369 = vmatpush3.bf16.msra.mxu0 %v1746_v27  ;;  %v1658_v24 = vld [vmem:[#allocation8 + $0x10] sm:$0xff]  ;;  %v1749_v27 = vpack.c.bf16 %v1707_v19, %v1706_v18 }
 0x841   : > { %3348 = vmatprep.subr.bf16.mxu1 %v1737_v34  ;;  %3370 = vmatprep.subr.bf16.mxu0 %v1753_v38  ;;  %v1704_v34 = vld [vmem:[#allocation8 + $0x180] sm:$0xff]  ;;  %v1725_v36 = vpack.c.bf16 %v1659_v25, %v1658_v24  ;;  %v1732_v38 = vpack.c.bf16 %v1673_v33, %v1672_v32 }
 0x842   : > { %v1748_v44 = vpack.c.bf16 %v1705_v35, %v1704_v34 }
 0x844   : > { %3349 = vmatpush3.bf16.msra.mxu1 %v1729_v41  ;;  %3371 = vmatpush3.bf16.msra.mxu0 %v1745_v46  ;;  %v1656_v41 = vld [vmem:[#allocation8] sm:$0xff]  ;;  %v1689_v46 = vld [vmem:[#allocation8 + $0x108] sm:$0xff] }
 0x845   : > { %3350 = vmatprep.subr.bf16.mxu1 %v1736_v50  ;;  %3372 = vmatprep.subr.bf16.mxu0 %v1752_v51  ;;  %v1724_v47 = vpack.c.bf16 %v1657_v42, %v1656_v41  ;;  %v1740_v48 = vpack.c.bf16 %v1689_v46, %v1688_v45  ;;  %v1532_v50 = vsub.s32 3, %v4269_v22  ;;  %v1521_v51 = vrot.slane %v1516_v49, %v4281_v31 }
 0x847   : > { %v1533_v54 = vrot.slane %v1516_v49, %v1532_v50 }
 0x848   : > { %3351 = vmatpush3.bf16.msra.mxu1 %v1728_v55  ;;  %3373 = vmatpush3.bf16.msra.mxu0 %v1744_v59 }
 0x849   : > { %3352 = vmatprep.subr.bf16.mxu1 %v1735_v60  ;;  %3374 = vmatprep.subr.bf16.mxu0 %v1751_v0 }
 0x84c   : > { %3353 = vmatpush3.bf16.msra.mxu1 %v1727_v4  ;;  %3375 = vmatpush3.bf16.msra.mxu0 %v1743_v9 }
 0x84d   : > { %3354 = vmatprep.subr.bf16.mxu1 %v1734_v10  ;;  %3376 = vmatprep.subr.bf16.mxu0 %v1750_v13 }
 0x850   : > { %3355 = vmatpush3.bf16.msra.mxu1 %v1726_v20  ;;  %3377 = vmatpush3.bf16.msra.mxu0 %v1742_v21 }
 0x851   : > { %3356 = vmatprep.subr.bf16.mxu1 %v1733_v23  ;;  %3378 = vmatprep.subr.bf16.mxu0 %v1749_v27 }
 0x854   : > { %3357 = vmatpush3.bf16.msra.mxu1 %v1725_v36  ;;  %3379 = vmatpush3.bf16.msra.mxu0 %v1741_v37 }
 0x855   : > { %3358 = vmatprep.subr.bf16.mxu1 %v1732_v38  ;;  %3380 = vmatprep.subr.bf16.mxu0 %v1748_v44 }
 0x858   : > { %3359 = vmatpush3.bf16.msra.mxu1 %v1724_v47  ;;  %3381 = vmatpush3.bf16.msra.mxu0 %v1740_v48 }
 0x859   : > { %3563 = vmatprep.subr.bf16.mxu0 %v4012_v5 }
 0x8fb   : > { %v1572_v55 = vpop.f32.mrf.mxu1  ;;  %v1613_v56 = vpop.f32.mrf.mxu0 }
 0x8fc   : > { %v1573_v57 = vadd.f32 %v1572_v55, %v1521_v51  ;;  %v1614_v58 = vadd.f32 %v1613_v56, %v1529_v52 }
 0x8fd   : > { %v1574_v59 = vpop.f32.mrf.mxu1  ;;  %v1615_v60 = vpop.f32.mrf.mxu0 }
 0x8fe   : > { %v1624_v61 = vmul.f32 0.044715, %v1573_v57  ;;  %v1626_v62 = vmul.f32 0.044715, %v1614_v58  ;;  %v1575_v63 = vadd.f32 %v1574_v59, %v1525_v53  ;;  %v1616_v0 = vadd.f32 %v1615_v60, %v1533_v54  ;;  %v3282_v53 = vld [vmem:[%s4677_s13] ss:$0 sm:$0xff] }
 0x8ff   : > { %v1576_v1 = vpop.f32.mrf.mxu1  ;;  %v1617_v40 = vpop.f32.mrf.mxu0  ;;  %v1620_v29 = vmul.f32 0.5, %v1573_v57  ;;  %v1622_v36 = vmul.f32 0.5, %v1614_v58 }
 0x900   : > { %v1628_v3 = vmul.f32 %v1624_v61, %v1573_v57  ;;  %v1630_v4 = vmul.f32 %v1626_v62, %v1614_v58  ;;  %v1625_v6 = vmul.f32 0.044715, %v1575_v63  ;;  %v1627_v7 = vmul.f32 0.044715, %v1616_v0  ;;  %v1915_v1 = vld [vmem:[#allocation2 + $0x2d8] sm:$0xff]  ;;  %v1918_v40 = vld [vmem:[#allocation2 + $0x2f0] sm:$0xff] }
 0x901   : > { %v1577_v8 = vpop.f32.mrf.mxu1  ;;  %v1618_v9 = vpop.f32.mrf.mxu0  ;;  %v1621_v34 = vmul.f32 0.5, %v1575_v63  ;;  %v1623_v37 = vmul.f32 0.5, %v1616_v0 }
 0x902   : > { %v1632_v10 = vmul.f32 %v1628_v3, %v1573_v57  ;;  %v1634_v39 = vmul.f32 %v1630_v4, %v1614_v58  ;;  %v1629_v11 = vmul.f32 %v1625_v6, %v1575_v63  ;;  %v1631_v12 = vmul.f32 %v1627_v7, %v1616_v0  ;;  %v1914_v3 = vld [vmem:[#allocation2 + $0x2d0] sm:$0xff]  ;;  %v1917_v6 = vld [vmem:[#allocation2 + $0x2e8] sm:$0xff]  ;;  %v1916_v7 = vld [vmem:[#allocation2 + $0x2e0] sm:$0xff] }
 0x903   : > { %v1943_v4 = vpack.c.bf16 %v1918_v40, %v1915_v1  ;;  %v1919_v8 = vld [vmem:[#allocation2 + $0x2f8] sm:$0xff]  ;;  %v1942_v9 = vpack.c.bf16 %v1917_v6, %v1914_v3  ;;  %v1882_v1 = vld [vmem:[#allocation2 + $0x1d0] sm:$0xff] }
 0x904   : > { %v1636_v13 = vadd.f32 %v1632_v10, %v1573_v57  ;;  %v1638_v14 = vadd.f32 %v1634_v39, %v1614_v58  ;;  %v1633_v15 = vmul.f32 %v1629_v11, %v1575_v63  ;;  %v1635_v16 = vmul.f32 %v1631_v12, %v1616_v0  ;;  %v1909_v39 = vld [vmem:[#allocation2 + $0x2a8] sm:$0xff]  ;;  %v1912_v11 = vld [vmem:[#allocation2 + $0x2c0] sm:$0xff]  ;;  %v1878_v6 = vld [vmem:[#allocation2 + $0x1b0] sm:$0xff] }
 0x905   : > { %v1944_v10 = vpack.c.bf16 %v1919_v8, %v1916_v7  ;;  %v1908_v12 = vld [vmem:[#allocation2 + $0x2a0] sm:$0xff]  ;;  %1963 = vmatprep.subr.bf16.mxu1 %v1943_v4  ;;  %v1881_v7 = vld [vmem:[#allocation2 + $0x1c8] sm:$0xff] }
 0x906   : > { %v1640_v17 = vmul.f32 0.7978846, %v1636_v13  ;;  %v1642_v18 = vmul.f32 0.7978846, %v1638_v14  ;;  %v1637_v19 = vadd.f32 %v1633_v15, %v1575_v63  ;;  %v1639_v20 = vadd.f32 %v1635_v16, %v1616_v0  ;;  %v1911_v14 = vld [vmem:[#allocation2 + $0x2b8] sm:$0xff]  ;;  %v1910_v15 = vld [vmem:[#allocation2 + $0x2b0] sm:$0xff] }
 0x907   : > { %v1940_v13 = vpack.c.bf16 %v1912_v11, %v1909_v39  ;;  %v1913_v16 = vld [vmem:[#allocation2 + $0x2c8] sm:$0xff]  ;;  %v1880_v8 = vld [vmem:[#allocation2 + $0x1c0] sm:$0xff]  ;;  %v1924_v11 = vpack.c.bf16 %v1881_v7, %v1878_v6 }
 0x908   : > { %v1641_v21 = vmul.f32 0.7978846, %v1637_v19  ;;  %v1643_v23 = vmul.f32 0.7978846, %v1639_v20  ;;  %3783 = vtanh.f32 %v1640_v17  ;;  %v1941_v17 = vpack.c.bf16 %v1913_v16, %v1910_v15  ;;  %v1876_v39 = vld [vmem:[#allocation2 + $0x1a0] sm:$0xff]  ;;  %v1875_v15 = vld [vmem:[#allocation2 + $0x198] sm:$0xff] }
 0x909   : > { %3785 = vtanh.f32 %v1642_v18  ;;  %v1874_v16 = vld [vmem:[#allocation2 + $0x190] sm:$0xff] }
 0x90a   : > { %3787 = vtanh.f32 %v1641_v21 }
 0x90b   : > { %3789 = vtanh.f32 %v1643_v23  ;;  %v1903_v23 = vld [vmem:[#allocation2 + $0x278] sm:$0xff] }
 0x915   : > { %v3784_v24 = vpop.eup %3783 }
 0x916   : > { %v3786_v25 = vpop.eup %3785  ;;  %v1648_v26 = vadd.f32 1.0, %v3784_v24  ;;  %v1906_v24 = vld [vmem:[#allocation2 + $0x290] sm:$0xff] }
 0x917   : > { %v3788_v27 = vpop.eup %3787  ;;  %v1650_v32 = vadd.f32 1.0, %v3786_v25  ;;  %v1937_v25 = vpack.c.bf16 %v1906_v24, %v1903_v23 }
 0x918   : > { %v3790_v33 = vpop.eup %3789  ;;  %v1649_v35 = vadd.f32 1.0, %v3788_v27  ;;  %v1652_v41 = vmul.f32 %v1648_v26, %v1620_v29  ;;  %v1902_v26 = vld [vmem:[#allocation2 + $0x270] sm:$0xff]  ;;  %v1905_v27 = vld [vmem:[#allocation2 + $0x288] sm:$0xff]  ;;  %v1904_v29 = vld [vmem:[#allocation2 + $0x280] sm:$0xff] }
 0x919   : > { %v1651_v38 = vadd.f32 1.0, %v3790_v33  ;;  %v1654_v44 = vmul.f32 %v1650_v32, %v1622_v36  ;;  %v1936_v32 = vpack.c.bf16 %v1905_v27, %v1902_v26  ;;  %v1907_v33 = vld [vmem:[#allocation2 + $0x298] sm:$0xff]  ;;  %v1900_v36 = vld [vmem:[#allocation2 + $0x260] sm:$0xff] }
 0x91a   : > { %v1653_v42 = vmul.f32 %v1649_v35, %v1621_v34  ;;  %v1720_v48 = vpack.c.bf16 %v1652_v41, %v1652_v41  ;;  %v1938_v34 = vpack.c.bf16 %v1907_v33, %v1904_v29  ;;  %v1897_v35 = vld [vmem:[#allocation2 + $0x248] sm:$0xff]  ;;  %v1899_v41 = vld [vmem:[#allocation2 + $0x258] sm:$0xff]  ;;  %v3284_v27 = vld [vmem:[%s4679_s15] ss:$0 sm:$0xff] }
 0x91b   : > { %v1655_v45 = vmul.f32 %v1651_v38, %v1623_v37  ;;  %v1722_v49 = vpack.c.bf16 %v1654_v44, %v1654_v44  ;;  %v1896_v37 = vld [vmem:[#allocation2 + $0x240] sm:$0xff]  ;;  %v1934_v38 = vpack.c.bf16 %v1900_v36, %v1897_v35  ;;  %v1901_v44 = vld [vmem:[#allocation2 + $0x268] sm:$0xff] }
 0x91c   : > { %v1721_v46 = vpack.c.bf16 %v1653_v42, %v1653_v42  ;;  %v1898_v42 = vld [vmem:[#allocation2 + $0x250] sm:$0xff] }
 0x91d   : > { %v1723_v47 = vpack.c.bf16 %v1655_v45, %v1655_v45  ;;  %v1933_v45 = vpack.c.bf16 %v1899_v41, %v1896_v37 }
 0x91e   : > { %1795 = vmatprep.mubr.bf16.mxu1 %v1721_v46  ;;  %v1935_v46 = vpack.c.bf16 %v1901_v44, %v1898_v42 }
 0x91f   : > { %1835 = vmatprep.mubr.bf16.mxu0 %v1723_v47  ;;  %1796 = vmatmul.mubr.bf16.vlgmr.msra.gmra.mxu1 %v1720_v48  ;;  %v1891_v47 = vld [vmem:[#allocation2 + $0x218] sm:$0xff]  ;;  %v1894_v48 = vld [vmem:[#allocation2 + $0x230] sm:$0xff] }
 0x920   : > { %1836 = vmatmul.mubr.bf16.vlgmr.msra.gmra.mxu0 %v1722_v49  ;;  %1995 = vmatprep.mubr.bf16.mxu1 %v4013_v43  ;;  %v1890_v49 = vld [vmem:[#allocation2 + $0x210] sm:$0xff] }
 0x921   : > { %3579 = vmatprep.mubr.msk.bf16.mxu0 %vm4014_vm0, %v4012_v5  ;;  %1964 = vmatpush1.bf16.msra.mxu1 %v1942_v9  ;;  %v1883_v9 = vld [vmem:[#allocation2 + $0x1d8] sm:$0xff] }
 0x922   : > { %3564 = vmatpush3.bf16.msra.mxu0 %v1944_v10  ;;  %1965 = vmatprep.subr.bf16.mxu1 %v1940_v13  ;;  %v1873_v10 = vld [vmem:[#allocation2 + $0x188] sm:$0xff] }
 0x923   : > { %3565 = vmatprep.subr.bf16.mxu0 %v4012_v5  ;;  %v1922_v13 = vpack.c.bf16 %v1876_v39, %v1873_v10 }
 0x926   : > { %3566 = vmatpush3.bf16.msra.mxu0 %v1941_v17 }
 0x927   : > { %3567 = vmatprep.subr.bf16.mxu0 %v4012_v5 }
 0x92a   : > { %3568 = vmatpush3.bf16.msra.mxu0 %v1938_v34 }
 0x92b   : > { %3569 = vmatprep.subr.bf16.mxu0 %v4012_v5 }
 0x92e   : > { %3570 = vmatpush3.bf16.msra.mxu0 %v1935_v46 }
 0x92f   : > { %3571 = vmatprep.subr.bf16.mxu0 %v4012_v5 }
 0x9df   : > { %v3360_v51 = vpop.f32.mrf.mxu1 }
 0x9e0   : > { %v3382_v52 = vpop.f32.mrf.mxu0 }
 0x9e1   : > { %v3361_v54 = vpop.f32.mrf.mxu1 }
 0x9e2   : > { %v3362_v55 = vadd.f32 %v3361_v54, %v3360_v51  ;;  %v3383_v56 = vpop.f32.mrf.mxu0  ;;  %v1931_v51 = vpack.c.bf16 %v1894_v48, %v1891_v47  ;;  %v1895_v54 = vld [vmem:[#allocation2 + $0x238] sm:$0xff] }
 0x9e3   : > { %v3363_v57 = vpop.f32.mrf.mxu1  ;;  %v3384_v59 = vadd.f32 %v3383_v56, %v3382_v52  ;;  %v1893_v52 = vld [vmem:[#allocation2 + $0x228] sm:$0xff] }
 0x9e4   : > { %v1798_v58 = vadd.f32 %v3362_v55, %v3282_v53  ;;  %v3385_v60 = vpop.f32.mrf.mxu0  ;;  %v1892_v53 = vld [vmem:[#allocation2 + $0x220] sm:$0xff]  ;;  %v1930_v55 = vpack.c.bf16 %v1893_v52, %v1890_v49  ;;  %v1885_v56 = vld [vmem:[#allocation2 + $0x1e8] sm:$0xff] }
 0x9e5   : > { %v3364_v61 = vpop.f32.mrf.mxu1  ;;  %v1888_v57 = vld [vmem:[#allocation2 + $0x200] sm:$0xff] }
 0x9e6   : > { %v1838_v62 = vadd.f32 %v3384_v59, %v1798_v58  ;;  %v3386_v63 = vpop.f32.mrf.mxu0  ;;  %v1932_v58 = vpack.c.bf16 %v1895_v54, %v1892_v53  ;;  %v1928_v59 = vpack.c.bf16 %v1888_v57, %v1885_v56  ;;  %v1884_v60 = vld [vmem:[#allocation2 + $0x1e0] sm:$0xff]  ;;  %v1887_v61 = vld [vmem:[#allocation2 + $0x1f8] sm:$0xff] }
 0x9e7   : > { %v1889_v63 = vld [vmem:[#allocation2 + $0x208] sm:$0xff]  ;;  %v1927_v40 = vpack.c.bf16 %v1887_v61, %v1884_v60  ;;  %v4452_v60 = vld [vmem:[%s4321_s30] ss:$0 sm:$0xff] }
 0x9e8   : > { %v1843_v0 = vadd.f32 %v1838_v62, %v4386_v2  ;;  %v1939_v2 = vpack.c.bf16 %v1911_v14, %v1908_v12  ;;  %v1886_v62 = vld [vmem:[#allocation2 + $0x1f0] sm:$0xff]  ;;  %3572 = vmatpush3.bf16.msra.mxu0 %v1932_v58  ;;  %v1926_v12 = vpack.c.bf16 %v1883_v9, %v1880_v8  ;;  %v1872_v14 = vld [vmem:[#allocation2 + $0x180] sm:$0xff] }
 0x9e9   : > { %v1929_v3 = vpack.c.bf16 %v1889_v63, %v1886_v62  ;;  %3573 = vmatprep.subr.bf16.mxu0 %v4012_v5  ;;  %v1921_v17 = vpack.c.bf16 %v1875_v15, %v1872_v14 }
 0x9ea   : > { %1846 = vadd.xlane.f32.xlu0 %v1843_v0  ;;  %1966 = vmatpush1.bf16.msra.mxu1 %v1939_v2  ;;  %v1877_v2 = vld [vmem:[#allocation2 + $0x1a8] sm:$0xff] }
 0x9eb   : > { %1967 = vmatprep.subr.bf16.mxu1 %v1937_v25  ;;  %v3283_v25 = vld [vmem:[%s4678_s14] ss:$0 sm:$0xff] }
 0x9ec   : > { %3574 = vmatpush3.bf16.msra.mxu0 %v1929_v3 }
 0x9ed   : > { %3575 = vmatprep.subr.bf16.mxu0 %v4012_v5 }
 0x9ee   : > { %1968 = vmatpush1.bf16.msra.mxu1 %v1936_v32 }
 0x9ef   : > { %1969 = vmatprep.subr.bf16.mxu1 %v1934_v38 }
 0x9f0   : > { %3576 = vmatpush3.bf16.msra.mxu0 %v1926_v12 }
 0x9f1   : > { %3577 = vmatprep.subr.bf16.mxu0 %v4012_v5 }
 0x9f2   : > { %1970 = vmatpush1.bf16.msra.mxu1 %v1933_v45 }
 0x9f3   : > { %1971 = vmatprep.subr.bf16.mxu1 %v1931_v51 }
 0x9f6   : > { %1972 = vmatpush1.bf16.msra.mxu1 %v1930_v55 }
 0x9f7   : > { %1973 = vmatprep.subr.bf16.mxu1 %v1928_v59 }
 0x9fa   : > { %1974 = vmatpush1.bf16.msra.mxu1 %v1927_v40 }
 0xa73   : > { %v1847_v18 = vpop.xlane.xlu0 %1846 }
 0xa74   : > { %v1848_v19 = vmul.f32 0.0078125, %v1847_v18  ;;  %v1923_v18 = vpack.c.bf16 %v1877_v2, %v1874_v16 }
 0xa76   : > { %v4409_v20 = vsub.f32 %v1843_v0, %v1848_v19  ;;  %v1879_v0 = vld [vmem:[#allocation2 + $0x1b8] sm:$0xff]  ;;  %3578 = vmatpush3.bf16.msra.mxu0 %v1923_v18 }
 0xa77   : > { %v1925_v4 = vpack.c.bf16 %v1882_v1, %v1879_v0  ;;  %3607 = vmatprep.subr.bf16.mxu0 %v4012_v5 }
 0xa78   : > { %v1850_v21 = vmul.f32 %v4409_v20, %v4409_v20 }
 0xa79   : > { %1975 = vmatprep.subr.bf16.mxu1 %v1925_v4 }
 0xa7a   : > { %1851 = vadd.xlane.f32.xlu1 %v1850_v21  ;;  %1976 = vmatpush1.bf16.msra.mxu1 %v1924_v11 }
 0xa7b   : > { %1977 = vmatprep.subr.bf16.mxu1 %v1922_v13 }
 0xa7e   : > { %1978 = vmatpush1.bf16.msra.mxu1 %v1921_v17 }
 0xa7f   : > { %3583 = vmatprep.subr.bf16.mxu1 %v4012_v5 }
 0xb03   : > { %v1852_v19 = vpop.xlane.xlu1 %1851 }
 0xb04   : > { %v1853_v21 = vmul.f32 0.0078125, %v1852_v19 }
 0xb06   : > { %v1854_v23 = vadd.f32 1e-12, %v1853_v21 }
 0xb08   : > { %3791 = vrsqrt.f32 %v1854_v23 }
 0xb15   : > { %v3792_v24 = vpop.eup %3791 }
 0xb16   : > { %v1856_v26 = vmul.f32 %v3792_v24, %v4409_v20  ;;  %v3285_v20 = vld [vmem:[%s4669_s5 + $0x3] sm:$0x7] }
 0xb17   : > { %v1955_v34 = vrot.slane %v3285_v20, %v4278_v30  ;;  %v1959_v41 = vrot.slane %v3285_v20, %v4272_v28  ;;  %v1951_v46 = vrot.slane %v3285_v20, %v4281_v31 }
 0xb18   : > { %v1863_v29 = vmul.f32 %v3283_v25, %v1856_v26 }
 0xb1a   : > { %v4427_v32 = vadd.f32 %v3284_v27, %v1863_v29 }
 0xb1c   : > { %v1920_v33 = vpack.c.bf16 %v4427_v32, %v4427_v32 }
 0xb1e   : > { %1996 = vmatmul.mubr.bf16.vlgmr.msra.gmra.mxu1 %v1920_v33  ;;  %3580 = vmatmul.mubr.bf16.vlgmr.msra.gmra.mxu0 %v1920_v33 }
 0xb1f   : > { %3585 = vmatprep.mubr.msk.bf16.mxu1 %vm4014_vm0, %v4012_v5  ;;  %3609 = vmatprep.mubr.msk.bf16.mxu0 %vm4014_vm0, %v4012_v5 }
 0xbde   : > { %v1997_v35 = vpop.f32.mrf.mxu1  ;;  %v2038_v36 = vpop.f32.mrf.mxu0 }
 0xbdf   : > { %v2039_v51 = vadd.f32 %v2038_v36, %v1959_v41  ;;  %v1998_v53 = vadd.f32 %v1997_v35, %v1951_v46 }
 0xbe0   : > { %v1999_v37 = vpop.f32.mrf.mxu1  ;;  %v3581_v38 = vpop.f32.mrf.mxu0 }
 0xbe1   : > { %v2000_v42 = vadd.f32 %v1999_v37, %v1955_v34  ;;  %v4443_v54 = vpack.c.bf16 %v2039_v51, %v2039_v51  ;;  %v2044_v55 = vpack.c.bf16 %v1998_v53, %v1998_v53 }
 0xbe2   : > { %v2001_v44 = vpop.f32.mrf.mxu1  ;;  %v2041_v45 = vpop.f32.mrf.mxu0 }
 0xbe3   : > { %v2045_v47 = vpack.c.bf16 %v2000_v42, %v2000_v42  ;;  %v2111_v56 = vsel %vm919_vm1, %v4443_v54, 0 }
 0xbe4   : > { %v2002_v48 = vpop.f32.mrf.mxu1  ;;  %v3582_v49 = vpop.f32.mrf.mxu0 }
 0xbe5   : > { %v2051_v52 = vsel %vm848_vm2, %v2045_v47, 0 }
 0xbe6   : > { %3584 = vmatpush3.bf16.xpose.msra.mxu1 %v2051_v52 }
 0xbe7   : > { %3589 = vmatprep.subr.bf16.mxu1 %v4012_v5 }
 0xbed   : > { %3586 = vmatmul.mubr.msk.bf16.vlgmr.msra.gmra.mxu1 %vm848_vm2, %v2044_v55 }
 0xbee   : > { %3590 = vmatpush3.bf16.msra.mxu1 %v2111_v56  ;;  %3591 = vmatprep.mubr.msk.bf16.mxu1 %vm4014_vm0, %v4012_v5 }
 0xbef   : > { %3595 = vmatprep.subr.bf16.mxu1 %v4012_v5 }
 0xcad   : > { %v2087_v57 = vpop.f32.mrf.mxu1 }
 0xcae   : > { %v2093_v58 = vmul.f32 0.17677669, %v2087_v57 }
 0xcaf   : > { %v3587_v59 = vpop.f32.mrf.mxu1 }
 0xcb0   : > { %v2094_v61 = vadd.f32 %v4452_v60, %v2093_v58 }
 0xcb1   : > { %v2090_v62 = vpop.f32.mrf.mxu1 }
 0xcb2   : > { %v2095_v63 = vsel %vm903_vm3, %v2094_v61, -inf }
 0xcb3   : > { %2096 = vmax.xlane.f32.xlu0 %v2095_v63  ;;  %v3588_v0 = vpop.f32.mrf.mxu1 }
 0xcc9   : > { %2157 = vrot.lane.b32.xlu0 %v2045_v47, %s4016_s19 }
 0xccd   : > { %2268 = vrot.lane.b32.xlu0 %v2044_v55, %s4015_s24 }
 0xcd1   : > { %2380 = vrot.lane.b32.xlu0 %v2044_v55, %s4017_s20 }
 0xd3c   : > { %v2097_v1 = vpop.xlane.xlu0 %2096 }
 0xd3d   : > { %v2098_v40 = vsub.f32 %v2094_v61, %v2097_v1 }
 0xd3f   : > { %v2099_v3 = vmul.f32 1.442695, %v2098_v40 }
 0xd40   : > { %v2158_v39 = vpop.permute.xlu0 %2157 }
 0xd41   : > { %3793 = vpow2.f32 %v2099_v3  ;;  %v2163_v2 = vsel %vm848_vm2, %v2158_v39, 0 }
 0xd44   : > { %v2269_v14 = vpop.permute.xlu0 %2268 }
 0xd48   : > { %v2381_v17 = vpop.permute.xlu0 %2380 }
 0xd4e   : > { %v3794_v4 = vpop.eup %3793 }
 0xd4f   : > { %v2101_v6 = vsel %vm903_vm3, %v3794_v4, 0.0 }
 0xd50   : > { %2102 = vadd.xlane.f32.xlu1 %v2101_v6 }
 0xd61   : > { %2154 = vrot.lane.b32.xlu1 %v2044_v55, %s4016_s19 }
 0xd65   : > { %2270 = vrot.lane.b32.xlu1 %v2045_v47, %s4015_s24 }
 0xd69   : > { %2382 = vrot.lane.b32.xlu1 %v2045_v47, %s4017_s20 }
 0xdd9   : > { %v2103_v7 = vpop.xlane.xlu1 %2102 }
 0xdda   : > { %3795 = vrcp.f32 %v2103_v7 }
 0xddd   : > { %v2155_v8 = vpop.permute.xlu1 %2154 }
 0xde1   : > { %v2271_v9 = vpop.permute.xlu1 %2270 }
 0xde2   : > { %v2276_v10 = vsel %vm848_vm2, %v2271_v9, 0 }
 0xde3   : > { %3608 = vmatpush3.bf16.xpose.msra.mxu0 %v2276_v10 }
 0xde4   : > { %3619 = vmatprep.subr.bf16.mxu0 %v4012_v5 }
 0xde5   : > { %v2383_v12 = vpop.permute.xlu1 %2382 }
 0xde6   : > { %v2388_v15 = vsel %vm848_vm2, %v2383_v12, 0 }
 0xde7   : > { %v3796_v11 = vpop.eup %3795 }
 0xde8   : > { %v2105_v13 = vmul.f32 %v3796_v11, %v3794_v4 }
 0xdea   : > { %3610 = vmatmul.mubr.msk.bf16.vlgmr.msra.gmra.mxu0 %vm848_vm2, %v2269_v14  ;;  %v2106_v16 = vpack.c.bf16 %v2105_v13, %v2105_v13 }
 0xdeb   : > { %3620 = vmatpush3.bf16.xpose.msra.mxu0 %v2388_v15  ;;  %3621 = vmatprep.mubr.msk.bf16.mxu0 %vm4014_vm0, %v4012_v5 }
 0xdec   : > { %3592 = vmatmul.mubr.msk.bf16.vlgmr.msra.gmra.mxu1 %vm903_vm3, %v2106_v16  ;;  %3631 = vmatprep.subr.bf16.mxu0 %v4012_v5 }
 0xded   : > { %3596 = vmatpush3.bf16.xpose.msra.mxu1 %v2163_v2  ;;  %3597 = vmatprep.mubr.msk.bf16.mxu1 %vm4014_vm0, %v4012_v5 }
 0xdee   : > { %3601 = vmatprep.subr.bf16.mxu1 %v4012_v5 }
 0xdf2   : > { %3622 = vmatmul.mubr.msk.bf16.vlgmr.msra.gmra.mxu0 %vm848_vm2, %v2381_v17 }
 0xdf3   : > { %3647 = vmatprep.mubr.msk.bf16.mxu0 %vm4014_vm0, %v4012_v5 }
 0xdf4   : > { %3598 = vmatmul.mubr.msk.bf16.vlgmr.msra.gmra.mxu1 %vm848_vm2, %v2155_v8 }
 0xdf5   : > { %3603 = vmatprep.mubr.msk.bf16.mxu1 %vm4014_vm0, %v4012_v5 }
 0xeaa   : > { %v2312_v18 = vpop.f32.mrf.mxu0 }
 0xeab   : > { %v2318_v19 = vmul.f32 0.17677669, %v2312_v18 }
 0xeac   : > { %v4481_v21 = vpop.f32.mrf.mxu1  ;;  %v3611_v23 = vpop.f32.mrf.mxu0 }
 0xead   : > { %v2319_v24 = vadd.f32 %v4452_v60, %v2318_v19  ;;  %v2522_v23 = vld [vmem:[#allocation5 + $0xf0] sm:$0xff] }
 0xeae   : > { %v3593_v25 = vpop.f32.mrf.mxu1  ;;  %v2315_v26 = vpop.f32.mrf.mxu0 }
 0xeaf   : > { %v2320_v27 = vsel %vm903_vm3, %v2319_v24, -inf  ;;  %v2520_v25 = vld [vmem:[#allocation5 + $0xe0] sm:$0xff] }
 0xeb0   : > { %2321 = vmax.xlane.f32.xlu0 %v2320_v27  ;;  %v2150_v29 = vpop.f32.mrf.mxu1  ;;  %v3612_v33 = vpop.f32.mrf.mxu0  ;;  %v2521_v27 = vld [vmem:[#allocation5 + $0xe8] sm:$0xff] }
 0xeb1   : > { %v2531_v29 = vpack.c.bf16 %v2521_v27, %v2520_v25  ;;  %v2518_v33 = vld [vmem:[#allocation5 + $0xd0] sm:$0xff]  ;;  %v2661_v27 = vld [vmem:[#allocation7 + $0x388] sm:$0xff] }
 0xeb2   : > { %v3594_v20 = vpop.f32.mrf.mxu1  ;;  %v2424_v34 = vpop.f32.mrf.mxu0  ;;  %v2670_v25 = vld [vmem:[#allocation7 + $0x3d0] sm:$0xff] }
 0xeb3   : > { %v2430_v35 = vmul.f32 0.17677669, %v2424_v34  ;;  %v2519_v20 = vld [vmem:[#allocation5 + $0xd8] sm:$0xff] }
 0xeb4   : > { %v2199_v36 = vpop.f32.mrf.mxu1  ;;  %v3623_v37 = vpop.f32.mrf.mxu0  ;;  %v2530_v34 = vpack.c.bf16 %v2519_v20, %v2518_v33  ;;  %v2665_v33 = vld [vmem:[#allocation7 + $0x3a8] sm:$0xff]  ;;  %v2663_v20 = vld [vmem:[#allocation7 + $0x398] sm:$0xff] }
 0xeb5   : > { %v2205_v38 = vmul.f32 0.17677669, %v2199_v36  ;;  %v2431_v41 = vadd.f32 %v4452_v60, %v2430_v35  ;;  %v2516_v35 = vld [vmem:[#allocation5 + $0xc0] sm:$0xff]  ;;  %v2517_v36 = vld [vmem:[#allocation5 + $0xc8] sm:$0xff] }
 0xeb6   : > { %v3599_v42 = vpop.f32.mrf.mxu1  ;;  %v2427_v44 = vpop.f32.mrf.mxu0  ;;  %v2529_v37 = vpack.c.bf16 %v2517_v36, %v2516_v35  ;;  %v2660_v36 = vld [vmem:[#allocation7 + $0x380] sm:$0xff] }
 0xeb7   : > { %v2432_v45 = vsel %vm903_vm3, %v2431_v41, -inf  ;;  %v2206_v46 = vadd.f32 %v4452_v60, %v2205_v38  ;;  %v2514_v38 = vld [vmem:[#allocation5 + $0xb0] sm:$0xff]  ;;  %v2512_v44 = vld [vmem:[#allocation5 + $0xa0] sm:$0xff] }
 0xeb8   : > { %2433 = vmax.xlane.f32.xlu0 %v2432_v45  ;;  %v2202_v47 = vpop.f32.mrf.mxu1  ;;  %v3624_v48 = vpop.f32.mrf.mxu0  ;;  %v2513_v45 = vld [vmem:[#allocation5 + $0xa8] sm:$0xff] }
 0xeb9   : > { %v2207_v49 = vsel %vm903_vm3, %v2206_v46, -inf  ;;  %v2510_v47 = vld [vmem:[#allocation5 + $0x90] sm:$0xff]  ;;  %v2511_v48 = vld [vmem:[#allocation5 + $0x98] sm:$0xff] }
 0xeba   : > { %2208 = vmax.xlane.f32.xlu1 %v2207_v49  ;;  %v3600_v51 = vpop.f32.mrf.mxu1  ;;  %v2526_v49 = vpack.c.bf16 %v2511_v48, %v2510_v47 }
 0xf39   : > { %v2322_v52 = vpop.xlane.xlu0 %2321 }
 0xf3a   : > { %v2323_v53 = vsub.f32 %v2319_v24, %v2322_v52  ;;  %v2523_v24 = vld [vmem:[#allocation5 + $0xf8] sm:$0xff] }
 0xf3b   : > { %v2532_v26 = vpack.c.bf16 %v2523_v24, %v2522_v23  ;;  %v2672_v23 = vld [vmem:[#allocation7 + $0x3e0] sm:$0xff] }
 0xf3c   : > { %v2324_v55 = vmul.f32 1.442695, %v2323_v53  ;;  %v2508_v53 = vld [vmem:[#allocation5 + $0x80] sm:$0xff] }
 0xf3d   : > { %3632 = vmatpush3.bf16.msra.mxu0 %v2532_v26  ;;  %v2674_v26 = vld [vmem:[#allocation7 + $0x3f0] sm:$0xff] }
 0xf3e   : > { %3797 = vpow2.f32 %v2324_v55  ;;  %3633 = vmatprep.subr.bf16.mxu0 %v4012_v5  ;;  %v2509_v55 = vld [vmem:[#allocation5 + $0x88] sm:$0xff] }
 0xf41   : > { %v2434_v56 = vpop.xlane.xlu0 %2433  ;;  %3634 = vmatpush3.bf16.msra.mxu0 %v2531_v29  ;;  %v2707_v29 = vpack.c.bf16 %v2674_v26, %v2670_v25  ;;  %v2631_v25 = vld [vmem:[#allocation7 + $0x298] sm:$0xff] }
 0xf42   : > { %v2435_v57 = vsub.f32 %v2431_v41, %v2434_v56  ;;  %3635 = vmatprep.subr.bf16.mxu0 %v4012_v5  ;;  %v2515_v41 = vld [vmem:[#allocation5 + $0xb8] sm:$0xff]  ;;  %v2525_v56 = vpack.c.bf16 %v2509_v55, %v2508_v53 }
 0xf43   : > { %v2209_v58 = vpop.xlane.xlu1 %2208  ;;  %v2528_v42 = vpack.c.bf16 %v2515_v41, %v2514_v38  ;;  %v2662_v38 = vld [vmem:[#allocation7 + $0x390] sm:$0xff]  ;;  %v2659_v55 = vld [vmem:[#allocation7 + $0x378] sm:$0xff] }
 0xf44   : > { %v2436_v59 = vmul.f32 1.442695, %v2435_v57  ;;  %v2210_v61 = vsub.f32 %v2206_v46, %v2209_v58  ;;  %v2527_v46 = vpack.c.bf16 %v2513_v45, %v2512_v44  ;;  %v2635_v26 = vld [vmem:[#allocation7 + $0x2b8] sm:$0xff] }
 0xf45   : > { %3636 = vmatpush3.bf16.msra.mxu0 %v2530_v34  ;;  %v2702_v34 = vpack.c.bf16 %v2665_v33, %v2661_v27  ;;  %v2628_v27 = vld [vmem:[#allocation7 + $0x280] sm:$0xff] }
 0xf46   : > { %3799 = vpow2.f32 %v2436_v59  ;;  %v2211_v62 = vmul.f32 1.442695, %v2210_v61  ;;  %3637 = vmatprep.subr.bf16.mxu0 %v4012_v5  ;;  %v2632_v33 = vld [vmem:[#allocation7 + $0x2a0] sm:$0xff] }
 0xf48   : > { %3801 = vpow2.f32 %v2211_v62 }
 0xf49   : > { %3638 = vmatpush3.bf16.msra.mxu0 %v2529_v37  ;;  %v2664_v37 = vld [vmem:[#allocation7 + $0x3a0] sm:$0xff] }
 0xf4a   : > { %3639 = vmatprep.subr.bf16.mxu0 %v4012_v5  ;;  %v2701_v41 = vpack.c.bf16 %v2664_v37, %v2660_v36  ;;  %v2625_v36 = vld [vmem:[#allocation7 + $0x268] sm:$0xff]  ;;  %v2623_v37 = vld [vmem:[#allocation7 + $0x258] sm:$0xff] }
 0xf4b   : > { %v3798_v60 = vpop.eup %3797 }
 0xf4c   : > { %v2326_v63 = vsel %vm903_vm3, %v3798_v60, 0.0 }
 0xf4d   : > { %2327 = vadd.xlane.f32.xlu0 %v2326_v63  ;;  %3640 = vmatpush3.bf16.msra.mxu0 %v2528_v42  ;;  %v2666_v42 = vld [vmem:[#allocation7 + $0x3b0] sm:$0xff] }
 0xf4e   : > { %3641 = vmatprep.subr.bf16.mxu0 %v4012_v5  ;;  %v2703_v44 = vpack.c.bf16 %v2666_v42, %v2662_v38  ;;  %v2627_v42 = vld [vmem:[#allocation7 + $0x278] sm:$0xff] }
 0xf51   : > { %3642 = vmatpush3.bf16.msra.mxu0 %v2527_v46 }
 0xf52   : > { %3643 = vmatprep.subr.bf16.mxu0 %v4012_v5 }
 0xf53   : > { %v3800_v0 = vpop.eup %3799 }
 0xf54   : > { %v2438_v1 = vsel %vm903_vm3, %v3800_v0, 0.0 }
 0xf55   : > { %v3802_v40 = vpop.eup %3801  ;;  %2439 = vadd.xlane.f32.xlu1 %v2438_v1  ;;  %3644 = vmatpush3.bf16.msra.mxu0 %v2526_v49  ;;  %v2653_v49 = vld [vmem:[#allocation7 + $0x348] sm:$0xff] }
 0xf56   : > { %v2213_v3 = vsel %vm903_vm3, %v3802_v40, 0.0  ;;  %3645 = vmatprep.subr.bf16.mxu0 %v4012_v5 }
 0xf59   : > { %2214 = vadd.xlane.f32.xlu1 %v2213_v3  ;;  %3646 = vmatpush3.bf16.msra.mxu0 %v2525_v56  ;;  %v2652_v56 = vld [vmem:[#allocation7 + $0x340] sm:$0xff] }
 0xf63   : > { %2220 = vrot.lane.b32.xlu0 %v4443_v54, %s4016_s19 }
 0xf6a   : > { %2332 = vrot.lane.b32.xlu1 %v4443_v54, %s4015_s24 }
 0xf6e   : > { %2444 = vrot.lane.b32.xlu1 %v4443_v54, %s4017_s20 }
 0xfd6   : > { %v2328_v4 = vpop.xlane.xlu0 %2327 }
 0xfda   : > { %v2221_v6 = vpop.permute.xlu0 %2220 }
 0xfdb   : > { %v2226_v7 = vsel %vm919_vm1, %v2221_v6, 0 }
 0xfdc   : > { %3602 = vmatpush3.bf16.msra.mxu1 %v2226_v7 }
 0xfdd   : > { %3613 = vmatprep.subr.bf16.mxu1 %v4012_v5 }
 0xfde   : > { %v2440_v8 = vpop.xlane.xlu1 %2439 }
 0xfe2   : > { %v2215_v9 = vpop.xlane.xlu1 %2214 }
 0xfe3   : > { %3803 = vrcp.f32 %v2215_v9 }
 0xfe4   : > { %3805 = vrcp.f32 %v2328_v4 }
 0xfe5   : > { %3807 = vrcp.f32 %v2440_v8 }
 0xfe6   : > { %v2333_v11 = vpop.permute.xlu1 %2332 }
 0xfe7   : > { %v2338_v14 = vsel %vm919_vm1, %v2333_v11, 0 }
 0xfea   : > { %v2445_v15 = vpop.permute.xlu1 %2444 }
 0xfeb   : > { %v2450_v17 = vsel %vm919_vm1, %v2445_v15, 0  ;;  %v2669_v15 = vld [vmem:[#allocation7 + $0x3c8] sm:$0xff] }
 0xff0   : > { %v3804_v10 = vpop.eup %3803 }
 0xff1   : > { %v2217_v39 = vmul.f32 %v3804_v10, %v3802_v40  ;;  %v3806_v13 = vpop.eup %3805 }
 0xff2   : > { %v2330_v54 = vmul.f32 %v3806_v13, %v3798_v60  ;;  %v3808_v2 = vpop.eup %3807 }
 0xff3   : > { %v2218_v12 = vpack.c.bf16 %v2217_v39, %v2217_v39  ;;  %v2442_v18 = vmul.f32 %v3808_v2, %v3800_v0  ;;  %v3295_v39 = vld [vmem:[%s4671_s7 + $0x1] ss:$0 sm:$0xff]  ;;  %v2671_v2 = vld [vmem:[#allocation7 + $0x3d8] sm:$0xff] }
 0xff4   : > { %v2331_v16 = vpack.c.bf16 %v2330_v54, %v2330_v54 }
 0xff5   : > { %3604 = vmatmul.mubr.msk.bf16.vlgmr.msra.gmra.mxu1 %vm903_vm3, %v2218_v12  ;;  %v2443_v19 = vpack.c.bf16 %v2442_v18, %v2442_v18  ;;  %v2675_v18 = vld [vmem:[#allocation7 + $0x3f8] sm:$0xff] }
 0xff6   : > { %3614 = vmatpush3.bf16.msra.mxu1 %v2338_v14  ;;  %3615 = vmatprep.mubr.msk.bf16.mxu1 %vm4014_vm0, %v4012_v5 }
 0xff7   : > { %3625 = vmatprep.subr.bf16.mxu1 %v4012_v5 }
 0xffd   : > { %3616 = vmatmul.mubr.msk.bf16.vlgmr.msra.gmra.mxu1 %vm903_vm3, %v2331_v16  ;;  %v2673_v16 = vld [vmem:[#allocation7 + $0x3e8] sm:$0xff] }
 0xffe   : > { %3626 = vmatpush3.bf16.msra.mxu1 %v2450_v17  ;;  %3627 = vmatprep.mubr.msk.bf16.mxu1 %vm4014_vm0, %v4012_v5  ;;  %v2706_v17 = vpack.c.bf16 %v2673_v16, %v2669_v15  ;;  %v2636_v15 = vld [vmem:[#allocation7 + $0x2c0] sm:$0xff] }
 0xfff   : > { %v2640_v16 = vld [vmem:[#allocation7 + $0x2e0] sm:$0xff] }
0x1000   : > { %2732 = vmatprep.subr.bf16.mxu1 %v2706_v17  ;;  %v2689_v17 = vpack.c.bf16 %v2640_v16, %v2636_v15  ;;  %v2865_v15 = vld [vmem:[#allocation8 + $0x270] sm:$0xff]  ;;  %v2866_v16 = vld [vmem:[#allocation8 + $0x278] sm:$0xff] }
0x1005   : > { %3628 = vmatmul.mubr.msk.bf16.vlgmr.msra.gmra.mxu1 %vm903_vm3, %v2443_v19  ;;  %v2668_v19 = vld [vmem:[#allocation7 + $0x3c0] sm:$0xff] }
0x1006   : > { %2764 = vmatprep.mubr.bf16.mxu1 %v4013_v43  ;;  %v2705_v24 = vpack.c.bf16 %v2672_v23, %v2668_v19  ;;  %v2629_v19 = vld [vmem:[#allocation7 + $0x288] sm:$0xff] }
0x1007   : > { %v2633_v23 = vld [vmem:[#allocation7 + $0x2a8] sm:$0xff] }
0x1008   : > { %2733 = vmatpush1.bf16.msra.mxu1 %v2705_v24  ;;  %v2686_v24 = vpack.c.bf16 %v2633_v23, %v2629_v19  ;;  %v2879_v23 = vld [vmem:[#allocation8 + $0x2e0] sm:$0xff] }
0x1009   : > { %2734 = vmatprep.subr.bf16.mxu1 %v2702_v34  ;;  %v2685_v34 = vpack.c.bf16 %v2632_v33, %v2628_v27  ;;  %v2863_v27 = vld [vmem:[#allocation8 + $0x260] sm:$0xff] }
0x100c   : > { %2735 = vmatpush1.bf16.msra.mxu1 %v2701_v41 }
0x10b5   : > { %v2262_v51 = vpop.f32.mrf.mxu1 }
0x10b6   : > { %2493 = vrot.lane.b32.xlu0 %v2262_v51, %s4017_s20  ;;  %v2657_v51 = vld [vmem:[#allocation7 + $0x368] sm:$0xff] }
0x10b7   : > { %v3605_v52 = vpop.f32.mrf.mxu1  ;;  %v2698_v53 = vpack.c.bf16 %v2657_v51, %v2653_v49  ;;  %v2626_v49 = vld [vmem:[#allocation7 + $0x270] sm:$0xff]  ;;  %v2613_v51 = vld [vmem:[#allocation7 + $0x208] sm:$0xff] }
0x10b8   : > { %v2655_v52 = vld [vmem:[#allocation7 + $0x358] sm:$0xff] }
0x10b9   : > { %v2265_v57 = vpop.f32.mrf.mxu1  ;;  %2736 = vmatprep.subr.bf16.mxu1 %v2698_v53  ;;  %v2615_v53 = vld [vmem:[#allocation7 + $0x218] sm:$0xff] }
0x10ba   : > { %v2656_v57 = vld [vmem:[#allocation7 + $0x360] sm:$0xff] }
0x10bb   : > { %v3606_v58 = vpop.f32.mrf.mxu1 }
0x10bc   : > { %v2700_v58 = vpack.c.bf16 %v2659_v55, %v2655_v52  ;;  %v2617_v52 = vld [vmem:[#allocation7 + $0x228] sm:$0xff]  ;;  %v2619_v55 = vld [vmem:[#allocation7 + $0x238] sm:$0xff] }
0x10bd   : > { %v2374_v59 = vpop.f32.mrf.mxu1 }
0x10be   : > { %2497 = vrot.lane.b32.xlu1 %v2374_v59, %s4015_s24  ;;  %v2697_v59 = vpack.c.bf16 %v2656_v57, %v2652_v56 }
0x10bf   : > { %v3617_v61 = vpop.f32.mrf.mxu1 }
0x10c0   : > { %v2654_v61 = vld [vmem:[#allocation7 + $0x350] sm:$0xff]  ;;  %2737 = vmatpush1.bf16.msra.mxu1 %v2697_v59  ;;  %v2612_v59 = vld [vmem:[#allocation7 + $0x200] sm:$0xff] }
0x10c1   : > { %v2377_v62 = vpop.f32.mrf.mxu1 }
0x10c2   : > { %v2658_v62 = vld [vmem:[#allocation7 + $0x370] sm:$0xff] }
0x10c3   : > { %v3618_v60 = vpop.f32.mrf.mxu1 }
0x10c4   : > { %v2699_v60 = vpack.c.bf16 %v2658_v62, %v2654_v61  ;;  %v2616_v61 = vld [vmem:[#allocation7 + $0x220] sm:$0xff]  ;;  %v2680_v62 = vpack.c.bf16 %v2619_v55, %v2615_v53  ;;  %v2876_v55 = vld [vmem:[#allocation8 + $0x2c8] sm:$0xff] }
0x10c5   : > { %v2486_v63 = vpop.f32.mrf.mxu1 }
0x10c6   : > { %2501 = vrot.lane.b32.xlu0 %v2486_v63, %s4016_s19  ;;  %v2645_v63 = vld [vmem:[#allocation7 + $0x308] sm:$0xff]  ;;  %s4709_s19 = sld [smem:[#allocation24_spill]] }
0x10c7   : > { %v3629_v0 = vpop.f32.mrf.mxu1 }
0x10c8   : > { %v2649_v0 = vld [vmem:[#allocation7 + $0x328] sm:$0xff] }
0x10c9   : > { %v2489_v1 = vpop.f32.mrf.mxu1 }
0x10ca   : > { %v2647_v1 = vld [vmem:[#allocation7 + $0x318] sm:$0xff] }
0x10cb   : > { %v3630_v40 = vpop.f32.mrf.mxu1 }
0x10cc   : > { %v2694_v40 = vpack.c.bf16 %v2649_v0, %v2645_v63  ;;  %v2618_v63 = vld [vmem:[#allocation7 + $0x230] sm:$0xff]  ;;  %v2677_v0 = vpack.c.bf16 %v2616_v61, %v2612_v59  ;;  %v2859_v61 = vld [vmem:[#allocation8 + $0x240] sm:$0xff]  ;;  %s4629_s30 = scalar_lea.hbm %s4709_s19, %s3307_s25 }
0x10ce   : > { %2738 = vmatprep.subr.bf16.mxu1 %v2694_v40 }
0x1128   : > { %v2494_v3 = vpop.permute.xlu0 %2493 }
0x1129   : > { %v2504_v6 = vsel %vm848_vm2, %v4481_v21, %v2494_v3  ;;  %v2651_v3 = vld [vmem:[#allocation7 + $0x338] sm:$0xff] }
0x1130   : > { %v2498_v4 = vpop.permute.xlu1 %2497 }
0x1131   : > { %v2505_v7 = vsel %vm1315_vm4, %v2504_v6, %v2498_v4  ;;  %v2644_v4 = vld [vmem:[#allocation7 + $0x300] sm:$0xff] }
0x1132   : > { %v2648_v6 = vld [vmem:[#allocation7 + $0x320] sm:$0xff] }
0x1138   : > { %v2502_v8 = vpop.permute.xlu0 %2501 }
0x1139   : > { %v2506_v9 = vsel %vm1317_vm5, %v2505_v7, %v2502_v8  ;;  %v2696_v7 = vpack.c.bf16 %v2651_v3, %v2647_v1  ;;  %v2693_v8 = vpack.c.bf16 %v2648_v6, %v2644_v4 }
0x113a   : > { %v2524_v10 = vpack.c.bf16 %v2506_v9, %v2506_v9  ;;  %v2646_v9 = vld [vmem:[#allocation7 + $0x310] sm:$0xff] }
0x113b   : > { %2739 = vmatpush1.bf16.msra.mxu1 %v2693_v8 }
0x113c   : > { %3648 = vmatmul.mubr.bf16.vlgmr.msra.gmra.mxu0 %v2524_v10  ;;  %v2650_v10 = vld [vmem:[#allocation7 + $0x330] sm:$0xff] }
0x113d   : > { %2805 = vmatprep.mubr.bf16.mxu0 %v4013_v43  ;;  %v2708_v43 = vpack.c.bf16 %v2675_v18, %v2671_v2  ;;  %v2638_v2 = vld [vmem:[#allocation7 + $0x2d0] sm:$0xff] }
0x113e   : > { %v2642_v18 = vld [vmem:[#allocation7 + $0x2f0] sm:$0xff] }
0x113f   : > { %2773 = vmatprep.subr.bf16.mxu0 %v2708_v43  ;;  %v2691_v43 = vpack.c.bf16 %v2642_v18, %v2638_v2  ;;  %v2926_v2 = vpack.c.bf16 %v2866_v16, %v2865_v15  ;;  %v2898_v18 = vld [vmem:[#allocation8 + $0x378] sm:$0xff] }
0x1140   : > { %2774 = vmatpush1.bf16.msra.mxu0 %v2707_v29  ;;  %v2688_v29 = vpack.c.bf16 %v2635_v26, %v2631_v25  ;;  %v2912_v26 = vld [vmem:[#allocation8 + $0x3e8] sm:$0xff] }
0x11fc   : > { %v2575_v11 = vpop.f32.mrf.mxu0 }
0x11fd   : > { %v2576_v12 = vadd.f32 %v3295_v39, %v2575_v11  ;;  %v2637_v39 = vld [vmem:[#allocation7 + $0x2c8] sm:$0xff]  ;;  %v2695_v11 = vpack.c.bf16 %v2650_v10, %v2646_v9  ;;  %v3299_v9 = vld [vmem:[%s4673_s9 + $0x1] ss:$0 sm:$0xff] }
0x11fe   : > { %v3649_v13 = vpop.f32.mrf.mxu0 }
0x11ff   : > { %v2581_v14 = vadd.f32 %v2576_v12, %v4427_v32  ;;  %v2667_v32 = vld [vmem:[#allocation7 + $0x3b8] sm:$0xff]  ;;  %v2641_v12 = vld [vmem:[#allocation7 + $0x2e8] sm:$0xff] }
0x1200   : > { %v2578_v54 = vpop.f32.mrf.mxu0  ;;  %v2704_v35 = vpack.c.bf16 %v2667_v32, %v2663_v20  ;;  %v2639_v13 = vld [vmem:[#allocation7 + $0x2d8] sm:$0xff]  ;;  %v2630_v20 = vld [vmem:[#allocation7 + $0x290] sm:$0xff] }
0x1201   : > { %2586 = vadd.xlane.f32.xlu1 %v2581_v14  ;;  %v2690_v54 = vpack.c.bf16 %v2641_v12, %v2637_v39  ;;  %v2634_v32 = vld [vmem:[#allocation7 + $0x2b0] sm:$0xff] }
0x1202   : > { %v3650_v21 = vpop.f32.mrf.mxu0  ;;  %2775 = vmatprep.subr.bf16.mxu0 %v2704_v35  ;;  %v2621_v35 = vld [vmem:[#allocation7 + $0x248] sm:$0xff]  ;;  %v2687_v38 = vpack.c.bf16 %v2634_v32, %v2630_v20  ;;  %v2881_v12 = vld [vmem:[#allocation8 + $0x2f0] sm:$0xff]  ;;  %v2895_v32 = vld [vmem:[#allocation8 + $0x360] sm:$0xff] }
0x1203   : > { %2776 = vmatpush1.bf16.msra.mxu0 %v2703_v44  ;;  %2740 = vmatprep.subr.bf16.mxu1 %v2690_v54  ;;  %v2682_v41 = vpack.c.bf16 %v2625_v36, %v2621_v35  ;;  %v2620_v44 = vld [vmem:[#allocation7 + $0x240] sm:$0xff]  ;;  %v2877_v36 = vld [vmem:[#allocation8 + $0x2d0] sm:$0xff] }
0x1204   : > { %2777 = vmatprep.subr.bf16.mxu0 %v2700_v58  ;;  %2741 = vmatpush1.bf16.msra.mxu1 %v2689_v17  ;;  %v2678_v58 = vpack.c.bf16 %v2617_v52, %v2613_v51  ;;  %v2897_v17 = vld [vmem:[#allocation8 + $0x370] sm:$0xff]  ;;  %v2894_v51 = vld [vmem:[#allocation8 + $0x358] sm:$0xff]  ;;  %v2875_v52 = vld [vmem:[#allocation8 + $0x2c0] sm:$0xff] }
0x1205   : > { %2742 = vmatprep.subr.bf16.mxu1 %v2686_v24  ;;  %v2942_v19 = vpack.c.bf16 %v2898_v18, %v2897_v17  ;;  %v2911_v24 = vld [vmem:[#allocation8 + $0x3e0] sm:$0xff]  ;;  %v2856_v17 = vld [vmem:[#allocation8 + $0x228] sm:$0xff] }
0x1206   : > { %v2949_v33 = vpack.c.bf16 %v2912_v26, %v2911_v24  ;;  %v2870_v24 = vld [vmem:[#allocation8 + $0x298] sm:$0xff] }
0x1207   : > { %2778 = vmatpush1.bf16.msra.mxu0 %v2699_v60  ;;  %v2614_v60 = vld [vmem:[#allocation7 + $0x210] sm:$0xff]  ;;  %v2902_v26 = vld [vmem:[#allocation8 + $0x398] sm:$0xff] }
0x1208   : > { %2779 = vmatprep.subr.bf16.mxu0 %v2696_v7  ;;  %2743 = vmatpush1.bf16.msra.mxu1 %v2685_v34  ;;  %v2679_v1 = vpack.c.bf16 %v2618_v63, %v2614_v60  ;;  %v3298_v7 = vld [vmem:[%s4672_s8 + $0x1] ss:$0 sm:$0xff]  ;;  %v2896_v34 = vld [vmem:[#allocation8 + $0x368] sm:$0xff] }
0x1209   : > { %2744 = vmatprep.subr.bf16.mxu1 %v2682_v41  ;;  %v2941_v35 = vpack.c.bf16 %v2896_v34, %v2895_v32  ;;  %v2891_v60 = vld [vmem:[#allocation8 + $0x340] sm:$0xff]  ;;  %v2854_v32 = vld [vmem:[#allocation8 + $0x218] sm:$0xff]  ;;  %v2885_v34 = vld [vmem:[#allocation8 + $0x310] sm:$0xff] }
0x120b   : > { %2780 = vmatpush1.bf16.msra.mxu0 %v2695_v11 }
0x128a   : > { %v2587_v45 = vpop.xlane.xlu1 %2586 }
0x128b   : > { %v2588_v46 = vmul.f32 0.0078125, %v2587_v45  ;;  %v2624_v45 = vld [vmem:[#allocation7 + $0x260] sm:$0xff] }
0x128c   : > { %v2681_v56 = vpack.c.bf16 %v2624_v45, %v2620_v44  ;;  %v2861_v44 = vld [vmem:[#allocation8 + $0x250] sm:$0xff]  ;;  %v2862_v45 = vld [vmem:[#allocation8 + $0x258] sm:$0xff] }
0x128d   : > { %v4530_v47 = vsub.f32 %v2581_v14, %v2588_v46  ;;  %v2643_v14 = vld [vmem:[#allocation7 + $0x2f8] sm:$0xff]  ;;  %v2684_v46 = vpack.c.bf16 %v2627_v42, %v2623_v37 }
0x128e   : > { %v2692_v21 = vpack.c.bf16 %v2643_v14, %v2639_v13  ;;  %2745 = vmatpush1.bf16.msra.mxu1 %v2681_v56  ;;  %v2882_v13 = vld [vmem:[#allocation8 + $0x2f8] sm:$0xff]  ;;  %v2913_v14 = vld [vmem:[#allocation8 + $0x3f0] sm:$0xff]  ;;  %v2907_v56 = vld [vmem:[#allocation8 + $0x3c0] sm:$0xff] }
0x128f   : > { %v2590_v48 = vmul.f32 %v4530_v47, %v4530_v47  ;;  %2746 = vmatprep.subr.bf16.mxu1 %v2678_v58  ;;  %v2934_v54 = vpack.c.bf16 %v2882_v13, %v2881_v12  ;;  %v2878_v37 = vld [vmem:[#allocation8 + $0x2d8] sm:$0xff]  ;;  %v2931_v58 = vpack.c.bf16 %v2876_v55, %v2875_v52  ;;  %v2883_v52 = vld [vmem:[#allocation8 + $0x300] sm:$0xff] }
0x1290   : > { %2781 = vmatprep.subr.bf16.mxu0 %v2692_v21  ;;  %v2914_v21 = vld [vmem:[#allocation8 + $0x3f8] sm:$0xff]  ;;  %v2932_v41 = vpack.c.bf16 %v2878_v37, %v2877_v36  ;;  %v2867_v37 = vld [vmem:[#allocation8 + $0x280] sm:$0xff] }
0x1291   : > { %2591 = vadd.xlane.f32.xlu0 %v2590_v48  ;;  %2782 = vmatpush1.bf16.msra.mxu0 %v2691_v43  ;;  %v2622_v48 = vld [vmem:[#allocation7 + $0x250] sm:$0xff]  ;;  %v2880_v43 = vld [vmem:[#allocation8 + $0x2e8] sm:$0xff]  ;;  %v2910_v42 = vld [vmem:[#allocation8 + $0x3d8] sm:$0xff] }
0x1292   : > { %2783 = vmatprep.subr.bf16.mxu0 %v2688_v29  ;;  %v2683_v57 = vpack.c.bf16 %v2626_v49, %v2622_v48  ;;  %2747 = vmatpush1.bf16.msra.mxu1 %v2677_v0  ;;  %v2933_v25 = vpack.c.bf16 %v2880_v43, %v2879_v23  ;;  %v2864_v29 = vld [vmem:[#allocation8 + $0x268] sm:$0xff]  ;;  %v2924_v48 = vpack.c.bf16 %v2862_v45, %v2861_v44  ;;  %v2893_v49 = vld [vmem:[#allocation8 + $0x350] sm:$0xff]  ;;  %v2890_v12 = vld [vmem:[#allocation8 + $0x338] sm:$0xff] }
0x1293   : > { %3422 = vmatprep.subr.bf16.mxu1 %v2934_v54  ;;  %v2925_v20 = vpack.c.bf16 %v2864_v29, %v2863_v27  ;;  %v2940_v53 = vpack.c.bf16 %v2894_v51, %v2893_v49  ;;  %v2892_v0 = vld [vmem:[#allocation8 + $0x348] sm:$0xff]  ;;  %v2869_v43 = vld [vmem:[#allocation8 + $0x290] sm:$0xff]  ;;  %v2886_v36 = vld [vmem:[#allocation8 + $0x318] sm:$0xff] }
0x1294   : > { %v2872_v54 = vld [vmem:[#allocation8 + $0x2a8] sm:$0xff]  ;;  %v2936_v45 = vpack.c.bf16 %v2886_v36, %v2885_v34 }
0x1295   : > { %2784 = vmatpush1.bf16.msra.mxu0 %v2687_v38  ;;  %v2909_v38 = vld [vmem:[#allocation8 + $0x3d0] sm:$0xff]  ;;  %v2888_v23 = vld [vmem:[#allocation8 + $0x328] sm:$0xff] }
0x1296   : > { %2785 = vmatprep.subr.bf16.mxu0 %v2684_v46  ;;  %v2948_v46 = vpack.c.bf16 %v2910_v42, %v2909_v38  ;;  %v2868_v38 = vld [vmem:[#allocation8 + $0x288] sm:$0xff] }
0x1297   : > { %v2900_v42 = vld [vmem:[#allocation8 + $0x388] sm:$0xff] }
0x1298   : > { %v2852_v49 = vld [vmem:[#allocation8 + $0x208] sm:$0xff] }
0x1299   : > { %2786 = vmatpush1.bf16.msra.mxu0 %v2683_v57  ;;  %v2908_v57 = vld [vmem:[#allocation8 + $0x3c8] sm:$0xff] }
0x129a   : > { %2787 = vmatprep.subr.bf16.mxu0 %v2680_v62  ;;  %v2947_v59 = vpack.c.bf16 %v2908_v57, %v2907_v56  ;;  %v2860_v62 = vld [vmem:[#allocation8 + $0x248] sm:$0xff]  ;;  %v3300_v57 = vld [vmem:[%s4675_s11 + $0x4] sm:$0xf] }
0x129b   : > { %v2923_v63 = vpack.c.bf16 %v2860_v62, %v2859_v61  ;;  %v2719_v61 = vrot.slane %v3300_v57, %v4278_v30  ;;  %v2727_v62 = vrot.slane %v3300_v57, %v1532_v50 }
0x129d   : > { %2788 = vmatpush1.bf16.msra.mxu0 %v2679_v1  ;;  %v2873_v1 = vld [vmem:[#allocation8 + $0x2b0] sm:$0xff] }
0x131a   : > { %v2592_v40 = vpop.xlane.xlu0 %2591 }
0x131b   : > { %v2593_v3 = vmul.f32 0.0078125, %v2592_v40  ;;  %v2874_v40 = vld [vmem:[#allocation8 + $0x2b8] sm:$0xff] }
0x131d   : > { %v2594_v4 = vadd.f32 1e-12, %v2593_v3  ;;  %v2939_v3 = vpack.c.bf16 %v2892_v0, %v2891_v60 }
0x131f   : > { %3809 = vrsqrt.f32 %v2594_v4  ;;  %v2930_v4 = vpack.c.bf16 %v2874_v40, %v2873_v1 }
0x132c   : > { %v3810_v6 = vpop.eup %3809 }
0x132d   : > { %v2596_v8 = vmul.f32 %v3810_v6, %v4530_v47  ;;  %v2950_v47 = vpack.c.bf16 %v2914_v21, %v2913_v14  ;;  %v2905_v6 = vld [vmem:[#allocation8 + $0x3b0] sm:$0xff]  ;;  %v2871_v14 = vld [vmem:[#allocation8 + $0x2a0] sm:$0xff] }
0x132e   : > { %v2903_v21 = vld [vmem:[#allocation8 + $0x3a0] sm:$0xff]  ;;  %v2929_v16 = vpack.c.bf16 %v2872_v54, %v2871_v14 }
0x132f   : > { %v2603_v10 = vmul.f32 %v3298_v7, %v2596_v8  ;;  %3444 = vmatprep.subr.bf16.mxu0 %v2950_v47  ;;  %v2906_v7 = vld [vmem:[#allocation8 + $0x3b8] sm:$0xff]  ;;  %v2857_v8 = vld [vmem:[#allocation8 + $0x230] sm:$0xff]  ;;  %v2904_v47 = vld [vmem:[#allocation8 + $0x3a8] sm:$0xff] }
0x1330   : > { %v2945_v18 = vpack.c.bf16 %v2904_v47, %v2903_v21 }
0x1331   : > { %v4541_v39 = vadd.f32 %v3299_v9, %v2603_v10  ;;  %v2946_v9 = vpack.c.bf16 %v2906_v7, %v2905_v6  ;;  %v2858_v10 = vld [vmem:[#allocation8 + $0x238] sm:$0xff] }
0x1332   : > { %v2922_v13 = vpack.c.bf16 %v2858_v10, %v2857_v8 }
0x1333   : > { %v2676_v11 = vpack.c.bf16 %v4541_v39, %v4541_v39 }
0x1335   : > { %2765 = vmatmul.mubr.bf16.vlgmr.msra.gmra.mxu1 %v2676_v11  ;;  %2806 = vmatmul.mubr.bf16.vlgmr.msra.gmra.mxu0 %v2676_v11  ;;  %v2889_v11 = vld [vmem:[#allocation8 + $0x330] sm:$0xff] }
0x1336   : > { %3423 = vmatpush3.bf16.msra.mxu1 %v2926_v2  ;;  %3445 = vmatpush3.bf16.msra.mxu0 %v2942_v19  ;;  %v2938_v15 = vpack.c.bf16 %v2890_v12, %v2889_v11  ;;  %v2855_v2 = vld [vmem:[#allocation8 + $0x220] sm:$0xff] }
0x1337   : > { %3424 = vmatprep.subr.bf16.mxu1 %v2933_v25  ;;  %3446 = vmatprep.subr.bf16.mxu0 %v2949_v33  ;;  %v2887_v19 = vld [vmem:[#allocation8 + $0x320] sm:$0xff]  ;;  %v2901_v25 = vld [vmem:[#allocation8 + $0x390] sm:$0xff]  ;;  %v2921_v27 = vpack.c.bf16 %v2856_v17, %v2855_v2  ;;  %v2928_v33 = vpack.c.bf16 %v2870_v24, %v2869_v43 }
0x1338   : > { %v2937_v29 = vpack.c.bf16 %v2888_v23, %v2887_v19 }
0x133a   : > { %3425 = vmatpush3.bf16.msra.mxu1 %v2925_v20  ;;  %3447 = vmatpush3.bf16.msra.mxu0 %v2941_v35  ;;  %v2853_v20 = vld [vmem:[#allocation8 + $0x210] sm:$0xff]  ;;  %v2944_v35 = vpack.c.bf16 %v2902_v26, %v2901_v25 }
0x133b   : > { %3426 = vmatprep.subr.bf16.mxu1 %v2932_v41  ;;  %3448 = vmatprep.subr.bf16.mxu0 %v2948_v46  ;;  %v2899_v41 = vld [vmem:[#allocation8 + $0x380] sm:$0xff]  ;;  %v2920_v44 = vpack.c.bf16 %v2854_v32, %v2853_v20  ;;  %v2927_v46 = vpack.c.bf16 %v2868_v38, %v2867_v37 }
0x133c   : > { %v2943_v51 = vpack.c.bf16 %v2900_v42, %v2899_v41 }
0x133e   : > { %3427 = vmatpush3.bf16.msra.mxu1 %v2924_v48  ;;  %3449 = vmatpush3.bf16.msra.mxu0 %v2940_v53  ;;  %v2851_v48 = vld [vmem:[#allocation8 + $0x200] sm:$0xff]  ;;  %v2884_v53 = vld [vmem:[#allocation8 + $0x308] sm:$0xff] }
0x133f   : > { %3428 = vmatprep.subr.bf16.mxu1 %v2931_v58  ;;  %3450 = vmatprep.subr.bf16.mxu0 %v2947_v59  ;;  %v2919_v55 = vpack.c.bf16 %v2852_v49, %v2851_v48  ;;  %v2935_v56 = vpack.c.bf16 %v2884_v53, %v2883_v52  ;;  %v2715_v58 = vrot.slane %v3300_v57, %v4281_v31  ;;  %v3302_v53 = vld [vmem:[%s4677_s13 + $0x1] ss:$0 sm:$0xff] }
0x1340   : > { %v2723_v59 = vrot.slane %v3300_v57, %v4272_v28 }
0x1342   : > { %3429 = vmatpush3.bf16.msra.mxu1 %v2923_v63  ;;  %3451 = vmatpush3.bf16.msra.mxu0 %v2939_v3 }
0x1343   : > { %3430 = vmatprep.subr.bf16.mxu1 %v2930_v4  ;;  %3452 = vmatprep.subr.bf16.mxu0 %v2946_v9 }
0x1346   : > { %3431 = vmatpush3.bf16.msra.mxu1 %v2922_v13  ;;  %3453 = vmatpush3.bf16.msra.mxu0 %v2938_v15 }
0x1347   : > { %3432 = vmatprep.subr.bf16.mxu1 %v2929_v16  ;;  %3454 = vmatprep.subr.bf16.mxu0 %v2945_v18 }
0x134a   : > { %3433 = vmatpush3.bf16.msra.mxu1 %v2921_v27  ;;  %3455 = vmatpush3.bf16.msra.mxu0 %v2937_v29 }
0x134b   : > { %3434 = vmatprep.subr.bf16.mxu1 %v2928_v33  ;;  %3456 = vmatprep.subr.bf16.mxu0 %v2944_v35 }
0x134e   : > { %3435 = vmatpush3.bf16.msra.mxu1 %v2920_v44  ;;  %3457 = vmatpush3.bf16.msra.mxu0 %v2936_v45 }
0x134f   : > { %3436 = vmatprep.subr.bf16.mxu1 %v2927_v46  ;;  %3458 = vmatprep.subr.bf16.mxu0 %v2943_v51 }
0x1352   : > { %3437 = vmatpush3.bf16.msra.mxu1 %v2919_v55  ;;  %3459 = vmatpush3.bf16.msra.mxu0 %v2935_v56 }
0x1353   : > { %3651 = vmatprep.subr.bf16.mxu1 %v4012_v5 }
0x13f5   : > { %v2766_v60 = vpop.f32.mrf.mxu1  ;;  %v2807_v63 = vpop.f32.mrf.mxu0 }
0x13f6   : > { %v2767_v0 = vadd.f32 %v2766_v60, %v2715_v58  ;;  %v2808_v1 = vadd.f32 %v2807_v63, %v2723_v59 }
0x13f7   : > { %v2768_v40 = vpop.f32.mrf.mxu1  ;;  %v2809_v3 = vpop.f32.mrf.mxu0 }
0x13f8   : > { %v2818_v4 = vmul.f32 0.044715, %v2767_v0  ;;  %v2820_v6 = vmul.f32 0.044715, %v2808_v1  ;;  %v2769_v7 = vadd.f32 %v2768_v40, %v2719_v61  ;;  %v2810_v8 = vadd.f32 %v2809_v3, %v2727_v62  ;;  %v3083_v40 = vld [vmem:[%s4680_s16 + $0x70] sm:$0xff]  ;;  %v3084_v3 = vld [vmem:[%s4680_s16 + $0x78] sm:$0xff] }
0x13f9   : > { %v2770_v9 = vpop.f32.mrf.mxu1  ;;  %v2811_v10 = vpop.f32.mrf.mxu0  ;;  %v2814_v29 = vmul.f32 0.5, %v2767_v0  ;;  %v2816_v35 = vmul.f32 0.5, %v2808_v1 }
0x13fa   : > { %v2822_v31 = vmul.f32 %v2818_v4, %v2767_v0  ;;  %v2824_v11 = vmul.f32 %v2820_v6, %v2808_v1  ;;  %v2819_v28 = vmul.f32 0.044715, %v2769_v7  ;;  %v2821_v12 = vmul.f32 0.044715, %v2810_v8  ;;  %v3081_v4 = vld [vmem:[%s4680_s16 + $0x60] sm:$0xff] }
0x13fb   : > { %v2771_v30 = vpop.f32.mrf.mxu1  ;;  %v2812_v13 = vpop.f32.mrf.mxu0  ;;  %v2815_v32 = vmul.f32 0.5, %v2769_v7  ;;  %v2817_v36 = vmul.f32 0.5, %v2810_v8  ;;  %v3093_v6 = vpack.c.bf16 %v3084_v3, %v3083_v40 }
0x13fc   : > { %v2826_v22 = vmul.f32 %v2822_v31, %v2767_v0  ;;  %v2828_v50 = vmul.f32 %v2824_v11, %v2808_v1  ;;  %v2823_v14 = vmul.f32 %v2819_v28, %v2769_v7  ;;  %v2825_v54 = vmul.f32 %v2821_v12, %v2810_v8  ;;  %v3079_v11 = vld [vmem:[%s4680_s16 + $0x50] sm:$0xff]  ;;  %v3080_v28 = vld [vmem:[%s4680_s16 + $0x58] sm:$0xff]  ;;  %v3077_v30 = vld [vmem:[%s4680_s16 + $0x40] sm:$0xff] }
0x13fd   : > { %v3091_v12 = vpack.c.bf16 %v3080_v28, %v3079_v11  ;;  %v3078_v13 = vld [vmem:[%s4680_s16 + $0x48] sm:$0xff] }
0x13fe   : > { %v2830_v21 = vadd.f32 %v2826_v22, %v2767_v0  ;;  %v2832_v15 = vadd.f32 %v2828_v50, %v2808_v1  ;;  %v2827_v16 = vmul.f32 %v2823_v14, %v2769_v7  ;;  %v2829_v47 = vmul.f32 %v2825_v54, %v2810_v8  ;;  %v3075_v50 = vld [vmem:[%s4680_s16 + $0x30] sm:$0xff]  ;;  %v3076_v14 = vld [vmem:[%s4680_s16 + $0x38] sm:$0xff] }
0x13ff   : > { %v3090_v22 = vpack.c.bf16 %v3078_v13, %v3077_v30  ;;  %v3089_v54 = vpack.c.bf16 %v3076_v14, %v3075_v50 }
0x1400   : > { %v2834_v2 = vmul.f32 0.7978846, %v2830_v21  ;;  %v2836_v17 = vmul.f32 0.7978846, %v2832_v15  ;;  %v2831_v18 = vadd.f32 %v2827_v16, %v2769_v7  ;;  %v2833_v19 = vadd.f32 %v2829_v47, %v2810_v8  ;;  %v3082_v7 = vld [vmem:[%s4680_s16 + $0x68] sm:$0xff]  ;;  %v3073_v21 = vld [vmem:[%s4680_s16 + $0x20] sm:$0xff] }
0x1401   : > { %v3074_v15 = vld [vmem:[%s4680_s16 + $0x28] sm:$0xff]  ;;  %v3071_v47 = vld [vmem:[%s4680_s16 + $0x10] sm:$0xff] }
0x1402   : > { %v2835_v23 = vmul.f32 0.7978846, %v2831_v18  ;;  %v2837_v43 = vmul.f32 0.7978846, %v2833_v19  ;;  %3811 = vtanh.f32 %v2834_v2  ;;  %v3088_v16 = vpack.c.bf16 %v3074_v15, %v3073_v21  ;;  %v3072_v2 = vld [vmem:[%s4680_s16 + $0x18] sm:$0xff]  ;;  %v3069_v18 = vld [vmem:[%s4680_s16] sm:$0xff] }
0x1403   : > { %3813 = vtanh.f32 %v2836_v17  ;;  %v3087_v17 = vpack.c.bf16 %v3072_v2, %v3071_v47  ;;  %v3070_v19 = vld [vmem:[%s4680_s16 + $0x8] sm:$0xff] }
0x1404   : > { %3815 = vtanh.f32 %v2835_v23  ;;  %v3086_v23 = vpack.c.bf16 %v3070_v19, %v3069_v18 }
0x1405   : > { %3817 = vtanh.f32 %v2837_v43 }
0x140f   : > { %v3812_v24 = vpop.eup %3811 }
0x1410   : > { %v3814_v25 = vpop.eup %3813  ;;  %v2842_v26 = vadd.f32 1.0, %v3812_v24 }
0x1411   : > { %v3816_v27 = vpop.eup %3815  ;;  %v2844_v33 = vadd.f32 1.0, %v3814_v25 }
0x1412   : > { %v3818_v20 = vpop.eup %3817  ;;  %v2843_v34 = vadd.f32 1.0, %v3816_v27  ;;  %v2846_v38 = vmul.f32 %v2842_v26, %v2814_v29  ;;  %v3305_v27 = vld [vmem:[%s4678_s14 + $0x1] ss:$0 sm:$0xff] }
0x1413   : > { %v2845_v37 = vadd.f32 1.0, %v3818_v20  ;;  %v2848_v42 = vmul.f32 %v2844_v33, %v2816_v35  ;;  %v3306_v33 = vld [vmem:[%s4679_s15 + $0x1] ss:$0 sm:$0xff] }
0x1414   : > { %v2847_v41 = vmul.f32 %v2843_v34, %v2815_v32  ;;  %v2915_v48 = vpack.c.bf16 %v2846_v38, %v2846_v38  ;;  %v3094_v34 = vld [vmem:[%s4681_s17] sm:$0x1] }
0x1415   : > { %v2849_v44 = vmul.f32 %v2845_v37, %v2817_v36  ;;  %v2917_v49 = vpack.c.bf16 %v2848_v42, %v2848_v42 }
0x1416   : > { %v2916_v45 = vpack.c.bf16 %v2847_v41, %v2847_v41 }
0x1417   : > { %v2918_v46 = vpack.c.bf16 %v2849_v44, %v2849_v44 }
0x1418   : > { %2991 = vmatprep.mubr.bf16.mxu1 %v2916_v45 }
0x1419   : > { %3031 = vmatprep.mubr.bf16.mxu0 %v2918_v46  ;;  %2992 = vmatmul.mubr.bf16.vlgmr.msra.gmra.mxu1 %v2915_v48 }
0x141a   : > { %3032 = vmatmul.mubr.bf16.vlgmr.msra.gmra.mxu0 %v2917_v49  ;;  %3667 = vmatprep.mubr.msk.bf16.mxu1 %vm4014_vm0, %v4012_v5 }
0x141b   : > { %3652 = vmatpush3.bf16.msra.mxu1 %v3093_v6 }
0x141c   : > { %3653 = vmatprep.subr.bf16.mxu1 %v4012_v5 }
0x14d9   : > { %v3438_v51 = vpop.f32.mrf.mxu1 }
0x14da   : > { %v3460_v52 = vpop.f32.mrf.mxu0 }
0x14db   : > { %v3439_v55 = vpop.f32.mrf.mxu1 }
0x14dc   : > { %v3440_v56 = vadd.f32 %v3439_v55, %v3438_v51  ;;  %v3461_v57 = vpop.f32.mrf.mxu0 }
0x14dd   : > { %v3441_v58 = vpop.f32.mrf.mxu1  ;;  %v3462_v61 = vadd.f32 %v3461_v57, %v3460_v52 }
0x14de   : > { %v2994_v59 = vadd.f32 %v3440_v56, %v3302_v53  ;;  %v3463_v62 = vpop.f32.mrf.mxu0 }
0x14df   : > { %v3442_v60 = vpop.f32.mrf.mxu1 }
0x14e0   : > { %v3034_v63 = vadd.f32 %v3462_v61, %v2994_v59  ;;  %v3464_v0 = vpop.f32.mrf.mxu0 }
0x14e2   : > { %v3039_v1 = vadd.f32 %v3034_v63, %v4541_v39  ;;  %v3092_v39 = vpack.c.bf16 %v3082_v7, %v3081_v4 }
0x14e4   : > { %3044 = vadd.xlane.f32.xlu0 %v3039_v1  ;;  %3654 = vmatpush3.bf16.msra.mxu1 %v3092_v39 }
0x14e5   : > { %3655 = vmatprep.subr.bf16.mxu1 %v4012_v5 }
0x14e8   : > { %3656 = vmatpush3.bf16.msra.mxu1 %v3091_v12 }
0x14e9   : > { %3657 = vmatprep.subr.bf16.mxu1 %v4012_v5 }
0x14ec   : > { %3658 = vmatpush3.bf16.msra.mxu1 %v3090_v22 }
0x14ed   : > { %3659 = vmatprep.subr.bf16.mxu1 %v4012_v5 }
0x14f0   : > { %3660 = vmatpush3.bf16.msra.mxu1 %v3089_v54 }
0x14f1   : > { %3661 = vmatprep.subr.bf16.mxu1 %v4012_v5 }
0x14f4   : > { %3662 = vmatpush3.bf16.msra.mxu1 %v3088_v16 }
0x14f5   : > { %3663 = vmatprep.subr.bf16.mxu1 %v4012_v5 }
0x14f8   : > { %3664 = vmatpush3.bf16.msra.mxu1 %v3087_v17 }
0x14f9   : > { %3665 = vmatprep.subr.bf16.mxu1 %v4012_v5 }
0x14fc   : > { %3666 = vmatpush3.bf16.msra.mxu1 %v3086_v23 }
0x156d   : > { %v3045_v8 = vpop.xlane.xlu0 %3044 }
0x156e   : > { %v3046_v9 = vmul.f32 0.0078125, %v3045_v8 }
0x1570   : > { %v3047_v10 = vsub.f32 %v3039_v1, %v3046_v9 }
0x1572   : > { %v3048_v31 = vmul.f32 %v3047_v10, %v3047_v10 }
0x1574   : > { %3049 = vadd.xlane.f32.xlu1 %v3048_v31 }
0x15fd   : > { %v3050_v43 = vpop.xlane.xlu1 %3049 }
0x15fe   : > { %v3051_v24 = vmul.f32 0.0078125, %v3050_v43 }
0x1600   : > { %v3052_v25 = vadd.f32 1e-12, %v3051_v24 }
0x1602   : > { %3819 = vrsqrt.f32 %v3052_v25 }
0x160f   : > { %v3820_v26 = vpop.eup %3819 }
0x1610   : > { %v3054_v29 = vmul.f32 %v3820_v26, %v3047_v10 }
0x1612   : > { %v3061_v20 = vmul.f32 %v3305_v27, %v3054_v29 }
0x1614   : > { %v3068_v32 = vadd.f32 %v3306_v33, %v3061_v20 }
0x1616   : > { %v3085_v5 = vpack.c.bf16 %v3068_v32, %v3068_v32 }
0x1618   : > { %3668 = vmatmul.mubr.bf16.vlgmr.msra.gmra.mxu1 %v3085_v5 }
0x16d8   : > { %v3129_v35 = vpop.f32.mrf.mxu1 }
0x16d9   : > { %v3130_v36 = vadd.f32 %v3129_v35, %v3094_v34 }
0x16da   : > { %v3669_v37 = vpop.f32.mrf.mxu1 }
0x16db   : > { %3821 = vtanh.f32 %v3130_v36 }
0x16dc   : > { %v3132_v38 = vpop.f32.mrf.mxu1 }
0x16de   : > { %v3670_v41 = vpop.f32.mrf.mxu1 }
0x16e8   : > { %v3822_v42 = vpop.eup %3821 }
0x16e9   : > { %3136 = vst [vmem:[%s635_s26] sm:$0x1] %v3822_v42 }
0x16ea   : > { %3941 = shalt.err (!%p3938_p11)
}
0x16eb   : > { %s3942_s22 = scalar_lea.hbm %s4629_s30, 16  ;;  %s3946_s26 = scalar_lea.hbm %s4709_s19, 32 }
0x16ec   : > { %p3943_p0 = scmp.ne.s32.totalorder %s4629_s30, %s3942_s22  ;;  %p3947_p3 = scmp.lt.s32.totalorder %s4629_s30, %s4709_s19 }
0x16ed   : > { %p3948_p10 = scmp.lt.s32.totalorder %s3946_s26, %s3942_s22 }
0x16ee   : > { %p3944_p1 = pnand %p3943_p0, %p4152_p5 }
0x16ef   : > { %p3949_p9 = por %p3948_p10, %p3947_p3 }
0x16f0   : > { %p3945_p2 = pneg %p3944_p1 }
0x16f2   : > { %p3950_p12 = pnand %p3949_p9, %p3945_p2 }
0x16f4   : > { %3953 = shalt.err (!%p3950_p12)
}
0x16f5   : > { %3687 = dma.vmem_to_hbm [thread:$0]  (%p4152_p5), %s3151_s23, 16, %s4629_s30, %s3138_s18  }
0x16f6 PF: > { %s4710_s27 = sld [smem:[#allocation17_spill]] }
0x16f7   : > { %s4711_s29 = sld [smem:[#allocation15_spill]] }
0x16fc   : > { %p3714_p13 = scmp.ge.s32.totalorder %s4710_s27, 2 }
0x16fd   : > { %s3162_s0 = sand.u32 1, %s4711_s29  }
0x16fe   : > { %p3703_p4 = pnand %p3714_p13, %p4156_p6  ;;  %s3163_s1 = scalar_lea.sflag [#allocation4], %s3162_s0 }
0x1700   : > { %p3704_p7 = pneg %p3703_p4 }
0x1702   : > { %3983 = dma.done.wait (%p3704_p7), %s3163_s1, 16  }
0x1703   : > { %3985 = vsyncadd (%p3704_p7), %s3163_s1, 4294967280  ;;  %s4713_s30 = sld [smem:[#allocation18_spill]]  ;;  %s4716_s27 = smov %s3992_s28 }
0x1704   : > { %s4714_s22 = sld [smem:[#allocation16_spill]] }
0x1705   : > { %s4715_s29 = sld [smem:[#allocation19_spill]] }
0x1709   : > { %p31_p8 = scmp.ge.s32.totalorder %s4713_s30, 4  }
0x170a   : > { %s4717_s28 = smov %s4714_s22 }
0x170b   :  { %33 = sbr.rel (!%p31_p8) target bundleno = 11 (0xb), region = 159 }
0x1710   :  { %3167 = vsyncpa [#allocation3], 1 }
0x1711   :  { %3169 = vsyncpa [#allocation3 + $0x1], 1 }
0x1712   :  { %3170 = vsyncpa [#allocation6], 1 }
0x1713   :  { %3171 = vsyncpa [#allocation9], 1 }
0x1714   :  { %3172 = vsyncpa [#allocation4], 1 }
0x1715   :  { %3174 = vsyncpa [#allocation4 + $0x1], 1 }

</bundles_post_ra>
